<compile_context>
chip_gen: v7x
topology: tpu7x:2x2x1
jax: 0.10.0
libtpu: 0.0.40
codegen_flags: <defaults>
</compile_context>

<pallas_src>
import jax
import jax.numpy as jnp
from jax.experimental import pallas as pl
from jax.experimental.pallas import tpu as pltpu

CONV_OUTPUT = 1024
STATE_VEC_DIM = 128


# ---------------------------------------------------------------------------
# Pallas kernel 1: fused  out = relu(x @ w + b)   (used for every conv layer)
# ---------------------------------------------------------------------------
def _matmul_bias_relu_kernel(x_ref, w_ref, b_ref, o_ref):
    y = jnp.dot(x_ref[...], w_ref[...], preferred_element_type=jnp.float32)
    y = jnp.maximum(y + b_ref[...], 0.0)
    o_ref[...] = y.astype(o_ref.dtype)


def fused_matmul_bias_relu(x, w, b_row, *, out_dtype=jnp.bfloat16, block_m=256):
    """x: [M, K] bf16, w: [K, N] bf16, b_row: [1, N] f32 -> relu(x@w+b) [M, N].

    M is tiled (parallel grid axis -> both TCs on v7x); K and N are small
    enough to keep as full blocks.  The partial last M block (if any) is
    handled by Pallas' masked writes.
    """
    M, K = x.shape
    K2, N = w.shape
    assert K == K2 and b_row.shape == (1, N)
    bm = M if M <= block_m else block_m          # block_m is a multiple of 8
    grid_m = pl.cdiv(M, bm)
    return pl.pallas_call(
        _matmul_bias_relu_kernel,
        out_shape=jax.ShapeDtypeStruct((M, N), out_dtype),
        grid=(grid_m,),
        in_specs=[
            pl.BlockSpec((bm, K), lambda i: (i, 0)),
            pl.BlockSpec((K, N), lambda i: (0, 0)),
            pl.BlockSpec((1, N), lambda i: (0, 0)),
        ],
        out_specs=pl.BlockSpec((bm, N), lambda i: (i, 0)),
        compiler_params=pltpu.CompilerParams(
            dimension_semantics=("parallel",),
            # Scaling guard: raises v5e's 16 MiB default scoped VMEM; well
            # under v7x's 64 MiB physical.  A no-op at these toy sizes.
            vmem_limit_bytes=32 * 1024 * 1024,
        ),
    )(x, w, b_row)


# ---------------------------------------------------------------------------
# Pallas kernel 2: fused head
#   q = (relu(feat @ W1a + vec @ W1b + b1)) @ W2 + b2
# ---------------------------------------------------------------------------
def _head_kernel(feat_ref, vec_ref, w1a_ref, w1b_ref, b1_ref, w2_ref, b2_ref,
                 q_ref):
    h = jnp.dot(feat_ref[...], w1a_ref[...], preferred_element_type=jnp.float32)
    h = h + jnp.dot(vec_ref[...], w1b_ref[...],
                    preferred_element_type=jnp.float32)
    h = jnp.maximum(h + b1_ref[...], 0.0)
    q = jnp.dot(h.astype(w2_ref.dtype), w2_ref[...],
                preferred_element_type=jnp.float32)
    q_ref[...] = (q + b2_ref[...]).astype(q_ref.dtype)


def fused_head(feat, vec, w1a, w1b, b1, w2, b2):
    """feat: [B,1024] bf16, vec: [B,128] bf16 -> Q values [B, A] f32."""
    B = feat.shape[0]
    A = w2.shape[1]
    full = lambda shape: pl.BlockSpec(shape, lambda i: (0,) * len(shape))
    # TODO(synk): tile B with a parallel grid axis if batch grows beyond ~256.
    return pl.pallas_call(
        _head_kernel,
        out_shape=jax.ShapeDtypeStruct((B, A), jnp.float32),
        grid=(1,),
        in_specs=[full(feat.shape), full(vec.shape), full(w1a.shape),
                  full(w1b.shape), full(b1.shape), full(w2.shape),
                  full(b2.shape)],
        out_specs=pl.BlockSpec((B, A), lambda i: (0, 0)),
        compiler_params=pltpu.CompilerParams(
            dimension_semantics=("arbitrary",)),
    )(feat, vec, w1a, w1b, b1, w2, b2)


# ---------------------------------------------------------------------------
# Conv2d (stride s, padding 0) via static-slice im2col + Pallas matmul (NHWC)
# ---------------------------------------------------------------------------
def _extract_patches_nhwc(x_nhwc, k, s):
    """[B, H, W, C] -> ([B*OH*OW, KH*KW*C], OH, OW).  No gather, no transpose.

    Patch flatten order is (KH, KW, C); conv weights are pre-flattened in the
    same order at param-conversion time.
    """
    B, H, W, C = x_nhwc.shape
    OH = (H - k) // s + 1
    OW = (W - k) // s + 1
    slices = []
    for dy in range(k):
        for dx in range(k):
            sl = jax.lax.slice(
                x_nhwc,
                (0, dy, dx, 0),
                (B, dy + (OH - 1) * s + 1, dx + (OW - 1) * s + 1, C),
                (1, s, s, 1))
            slices.append(sl)                       # [B, OH, OW, C]
    patches = jnp.stack(slices, axis=3)             # [B, OH, OW, k*k, C]
    return patches.reshape(B * OH * OW, k * k * C), OH, OW


def conv2d_relu_nhwc(x_nhwc, w_mat, b_row, *, stride, ksize):
    """Conv2d(padding=0) + ReLU on NHWC bf16 input, NHWC bf16 output."""
    B = x_nhwc.shape[0]
    oc = w_mat.shape[1]
    patches, OH, OW = _extract_patches_nhwc(x_nhwc, ksize, stride)
    out = fused_matmul_bias_relu(patches, w_mat, b_row)   # [B*OH*OW, OC]
    return out.reshape(B, OH, OW, oc)                     # free reshape, no transpose


# ---------------------------------------------------------------------------
# Parameter init (PyTorch layouts / init schemes) + one-time kernel conversion
# ---------------------------------------------------------------------------
def _uniform(key, shape, bound):
    return jax.random.uniform(key, shape, jnp.float32, -bound, bound)


def init_qnetwork_params(key, num_channels, num_actions):
    """Parameters in PyTorch tensor layouts with PyTorch init semantics:
    convs: kaiming_uniform_ (bound sqrt(6/fan_in)) + zero bias;
    head Linears: PyTorch default (bound 1/sqrt(fan_in) for weight AND bias).
    """
    ks = jax.random.split(key, 8)
    he = lambda k, shape, fan_in: _uniform(k, shape, jnp.sqrt(6.0 / fan_in))
    in_head = CONV_OUTPUT + STATE_VEC_DIM
    lin_bound = lambda fan_in: 1.0 / jnp.sqrt(float(fan_in))
    return {
        "conv1_w": he(ks[0], (32, num_channels, 8, 8), num_channels * 64),
        "conv1_b": jnp.zeros((32,), jnp.float32),
        "conv2_w": he(ks[1], (64, 32, 4, 4), 32 * 16),
        "conv2_b": jnp.zeros((64,), jnp.float32),
        "conv3_w": he(ks[2], (64, 64, 3, 3), 64 * 9),
        "conv3_b": jnp.zeros((64,), jnp.float32),
        "fc1_w": _uniform(ks[3], (512, in_head), lin_bound(in_head)),
        "fc1_b": _uniform(ks[4], (512,), lin_bound(in_head)),
        "fc2_w": _uniform(ks[5], (num_actions, 512), lin_bound(512)),
        "fc2_b": _uniform(ks[6], (num_actions,), lin_bound(512)),
    }


def prepare_kernel_params(tp):
    """One-time conversion torch-layout -> kernel layout (run once, not per
    forward): pre-flattened / pre-transposed bf16 weights, [1, N] f32 biases.
    """
    def conv_w(w):   # [OC, IC, KH, KW] -> [KH*KW*IC, OC]  ((kh, kw, c) order)
        OC, IC, KH, KW = w.shape
        return w.transpose(2, 3, 1, 0).reshape(KH * KW * IC, OC).astype(jnp.bfloat16)

    fc1_w = tp["fc1_w"]                              # [512, 1152] torch layout
    w1a = fc1_w[:, :CONV_OUTPUT].T                   # [1024, 512], rows in torch (C,H,W) order
    # Kernel-side conv features are flattened in (H, W, C) order; permute the
    # rows once here instead of transposing the activation every forward.
    # Last conv: 64 channels, 4x4 spatial (fixed by CONV_OUTPUT = 1024).
    w1a = w1a.reshape(64, 4, 4, 512).transpose(1, 2, 0, 3).reshape(CONV_OUTPUT, 512)
    w1b = fc1_w[:, CONV_OUTPUT:].T                   # [128, 512]
    return {
        "conv1_w": conv_w(tp["conv1_w"]), "conv1_b": tp["conv1_b"].reshape(1, -1),
        "conv2_w": conv_w(tp["conv2_w"]), "conv2_b": tp["conv2_b"].reshape(1, -1),
        "conv3_w": conv_w(tp["conv3_w"]), "conv3_b": tp["conv3_b"].reshape(1, -1),
        "fc1a_w": w1a.astype(jnp.bfloat16),
        "fc1b_w": w1b.astype(jnp.bfloat16),
        "fc1_b": tp["fc1_b"].reshape(1, -1),
        "fc2_w": tp["fc2_w"].T.astype(jnp.bfloat16),   # [512, num_actions]
        "fc2_b": tp["fc2_b"].reshape(1, -1),
    }


# ---------------------------------------------------------------------------
# QNetwork forward (shared=False, dueling_net=False — the module defaults)
# ---------------------------------------------------------------------------
def qnetwork_forward(params, states_nchw, state_vectors):
    # Single layout op: NCHW -> NHWC (+ bf16 cast) for the input image.
    x = jnp.transpose(states_nchw, (0, 2, 3, 1)).astype(jnp.bfloat16)
    # DQNBase: conv(8,s4)+ReLU -> conv(4,s2)+ReLU -> conv(3,s1)+ReLU -> Flatten
    h = conv2d_relu_nhwc(x, params["conv1_w"], params["conv1_b"], stride=4, ksize=8)
    h = conv2d_relu_nhwc(h, params["conv2_w"], params["conv2_b"], stride=2, ksize=4)
    h = conv2d_relu_nhwc(h, params["conv3_w"], params["conv3_b"], stride=1, ksize=3)
    B = h.shape[0]
    feat = h.reshape(B, -1)                          # [B, 1024] in (H,W,C) order;
                                                     # fc1a_w rows are pre-permuted to match.
    vec = state_vectors.astype(jnp.bfloat16)
    # Fused head: relu([feat|vec] @ W1 + b1) @ W2 + b2, one Pallas call,
    # no concatenate, no [B,512] HBM round trip.
    q = fused_head(feat, vec, params["fc1a_w"], params["fc1b_w"], params["fc1_b"],
                   params["fc2_w"], params["fc2_b"])
    return q
    # TODO(synk): dueling_net / shared branches not exercised (module defaults are False).


if __name__ == "__main__":
    key = jax.random.PRNGKey(0)
    k_param, k_img, k_vec = jax.random.split(key, 3)

    num_channels = 4
    num_actions = 6
    batch = 2
    # CONV_OUTPUT = 1024 forces 60x60 spatial input.
    states = jax.random.normal(k_img, (batch, num_channels, 60, 60), jnp.float32)
    state_vectors = jax.random.normal(k_vec, (batch, STATE_VEC_DIM), jnp.float32)

    torch_layout_params = init_qnetwork_params(k_param, num_channels, num_actions)
    params = prepare_kernel_params(torch_layout_params)   # one-time conversion

    q = jax.jit(qnetwork_forward)(params, states, state_vectors)
    q = jax.block_until_ready(q)
    assert q.shape == (batch, num_actions), q.shape
    assert q.dtype == jnp.float32
    print("KERNEL_OK")
</pallas_src>

<mosaic_0001>
module attributes {stable_mosaic.version = 11 : i64} {
  func.func @_matmul_bias_relu_kernel(%arg0: i32, %arg1: memref<256x256xbf16, #tpu.memory_space<vmem>>, %arg2: memref<256x32xbf16, #tpu.memory_space<vmem>>, %arg3: memref<1x32xf32, #tpu.memory_space<vmem>>, %arg4: memref<256x32xbf16, #tpu.memory_space<vmem>>) attributes {dimension_semantics = [#tpu.dimension_semantics<parallel>], iteration_bounds = array<i64: 2>, scalar_prefetch = 0 : i64, scratch_operands = 0 : i64, tpu.core_type = #tpu.core_type<tc>, window_params = [{transform_indices = @transform_0, window_bounds = array<i64: 256, 256>}, {pipeline_mode = #tpu.pipeline_mode<synchronous>, transform_indices = @transform_1, window_bounds = array<i64: 256, 32>}, {pipeline_mode = #tpu.pipeline_mode<synchronous>, transform_indices = @transform_2, window_bounds = array<i64: 1, 32>}, {transform_indices = @transform_3, window_bounds = array<i64: 256, 32>}]} {
    %c0 = arith.constant 0 : index
    %c0_0 = arith.constant 0 : index
    %0 = vector.load %arg1[%c0, %c0_0] : memref<256x256xbf16, #tpu.memory_space<vmem>>, vector<256x256xbf16>
    %c0_1 = arith.constant 0 : index
    %c0_2 = arith.constant 0 : index
    %1 = vector.load %arg2[%c0_1, %c0_2] : memref<256x32xbf16, #tpu.memory_space<vmem>>, vector<256x32xbf16>
    %cst = arith.constant dense<0.000000e+00> : vector<256x32xf32>
    %2 = tpu.matmul %0, %1, %cst {dimension_numbers = #tpu.dot_dimension_numbers<[1], [0], [0], [1], [0, 0, 1, 1], [], []>} : vector<256x256xbf16>, vector<256x32xbf16>, vector<256x32xf32> -> vector<256x32xf32>
    %c0_3 = arith.constant 0 : index
    %c0_4 = arith.constant 0 : index
    %3 = vector.load %arg3[%c0_3, %c0_4] : memref<1x32xf32, #tpu.memory_space<vmem>>, vector<1x32xf32>
    %4 = vector.broadcast %3 : vector<1x32xf32> to vector<256x32xf32>
    %5 = arith.addf %2, %4 : vector<256x32xf32>
    %cst_5 = arith.constant 0.000000e+00 : f32
    %6 = vector.broadcast %cst_5 : f32 to vector<256x32xf32>
    %7 = arith.maximumf %5, %6 : vector<256x32xf32>
    %8 = arith.truncf %7 : vector<256x32xf32> to vector<256x32xbf16>
    %c0_6 = arith.constant 0 : index
    %c0_7 = arith.constant 0 : index
    %9 = vector.load %arg4[%c0_6, %c0_7] : memref<256x32xbf16, #tpu.memory_space<vmem>>, vector<256x32xbf16>
    tpu.vector_store %arg4[%c0_6, %c0_7], %8 {strides = array<i32>} : memref<256x32xbf16, #tpu.memory_space<vmem>>, vector<256x32xbf16>,
    return
  }
  func.func @transform_0(%arg0: i32) -> (i32, i32) {
    %c0_i32 = arith.constant 0 : i32
    %c0_i32_0 = arith.constant 0 : i32
    return %arg0, %c0_i32 : i32, i32
  }
  func.func @transform_1(%arg0: i32) -> (i32, i32) {
    %c0_i32 = arith.constant 0 : i32
    %c0_i32_0 = arith.constant 0 : i32
    %c0_i32_1 = arith.constant 0 : i32
    return %c0_i32, %c0_i32_0 : i32, i32
  }
  func.func @transform_2(%arg0: i32) -> (i32, i32) {
    %c0_i32 = arith.constant 0 : i32
    %c0_i32_0 = arith.constant 0 : i32
    %c0_i32_1 = arith.constant 0 : i32
    return %c0_i32, %c0_i32_0 : i32, i32
  }
  func.func @transform_3(%arg0: i32) -> (i32, i32) {
    %c0_i32 = arith.constant 0 : i32
    %c0_i32_0 = arith.constant 0 : i32
    return %arg0, %c0_i32 : i32, i32
  }
}

module attributes {stable_mosaic.version = 11 : i64} {
  func.func @_matmul_bias_relu_kernel(%arg0: i32, %arg1: memref<72x512xbf16, #tpu.memory_space<vmem>>, %arg2: memref<512x64xbf16, #tpu.memory_space<vmem>>, %arg3: memref<1x64xf32, #tpu.memory_space<vmem>>, %arg4: memref<72x64xbf16, #tpu.memory_space<vmem>>) attributes {dimension_semantics = [#tpu.dimension_semantics<parallel>], iteration_bounds = array<i64: 1>, scalar_prefetch = 0 : i64, scratch_operands = 0 : i64, tpu.core_type = #tpu.core_type<tc>, window_params = [{transform_indices = @transform_0, window_bounds = array<i64: 72, 512>}, {pipeline_mode = #tpu.pipeline_mode<synchronous>, transform_indices = @transform_1, window_bounds = array<i64: 512, 64>}, {pipeline_mode = #tpu.pipeline_mode<synchronous>, transform_indices = @transform_2, window_bounds = array<i64: 1, 64>}, {transform_indices = @transform_3, window_bounds = array<i64: 72, 64>}]} {
    %c0 = arith.constant 0 : index
    %c0_0 = arith.constant 0 : index
    %0 = vector.load %arg1[%c0, %c0_0] : memref<72x512xbf16, #tpu.memory_space<vmem>>, vector<72x512xbf16>
    %c0_1 = arith.constant 0 : index
    %c0_2 = arith.constant 0 : index
    %1 = vector.load %arg2[%c0_1, %c0_2] : memref<512x64xbf16, #tpu.memory_space<vmem>>, vector<512x64xbf16>
    %cst = arith.constant dense<0.000000e+00> : vector<72x64xf32>
    %2 = tpu.matmul %0, %1, %cst {dimension_numbers = #tpu.dot_dimension_numbers<[1], [0], [0], [1], [0, 0, 1, 1], [], []>} : vector<72x512xbf16>, vector<512x64xbf16>, vector<72x64xf32> -> vector<72x64xf32>
    %c0_3 = arith.constant 0 : index
    %c0_4 = arith.constant 0 : index
    %3 = vector.load %arg3[%c0_3, %c0_4] : memref<1x64xf32, #tpu.memory_space<vmem>>, vector<1x64xf32>
    %4 = vector.broadcast %3 : vector<1x64xf32> to vector<72x64xf32>
    %5 = arith.addf %2, %4 : vector<72x64xf32>
    %cst_5 = arith.constant 0.000000e+00 : f32
    %6 = vector.broadcast %cst_5 : f32 to vector<72x64xf32>
    %7 = arith.maximumf %5, %6 : vector<72x64xf32>
    %8 = arith.truncf %7 : vector<72x64xf32> to vector<72x64xbf16>
    %c0_6 = arith.constant 0 : index
    %c0_7 = arith.constant 0 : index
    %9 = vector.load %arg4[%c0_6, %c0_7] : memref<72x64xbf16, #tpu.memory_space<vmem>>, vector<72x64xbf16>
    tpu.vector_store %arg4[%c0_6, %c0_7], %8 {strides = array<i32>} : memref<72x64xbf16, #tpu.memory_space<vmem>>, vector<72x64xbf16>,
    return
  }
  func.func @transform_0(%arg0: i32) -> (i32, i32) {
    %c0_i32 = arith.constant 0 : i32
    %c0_i32_0 = arith.constant 0 : i32
    return %arg0, %c0_i32 : i32, i32
  }
  func.func @transform_1(%arg0: i32) -> (i32, i32) {
    %c0_i32 = arith.constant 0 : i32
    %c0_i32_0 = arith.constant 0 : i32
    %c0_i32_1 = arith.constant 0 : i32
    return %c0_i32, %c0_i32_0 : i32, i32
  }
  func.func @transform_2(%arg0: i32) -> (i32, i32) {
    %c0_i32 = arith.constant 0 : i32
    %c0_i32_0 = arith.constant 0 : i32
    %c0_i32_1 = arith.constant 0 : i32
    return %c0_i32, %c0_i32_0 : i32, i32
  }
  func.func @transform_3(%arg0: i32) -> (i32, i32) {
    %c0_i32 = arith.constant 0 : i32
    %c0_i32_0 = arith.constant 0 : i32
    return %arg0, %c0_i32 : i32, i32
  }
}

module attributes {stable_mosaic.version = 11 : i64} {
  func.func @_matmul_bias_relu_kernel(%arg0: i32, %arg1: memref<32x576xbf16, #tpu.memory_space<vmem>>, %arg2: memref<576x64xbf16, #tpu.memory_space<vmem>>, %arg3: memref<1x64xf32, #tpu.memory_space<vmem>>, %arg4: memref<32x64xbf16, #tpu.memory_space<vmem>>) attributes {dimension_semantics = [#tpu.dimension_semantics<parallel>], iteration_bounds = array<i64: 1>, scalar_prefetch = 0 : i64, scratch_operands = 0 : i64, tpu.core_type = #tpu.core_type<tc>, window_params = [{transform_indices = @transform_0, window_bounds = array<i64: 32, 576>}, {pipeline_mode = #tpu.pipeline_mode<synchronous>, transform_indices = @transform_1, window_bounds = array<i64: 576, 64>}, {pipeline_mode = #tpu.pipeline_mode<synchronous>, transform_indices = @transform_2, window_bounds = array<i64: 1, 64>}, {transform_indices = @transform_3, window_bounds = array<i64: 32, 64>}]} {
    %c0 = arith.constant 0 : index
    %c0_0 = arith.constant 0 : index
    %0 = vector.load %arg1[%c0, %c0_0] : memref<32x576xbf16, #tpu.memory_space<vmem>>, vector<32x576xbf16>
    %c0_1 = arith.constant 0 : index
    %c0_2 = arith.constant 0 : index
    %1 = vector.load %arg2[%c0_1, %c0_2] : memref<576x64xbf16, #tpu.memory_space<vmem>>, vector<576x64xbf16>
    %cst = arith.constant dense<0.000000e+00> : vector<32x64xf32>
    %2 = tpu.matmul %0, %1, %cst {dimension_numbers = #tpu.dot_dimension_numbers<[1], [0], [0], [1], [0, 0, 1, 1], [], []>} : vector<32x576xbf16>, vector<576x64xbf16>, vector<32x64xf32> -> vector<32x64xf32>
    %c0_3 = arith.constant 0 : index
    %c0_4 = arith.constant 0 : index
    %3 = vector.load %arg3[%c0_3, %c0_4] : memref<1x64xf32, #tpu.memory_space<vmem>>, vector<1x64xf32>
    %4 = vector.broadcast %3 : vector<1x64xf32> to vector<32x64xf32>
    %5 = arith.addf %2, %4 : vector<32x64xf32>
    %cst_5 = arith.constant 0.000000e+00 : f32
    %6 = vector.broadcast %cst_5 : f32 to vector<32x64xf32>
    %7 = arith.maximumf %5, %6 : vector<32x64xf32>
    %8 = arith.truncf %7 : vector<32x64xf32> to vector<32x64xbf16>
    %c0_6 = arith.constant 0 : index
    %c0_7 = arith.constant 0 : index
    %9 = vector.load %arg4[%c0_6, %c0_7] : memref<32x64xbf16, #tpu.memory_space<vmem>>, vector<32x64xbf16>
    tpu.vector_store %arg4[%c0_6, %c0_7], %8 {strides = array<i32>} : memref<32x64xbf16, #tpu.memory_space<vmem>>, vector<32x64xbf16>,
    return
  }
  func.func @transform_0(%arg0: i32) -> (i32, i32) {
    %c0_i32 = arith.constant 0 : i32
    %c0_i32_0 = arith.constant 0 : i32
    return %arg0, %c0_i32 : i32, i32
  }
  func.func @transform_1(%arg0: i32) -> (i32, i32) {
    %c0_i32 = arith.constant 0 : i32
    %c0_i32_0 = arith.constant 0 : i32
    %c0_i32_1 = arith.constant 0 : i32
    return %c0_i32, %c0_i32_0 : i32, i32
  }
  func.func @transform_2(%arg0: i32) -> (i32, i32) {
    %c0_i32 = arith.constant 0 : i32
    %c0_i32_0 = arith.constant 0 : i32
    %c0_i32_1 = arith.constant 0 : i32
    return %c0_i32, %c0_i32_0 : i32, i32
  }
  func.func @transform_3(%arg0: i32) -> (i32, i32) {
    %c0_i32 = arith.constant 0 : i32
    %c0_i32_0 = arith.constant 0 : i32
    return %arg0, %c0_i32 : i32, i32
  }
}

module attributes {stable_mosaic.version = 11 : i64} {
  func.func @_head_kernel(%arg0: i32, %arg1: memref<2x1024xbf16, #tpu.memory_space<vmem>>, %arg2: memref<2x128xbf16, #tpu.memory_space<vmem>>, %arg3: memref<1024x512xbf16, #tpu.memory_space<vmem>>, %arg4: memref<128x512xbf16, #tpu.memory_space<vmem>>, %arg5: memref<1x512xf32, #tpu.memory_space<vmem>>, %arg6: memref<512x6xbf16, #tpu.memory_space<vmem>>, %arg7: memref<1x6xf32, #tpu.memory_space<vmem>>, %arg8: memref<2x6xf32, #tpu.memory_space<vmem>>) attributes {dimension_semantics = [#tpu.dimension_semantics<arbitrary>], iteration_bounds = array<i64: 1>, scalar_prefetch = 0 : i64, scratch_operands = 0 : i64, tpu.core_type = #tpu.core_type<tc>, window_params = [{pipeline_mode = #tpu.pipeline_mode<synchronous>, transform_indices = @transform_0, window_bounds = array<i64: 2, 1024>}, {pipeline_mode = #tpu.pipeline_mode<synchronous>, transform_indices = @transform_1, window_bounds = array<i64: 2, 128>}, {pipeline_mode = #tpu.pipeline_mode<synchronous>, transform_indices = @transform_2, window_bounds = array<i64: 1024, 512>}, {pipeline_mode = #tpu.pipeline_mode<synchronous>, transform_indices = @transform_3, window_bounds = array<i64: 128, 512>}, {pipeline_mode = #tpu.pipeline_mode<synchronous>, transform_indices = @transform_4, window_bounds = array<i64: 1, 512>}, {pipeline_mode = #tpu.pipeline_mode<synchronous>, transform_indices = @transform_5, window_bounds = array<i64: 512, 6>}, {pipeline_mode = #tpu.pipeline_mode<synchronous>, transform_indices = @transform_6, window_bounds = array<i64: 1, 6>}, {pipeline_mode = #tpu.pipeline_mode<synchronous>, transform_indices = @transform_7, window_bounds = array<i64: 2, 6>}]} {
    %c0 = arith.constant 0 : index
    %c0_0 = arith.constant 0 : index
    %0 = vector.load %arg1[%c0, %c0_0] : memref<2x1024xbf16, #tpu.memory_space<vmem>>, vector<2x1024xbf16>
    %c0_1 = arith.constant 0 : index
    %c0_2 = arith.constant 0 : index
    %1 = vector.load %arg3[%c0_1, %c0_2] : memref<1024x512xbf16, #tpu.memory_space<vmem>>, vector<1024x512xbf16>
    %cst = arith.constant dense<0.000000e+00> : vector<2x512xf32>
    %2 = tpu.matmul %0, %1, %cst {dimension_numbers = #tpu.dot_dimension_numbers<[1], [0], [0], [1], [0, 0, 1, 1], [], []>} : vector<2x1024xbf16>, vector<1024x512xbf16>, vector<2x512xf32> -> vector<2x512xf32>
    %c0_3 = arith.constant 0 : index
    %c0_4 = arith.constant 0 : index
    %3 = vector.load %arg2[%c0_3, %c0_4] : memref<2x128xbf16, #tpu.memory_space<vmem>>, vector<2x128xbf16>
    %c0_5 = arith.constant 0 : index
    %c0_6 = arith.constant 0 : index
    %4 = vector.load %arg4[%c0_5, %c0_6] : memref<128x512xbf16, #tpu.memory_space<vmem>>, vector<128x512xbf16>
    %cst_7 = arith.constant dense<0.000000e+00> : vector<2x512xf32>
    %5 = tpu.matmul %3, %4, %cst_7 {dimension_numbers = #tpu.dot_dimension_numbers<[1], [0], [0], [1], [0, 0, 1, 1], [], []>} : vector<2x128xbf16>, vector<128x512xbf16>, vector<2x512xf32> -> vector<2x512xf32>
    %6 = arith.addf %2, %5 : vector<2x512xf32>
    %c0_8 = arith.constant 0 : index
    %c0_9 = arith.constant 0 : index
    %7 = vector.load %arg5[%c0_8, %c0_9] : memref<1x512xf32, #tpu.memory_space<vmem>>, vector<1x512xf32>
    %8 = vector.broadcast %7 : vector<1x512xf32> to vector<2x512xf32>
    %9 = arith.addf %6, %8 : vector<2x512xf32>
    %cst_10 = arith.constant 0.000000e+00 : f32
    %10 = vector.broadcast %cst_10 : f32 to vector<2x512xf32>
    %11 = arith.maximumf %9, %10 : vector<2x512xf32>
    %12 = arith.truncf %11 : vector<2x512xf32> to vector<2x512xbf16>
    %c0_11 = arith.constant 0 : index
    %c0_12 = arith.constant 0 : index
    %13 = vector.load %arg6[%c0_11, %c0_12] : memref<512x6xbf16, #tpu.memory_space<vmem>>, vector<512x6xbf16>
    %cst_13 = arith.constant dense<0.000000e+00> : vector<2x6xf32>
    %14 = tpu.matmul %12, %13, %cst_13 {dimension_numbers = #tpu.dot_dimension_numbers<[1], [0], [0], [1], [0, 0, 1, 1], [], []>} : vector<2x512xbf16>, vector<512x6xbf16>, vector<2x6xf32> -> vector<2x6xf32>
    %c0_14 = arith.constant 0 : index
    %c0_15 = arith.constant 0 : index
    %15 = vector.load %arg7[%c0_14, %c0_15] : memref<1x6xf32, #tpu.memory_space<vmem>>, vector<1x6xf32>
    %16 = vector.broadcast %15 : vector<1x6xf32> to vector<2x6xf32>
    %17 = arith.addf %14, %16 : vector<2x6xf32>
    %c0_16 = arith.constant 0 : index
    %c0_17 = arith.constant 0 : index
    %18 = vector.load %arg8[%c0_16, %c0_17] : memref<2x6xf32, #tpu.memory_space<vmem>>, vector<2x6xf32>
    tpu.vector_store %arg8[%c0_16, %c0_17], %17 {strides = array<i32>} : memref<2x6xf32, #tpu.memory_space<vmem>>, vector<2x6xf32>,
    return
  }
  func.func @transform_0(%arg0: i32) -> (i32, i32) {
    %c0_i32 = arith.constant 0 : i32
    %c0_i32_0 = arith.constant 0 : i32
    %c0_i32_1 = arith.constant 0 : i32
    return %c0_i32, %c0_i32_0 : i32, i32
  }
  func.func @transform_1(%arg0: i32) -> (i32, i32) {
    %c0_i32 = arith.constant 0 : i32
    %c0_i32_0 = arith.constant 0 : i32
    %c0_i32_1 = arith.constant 0 : i32
    return %c0_i32, %c0_i32_0 : i32, i32
  }
  func.func @transform_2(%arg0: i32) -> (i32, i32) {
    %c0_i32 = arith.constant 0 : i32
    %c0_i32_0 = arith.constant 0 : i32
    %c0_i32_1 = arith.constant 0 : i32
    return %c0_i32, %c0_i32_0 : i32, i32
  }
  func.func @transform_3(%arg0: i32) -> (i32, i32) {
    %c0_i32 = arith.constant 0 : i32
    %c0_i32_0 = arith.constant 0 : i32
    %c0_i32_1 = arith.constant 0 : i32
    return %c0_i32, %c0_i32_0 : i32, i32
  }
  func.func @transform_4(%arg0: i32) -> (i32, i32) {
    %c0_i32 = arith.constant 0 : i32
    %c0_i32_0 = arith.constant 0 : i32
    %c0_i32_1 = arith.constant 0 : i32
    return %c0_i32, %c0_i32_0 : i32, i32
  }
  func.func @transform_5(%arg0: i32) -> (i32, i32) {
    %c0_i32 = arith.constant 0 : i32
    %c0_i32_0 = arith.constant 0 : i32
    %c0_i32_1 = arith.constant 0 : i32
    return %c0_i32, %c0_i32_0 : i32, i32
  }
  func.func @transform_6(%arg0: i32) -> (i32, i32) {
    %c0_i32 = arith.constant 0 : i32
    %c0_i32_0 = arith.constant 0 : i32
    %c0_i32_1 = arith.constant 0 : i32
    return %c0_i32, %c0_i32_0 : i32, i32
  }
  func.func @transform_7(%arg0: i32) -> (i32, i32) {
    %c0_i32 = arith.constant 0 : i32
    %c0_i32_0 = arith.constant 0 : i32
    %c0_i32_1 = arith.constant 0 : i32
    return %c0_i32, %c0_i32_0 : i32, i32
  }
}

</mosaic_0001>

<bundles_post_ra>
// kernel: qnetwork_forward.4
= control target key start
LH: loop header
LB: loop body
LE: loop exit
PB: predicated region body
PF: predicated region fallthrough
CT: control target
= control target key end

     0   :  { %s1750_s12 = smov 0   ;;  %s1752_s13 = smov 0   ;;  %s2108_s0 = inlined_call_operand.vmem [shape: bf16[392,256], index: 0, kind: input, shape index: {}]   ;;  %s2109_s1 = inlined_call_operand.vmem [shape: bf16[256,32], index: 1, kind: input, shape index: {}]   ;;  %s2110_s2 = inlined_call_operand.vmem [shape: f32[1,32], index: 2, kind: input, shape index: {}]   ;;  %s2111_s3 = inlined_call_operand.vmem [shape: bf16[392,32], index: 3, kind: output, shape index: {}]  }
   0x1   :  { %s1754_s14 = smov 0  }
   0x2 LB: > { %s1763_s15 = sadd.s32 4294967295, %s1696_s14   ;;  %s1765_s16 = sadd.s32 1, %s1696_s14   ;;  %s1696_s14 = sphi %s1754_s14, %s2118_s14   ;;  %s1692_s13 = sphi %s1752_s13, %s2117_s13   ;;  %s1688_s12 = sphi %s1750_s12, %s2116_s12  }
   0x3   : > { %s85_s17 = ssub.s32 %s1696_s14, %s1765_s16  ;;  %s88_s18 = sadd.s32 1, %s1692_s13 }
   0x4   : > { %p86_p0 = scmp.eq.s32.totalorder %s85_s17, 0  ;;  %p98_p1 = scmp.ne.s32.totalorder %s1692_s13, %s1688_s12 }
   0x5   : > { %p99_p2 = scmp.eq.s32.totalorder %s1763_s15, 1  ;;  %p1223_p3 = scmp.ge.s32.totalorder %s1696_s14, 1 }
   0x6   : > { %s1773_s19 = scalar_select %p86_p0, %s1692_s13, %s88_s18  }
   0x7   : > { %p1775_p4 = por %p99_p2, %p98_p1  ;;  %p149_p5 = scmp.lt.s32.totalorder %s1696_s14, 3 }
   0x9   : > { %p150_p6 = pnand %p1223_p3, %p149_p5 }
   0xa   : > { %v1578_v0 = vld [vmem:[%s2109_s1 + $0x40] sm:$0xff] (!%p150_p6)   ;;  %s1783_s23 = sshll.u32 (!%p150_p6), %s1763_s15, 5  ;;  %v1580_v2 = vld [vmem:[%s2109_s1 + $0x48] sm:$0xff] (!%p150_p6)   ;;  %v1582_v4 = vld [vmem:[%s2109_s1 + $0x50] sm:$0xff] (!%p150_p6)   ;;  %vm849_vm0 = vcmask (!%p150_p6), 257024  }
   0xb   : > { %153 = sbr.rel (%p150_p6) target bundleno = 393 (0x189), region = 32  ;;  %v1579_v1 = vld [vmem:[%s2109_s1] sm:$0xff] (!%p150_p6)   ;;  %1362 = vmatprep.subr.bf16.mxu0 (!%p150_p6), %v1578_v0  ;;  %1474 = vmatprep.subr.bf16.mxu1 (!%p150_p6), %v1578_v0  ;;  %v1581_v3 = vld [vmem:[%s2109_s1 + $0x8] sm:$0xff] (!%p150_p6)   ;;  %p184_p7 = scmp.lt.s32.totalorder (!%p150_p6), %s1783_s23, 48  ;;  %v1583_v5 = vld [vmem:[%s2109_s1 + $0x10] sm:$0xff] (!%p150_p6)  }
   0xc   : > { %1363 = vmatpush3.bf16.msra.mxu0 (!%p150_p6), %v1579_v1  ;;  %1482 = vmatpush3.bf16.msra.mxu1 (!%p150_p6), %v1579_v1  ;;  %v1584_v6 = vld [vmem:[%s2109_s1 + $0x58] sm:$0xff] (!%p150_p6)   ;;  %v1586_v8 = vld [vmem:[%s2109_s1 + $0x60] sm:$0xff] (!%p150_p6)   ;;  %v1588_v10 = vld [vmem:[%s2109_s1 + $0x68] sm:$0xff] (!%p150_p6)  }
   0xd   : > { %1364 = vmatprep.subr.bf16.mxu0 (!%p150_p6), %v1580_v2  ;;  %1475 = vmatprep.subr.bf16.mxu1 (!%p150_p6), %v1580_v2  ;;  %v1585_v7 = vld [vmem:[%s2109_s1 + $0x18] sm:$0xff] (!%p150_p6)   ;;  %v1587_v9 = vld [vmem:[%s2109_s1 + $0x20] sm:$0xff] (!%p150_p6)   ;;  %v1589_v13 = vld [vmem:[%s2109_s1 + $0x28] sm:$0xff] (!%p150_p6)  }
   0xe   : > { %v1590_v14 = vld [vmem:[%s2109_s1 + $0x70] sm:$0xff] (!%p150_p6)   ;;  %v1592_v16 = vld [vmem:[%s2109_s1 + $0x78] sm:$0xff] (!%p150_p6)   ;;  %v1873_v50 = vld [vmem:[%s2110_s2] ss:$0 sm:$0xff] (!%p150_p6) }
   0xf   : > { %v1591_v15 = vld [vmem:[%s2109_s1 + $0x30] sm:$0xff] (!%p150_p6)   ;;  %v1593_v17 = vld [vmem:[%s2109_s1 + $0x38] sm:$0xff] (!%p150_p6)  }
  0x10   : > { %1365 = vmatpush3.bf16.msra.mxu0 (!%p150_p6), %v1581_v3  ;;  %1483 = vmatpush3.bf16.msra.mxu1 (!%p150_p6), %v1581_v3 }
  0x11   : > { %1366 = vmatprep.subr.bf16.mxu0 (!%p150_p6), %v1582_v4  ;;  %1476 = vmatprep.subr.bf16.mxu1 (!%p150_p6), %v1582_v4 }
  0x12   : > { %s185_s7 = scalar_select %p184_p7, %s1783_s23, 48 }
  0x13   : > { %s890_s22 = ssub.s32 (%p1775_p4), 49, %s1783_s23 }
  0x14   : > { %1367 = vmatpush3.bf16.msra.mxu0 %v1583_v5  ;;  %1484 = vmatpush3.bf16.msra.mxu1 %v1583_v5  ;;  %s1326_s14 = sshll.u32 %s185_s7, 3  ;;  %p891_p8 = scmp.lt.s32.totalorder (%p1775_p4), %s890_s22, 32 }
  0x15   : > { %1368 = vmatprep.subr.bf16.mxu0 %v1584_v6  ;;  %1477 = vmatprep.subr.bf16.mxu1 %v1584_v6  ;;  %s1814_s24 = scalar_lea.vmem %s2108_s0, %s1326_s14  ;;  %s175_s14 = sand.u32 1, %s1688_s12  }
  0x16   : > { %v1596_v11 = vld [vmem:[%s1814_s24 + $0x4] ss:$8 sps:$4 sm:$0xff]   ;;  %v1594_v18 = vld [vmem:[%s1814_s24] ss:$8 sps:$4 sm:$0xff]   ;;  %v1600_v20 = vld [vmem:[%s1814_s24 + $0x14] ss:$8 sps:$4 sm:$0xff]  }
  0x17   : > { %v1599_v12 = vld [vmem:[%s1814_s24 + $0x84] ss:$8 sps:$4 sm:$0xff]   ;;  %560 = vmatprep.mubr.bf16.mxu0 %v1596_v11  ;;  %v1597_v19 = vld [vmem:[%s1814_s24 + $0x80] ss:$8 sps:$4 sm:$0xff]   ;;  %v1602_v21 = vld [vmem:[%s1814_s24 + $0x94] ss:$8 sps:$4 sm:$0xff]  }
  0x18   : > { %1369 = vmatpush3.bf16.msra.mxu0 %v1585_v7  ;;  %1485 = vmatpush3.bf16.msra.mxu1 %v1585_v7  ;;  %v1604_v22 = vld [vmem:[%s1814_s24 + $0x10] ss:$8 sps:$4 sm:$0xff]   ;;  %v1606_v24 = vld [vmem:[%s1814_s24 + $0x24] ss:$8 sps:$4 sm:$0xff]   ;;  %v1610_v26 = vld [vmem:[%s1814_s24 + $0x20] ss:$8 sps:$4 sm:$0xff]  }
  0x19   : > { %1370 = vmatprep.subr.bf16.mxu0 %v1586_v8  ;;  %1478 = vmatprep.subr.bf16.mxu1 %v1586_v8  ;;  %v1605_v23 = vld [vmem:[%s1814_s24 + $0x90] ss:$8 sps:$4 sm:$0xff]   ;;  %v1608_v25 = vld [vmem:[%s1814_s24 + $0xa4] ss:$8 sps:$4 sm:$0xff]   ;;  %v1611_v27 = vld [vmem:[%s1814_s24 + $0xa0] ss:$8 sps:$4 sm:$0xff]  }
  0x1a   : > { %624 = vmatprep.mubr.bf16.mxu1 %v1599_v12  ;;  %v1612_v28 = vld [vmem:[%s1814_s24 + $0x34] ss:$8 sps:$4 sm:$0xff]   ;;  %v1616_v30 = vld [vmem:[%s1814_s24 + $0x30] ss:$8 sps:$4 sm:$0xff]   ;;  %v1618_v32 = vld [vmem:[%s1814_s24 + $0x44] ss:$8 sps:$4 sm:$0xff]  }
  0x1b   : > { %v1614_v29 = vld [vmem:[%s1814_s24 + $0xb4] ss:$8 sps:$4 sm:$0xff]   ;;  %v1617_v31 = vld [vmem:[%s1814_s24 + $0xb0] ss:$8 sps:$4 sm:$0xff]   ;;  %v1620_v33 = vld [vmem:[%s1814_s24 + $0xc4] ss:$8 sps:$4 sm:$0xff]  }
  0x1c   : > { %1371 = vmatpush3.bf16.msra.mxu0 %v1587_v9  ;;  %1486 = vmatpush3.bf16.msra.mxu1 %v1587_v9  ;;  %v1622_v34 = vld [vmem:[%s1814_s24 + $0x40] ss:$8 sps:$4 sm:$0xff]   ;;  %v1624_v36 = vld [vmem:[%s1814_s24 + $0x54] ss:$8 sps:$4 sm:$0xff]   ;;  %v1628_v38 = vld [vmem:[%s1814_s24 + $0x50] ss:$8 sps:$4 sm:$0xff]  }
  0x1d   : > { %1372 = vmatprep.subr.bf16.mxu0 %v1588_v10  ;;  %1479 = vmatprep.subr.bf16.mxu1 %v1588_v10  ;;  %v1623_v35 = vld [vmem:[%s1814_s24 + $0xc0] ss:$8 sps:$4 sm:$0xff]   ;;  %v1626_v37 = vld [vmem:[%s1814_s24 + $0xd4] ss:$8 sps:$4 sm:$0xff]   ;;  %v1629_v39 = vld [vmem:[%s1814_s24 + $0xd0] ss:$8 sps:$4 sm:$0xff]  }
  0x1e   : > { %v1630_v40 = vld [vmem:[%s1814_s24 + $0x64] ss:$8 sps:$4 sm:$0xff]   ;;  %v1634_v42 = vld [vmem:[%s1814_s24 + $0x60] ss:$8 sps:$4 sm:$0xff]   ;;  %v1636_v44 = vld [vmem:[%s1814_s24 + $0x74] ss:$8 sps:$4 sm:$0xff]  }
  0x1f   : > { %v1632_v41 = vld [vmem:[%s1814_s24 + $0xe4] ss:$8 sps:$4 sm:$0xff]   ;;  %v1635_v43 = vld [vmem:[%s1814_s24 + $0xe0] ss:$8 sps:$4 sm:$0xff]   ;;  %v1638_v45 = vld [vmem:[%s1814_s24 + $0xf4] ss:$8 sps:$4 sm:$0xff]  }
  0x20   : > { %1373 = vmatpush3.bf16.msra.mxu0 %v1589_v13  ;;  %1487 = vmatpush3.bf16.msra.mxu1 %v1589_v13  ;;  %v1640_v46 = vld [vmem:[%s1814_s24 + $0x70] ss:$8 sps:$4 sm:$0xff]   ;;  %s1224_s21 = sshll.u32 %s175_s14, 7 }
  0x21   : > { %1374 = vmatprep.subr.bf16.mxu0 %v1590_v14  ;;  %1480 = vmatprep.subr.bf16.mxu1 %v1590_v14  ;;  %v1641_v47 = vld [vmem:[%s1814_s24 + $0xf0] ss:$8 sps:$4 sm:$0xff]   ;;  %s1879_s12 = scalar_lea.vmem [#allocation2], %s1224_s21   ;;  %s1359_s24 = sshll.u32 (%p1775_p4), %s1763_s15, 7 }
  0x22   : > { %s1980_s27 = scalar_lea.vmem (%p1775_p4), %s2111_s3, %s1359_s24  }
  0x24   : > { %1375 = vmatpush3.bf16.msra.mxu0 %v1591_v15  ;;  %1488 = vmatpush3.bf16.msra.mxu1 %v1591_v15 }
  0x25   : > { %1376 = vmatprep.subr.bf16.mxu0 %v1592_v16  ;;  %1481 = vmatprep.subr.bf16.mxu1 %v1592_v16 }
  0x28   : > { %1377 = vmatpush3.bf16.msra.mxu0 %v1593_v17  ;;  %1489 = vmatpush3.bf16.msra.mxu1 %v1593_v17 }
  0x2b   : > { %561 = vmatmul.mubr.bf16.vlgmr.msra.gmra.mrb[0].mxu0 %v1594_v18  ;;  %625 = vmatmul.mubr.bf16.vlgmr.msra.gmra.mrb[0].mxu1 %v1597_v19 }
  0x2c   : > { %568 = vmatprep.mubr.bf16.mxu0 %v1600_v20  ;;  %632 = vmatprep.mubr.bf16.mxu1 %v1602_v21 }
  0x33   : > { %569 = vmatmul.mubr.bf16.gmra.mrb[4].mxu0 %v1604_v22  ;;  %633 = vmatmul.mubr.bf16.gmra.mrb[4].mxu1 %v1605_v23 }
  0x34   : > { %576 = vmatprep.mubr.bf16.mxu0 %v1606_v24  ;;  %640 = vmatprep.mubr.bf16.mxu1 %v1608_v25 }
  0x3b   : > { %577 = vmatmul.mubr.bf16.gmra.mrb[8].mxu0 %v1610_v26  ;;  %641 = vmatmul.mubr.bf16.gmra.mrb[8].mxu1 %v1611_v27 }
  0x3c   : > { %584 = vmatprep.mubr.bf16.mxu0 %v1612_v28  ;;  %648 = vmatprep.mubr.bf16.mxu1 %v1614_v29 }
  0x43   : > { %585 = vmatmul.mubr.bf16.gmra.mrb[12].mxu0 %v1616_v30  ;;  %649 = vmatmul.mubr.bf16.gmra.mrb[12].mxu1 %v1617_v31 }
  0x44   : > { %592 = vmatprep.mubr.bf16.mxu0 %v1618_v32  ;;  %656 = vmatprep.mubr.bf16.mxu1 %v1620_v33 }
  0x4b   : > { %593 = vmatmul.mubr.bf16.gmra.mrb[16].mxu0 %v1622_v34  ;;  %657 = vmatmul.mubr.bf16.gmra.mrb[16].mxu1 %v1623_v35 }
  0x4c   : > { %600 = vmatprep.mubr.bf16.mxu0 %v1624_v36  ;;  %664 = vmatprep.mubr.bf16.mxu1 %v1626_v37 }
  0x53   : > { %601 = vmatmul.mubr.bf16.gmra.mrb[20].mxu0 %v1628_v38  ;;  %665 = vmatmul.mubr.bf16.gmra.mrb[20].mxu1 %v1629_v39 }
  0x54   : > { %608 = vmatprep.mubr.bf16.mxu0 %v1630_v40  ;;  %672 = vmatprep.mubr.bf16.mxu1 %v1632_v41 }
  0x5b   : > { %609 = vmatmul.mubr.bf16.gmra.mrb[24].mxu0 %v1634_v42  ;;  %673 = vmatmul.mubr.bf16.gmra.mrb[24].mxu1 %v1635_v43 }
  0x5c   : > { %616 = vmatprep.mubr.bf16.mxu0 %v1636_v44  ;;  %680 = vmatprep.mubr.bf16.mxu1 %v1638_v45 }
  0x63   : > { %617 = vmatmul.mubr.bf16.gmra.mrb[28].mxu0 %v1640_v46  ;;  %681 = vmatmul.mubr.bf16.gmra.mrb[28].mxu1 %v1641_v47 }
  0xfe   : > { %v1378_v48 = vpop.f32.mrb[0].mxu0  ;;  %v1426_v49 = vpop.f32.mrb[0].mxu1 }
  0xff   : > { %v1379_v51 = vpop.f32.mrb[1].mxu0  ;;  %v1427_v52 = vpop.f32.mrb[1].mxu1 }
 0x100   : > { %v1380_v53 = vadd.f32 %v1379_v51, %v1378_v48  ;;  %v1428_v54 = vadd.f32 %v1427_v52, %v1426_v49  ;;  %v1381_v55 = vpop.f32.mrb[2].mxu0  ;;  %v1429_v56 = vpop.f32.mrb[2].mxu1 }
 0x101   : > { %v1382_v57 = vpop.f32.mrb[3].mxu0  ;;  %v1430_v58 = vpop.f32.mrb[3].mxu1 }
 0x102   : > { %v563_v59 = vadd.f32 %v1380_v53, %v1873_v50  ;;  %v627_v60 = vadd.f32 %v1428_v54, %v1873_v50  ;;  %v1383_v61 = vadd.f32 %v1382_v57, %v1381_v55  ;;  %v1431_v62 = vadd.f32 %v1430_v58, %v1429_v56 }
 0x104   : > { %v689_v63 = vmax.f32 %v563_v59, 0.0  ;;  %v705_v0 = vmax.f32 %v627_v60, 0.0  ;;  %v566_v1 = vadd.f32 %v1383_v61, %v1873_v50  ;;  %v630_v2 = vadd.f32 %v1431_v62, %v1873_v50 }
 0x106   : > { %v1327_v3 = vpack.c.bf16 %v689_v63, %v689_v63  ;;  %v1343_v4 = vpack.c.bf16 %v705_v0, %v705_v0  ;;  %v690_v5 = vmax.f32 %v566_v1, 0.0  ;;  %v706_v6 = vmax.f32 %v630_v2, 0.0  ;;  %v1384_v7 = vpop.f32.mrb[4].mxu0  ;;  %v1432_v8 = vpop.f32.mrb[4].mxu1 }
 0x107   : > { %v1385_v9 = vpop.f32.mrb[5].mxu0  ;;  %v1433_v10 = vpop.f32.mrb[5].mxu1 }
 0x108   : > { %850 = vst.msk [vmem:[%s1879_s12] sm:$0xf] %vm849_vm0, %v1327_v3  ;;  %866 = vst.msk [vmem:[%s1879_s12 + $0x40] sm:$0xf] %vm849_vm0, %v1343_v4  ;;  %v1328_v11 = vpack.c.bf16 %v690_v5, %v690_v5  ;;  %v1344_v12 = vpack.c.bf16 %v706_v6, %v706_v6  ;;  %v1386_v13 = vadd.f32 %v1385_v9, %v1384_v7  ;;  %v1387_v15 = vpop.f32.mrb[6].mxu0  ;;  %v1435_v16 = vpop.f32.mrb[6].mxu1 }
 0x109   : > { %v1434_v14 = vadd.f32 %v1433_v10, %v1432_v8  ;;  %v1388_v17 = vpop.f32.mrb[7].mxu0  ;;  %v1436_v18 = vpop.f32.mrb[7].mxu1 }
 0x10a   : > { %851 = vst.msk [vmem:[%s1879_s12 + $0x4] sm:$0xf] %vm849_vm0, %v1328_v11  ;;  %867 = vst.msk [vmem:[%s1879_s12 + $0x44] sm:$0xf] %vm849_vm0, %v1344_v12  ;;  %v571_v19 = vadd.f32 %v1386_v13, %v1873_v50  ;;  %v1389_v21 = vadd.f32 %v1388_v17, %v1387_v15  ;;  %v1437_v22 = vadd.f32 %v1436_v18, %v1435_v16 }
 0x10b   : > { %v635_v20 = vadd.f32 %v1434_v14, %v1873_v50 }
 0x10c   : > { %v691_v23 = vmax.f32 %v571_v19, 0.0  ;;  %v574_v25 = vadd.f32 %v1389_v21, %v1873_v50  ;;  %v638_v26 = vadd.f32 %v1437_v22, %v1873_v50 }
 0x10d   : > { %v707_v24 = vmax.f32 %v635_v20, 0.0 }
 0x10e   : > { %v1329_v27 = vpack.c.bf16 %v691_v23, %v691_v23  ;;  %v692_v29 = vmax.f32 %v574_v25, 0.0  ;;  %v708_v30 = vmax.f32 %v638_v26, 0.0  ;;  %v1390_v31 = vpop.f32.mrb[8].mxu0  ;;  %v1438_v32 = vpop.f32.mrb[8].mxu1 }
 0x10f   : > { %v1345_v28 = vpack.c.bf16 %v707_v24, %v707_v24  ;;  %v1391_v33 = vpop.f32.mrb[9].mxu0  ;;  %v1439_v34 = vpop.f32.mrb[9].mxu1 }
 0x110   : > { %852 = vst.msk [vmem:[%s1879_s12 + $0x8] sm:$0xf] %vm849_vm0, %v1329_v27  ;;  %v1330_v35 = vpack.c.bf16 %v692_v29, %v692_v29  ;;  %v1346_v36 = vpack.c.bf16 %v708_v30, %v708_v30  ;;  %v1392_v37 = vadd.f32 %v1391_v33, %v1390_v31  ;;  %v1440_v38 = vadd.f32 %v1439_v34, %v1438_v32  ;;  %v1393_v39 = vpop.f32.mrb[10].mxu0  ;;  %v1441_v40 = vpop.f32.mrb[10].mxu1 }
 0x111   : > { %868 = vst.msk [vmem:[%s1879_s12 + $0x48] sm:$0xf] %vm849_vm0, %v1345_v28  ;;  %v1394_v41 = vpop.f32.mrb[11].mxu0  ;;  %v1442_v42 = vpop.f32.mrb[11].mxu1 }
 0x112   : > { %853 = vst.msk [vmem:[%s1879_s12 + $0xc] sm:$0xf] %vm849_vm0, %v1330_v35  ;;  %869 = vst.msk [vmem:[%s1879_s12 + $0x4c] sm:$0xf] %vm849_vm0, %v1346_v36  ;;  %v579_v43 = vadd.f32 %v1392_v37, %v1873_v50  ;;  %v643_v44 = vadd.f32 %v1440_v38, %v1873_v50  ;;  %v1395_v45 = vadd.f32 %v1394_v41, %v1393_v39 }
 0x113   : > { %v1443_v46 = vadd.f32 %v1442_v42, %v1441_v40 }
 0x114   : > { %v693_v47 = vmax.f32 %v579_v43, 0.0  ;;  %v709_v48 = vmax.f32 %v643_v44, 0.0  ;;  %v582_v49 = vadd.f32 %v1395_v45, %v1873_v50 }
 0x115   : > { %v646_v51 = vadd.f32 %v1443_v46, %v1873_v50 }
 0x116   : > { %v1331_v52 = vpack.c.bf16 %v693_v47, %v693_v47  ;;  %v1347_v53 = vpack.c.bf16 %v709_v48, %v709_v48  ;;  %v694_v54 = vmax.f32 %v582_v49, 0.0  ;;  %v1396_v56 = vpop.f32.mrb[12].mxu0  ;;  %v1444_v57 = vpop.f32.mrb[12].mxu1 }
 0x117   : > { %v710_v55 = vmax.f32 %v646_v51, 0.0  ;;  %v1397_v58 = vpop.f32.mrb[13].mxu0  ;;  %v1445_v59 = vpop.f32.mrb[13].mxu1 }
 0x118   : > { %854 = vst.msk [vmem:[%s1879_s12 + $0x10] sm:$0xf] %vm849_vm0, %v1331_v52  ;;  %870 = vst.msk [vmem:[%s1879_s12 + $0x50] sm:$0xf] %vm849_vm0, %v1347_v53  ;;  %v1332_v60 = vpack.c.bf16 %v694_v54, %v694_v54  ;;  %v1398_v62 = vadd.f32 %v1397_v58, %v1396_v56  ;;  %v1446_v63 = vadd.f32 %v1445_v59, %v1444_v57  ;;  %v1399_v0 = vpop.f32.mrb[14].mxu0  ;;  %v1447_v1 = vpop.f32.mrb[14].mxu1 }
 0x119   : > { %v1348_v61 = vpack.c.bf16 %v710_v55, %v710_v55  ;;  %v1400_v2 = vpop.f32.mrb[15].mxu0  ;;  %v1448_v3 = vpop.f32.mrb[15].mxu1 }
 0x11a   : > { %855 = vst.msk [vmem:[%s1879_s12 + $0x14] sm:$0xf] %vm849_vm0, %v1332_v60  ;;  %v587_v4 = vadd.f32 %v1398_v62, %v1873_v50  ;;  %v651_v5 = vadd.f32 %v1446_v63, %v1873_v50  ;;  %v1401_v6 = vadd.f32 %v1400_v2, %v1399_v0  ;;  %v1449_v7 = vadd.f32 %v1448_v3, %v1447_v1 }
 0x11b   : > { %871 = vst.msk [vmem:[%s1879_s12 + $0x54] sm:$0xf] %vm849_vm0, %v1348_v61 }
 0x11c   : > { %v695_v8 = vmax.f32 %v587_v4, 0.0  ;;  %v711_v9 = vmax.f32 %v651_v5, 0.0  ;;  %v590_v10 = vadd.f32 %v1401_v6, %v1873_v50  ;;  %v654_v11 = vadd.f32 %v1449_v7, %v1873_v50 }
 0x11e   : > { %v1333_v12 = vpack.c.bf16 %v695_v8, %v695_v8  ;;  %v1349_v13 = vpack.c.bf16 %v711_v9, %v711_v9  ;;  %v696_v14 = vmax.f32 %v590_v10, 0.0  ;;  %v712_v15 = vmax.f32 %v654_v11, 0.0  ;;  %v1402_v16 = vpop.f32.mrb[16].mxu0  ;;  %v1450_v17 = vpop.f32.mrb[16].mxu1 }
 0x11f   : > { %v1403_v18 = vpop.f32.mrb[17].mxu0  ;;  %v1451_v19 = vpop.f32.mrb[17].mxu1 }
 0x120   : > { %856 = vst.msk [vmem:[%s1879_s12 + $0x18] sm:$0xf] %vm849_vm0, %v1333_v12  ;;  %872 = vst.msk [vmem:[%s1879_s12 + $0x58] sm:$0xf] %vm849_vm0, %v1349_v13  ;;  %v1334_v20 = vpack.c.bf16 %v696_v14, %v696_v14  ;;  %v1350_v21 = vpack.c.bf16 %v712_v15, %v712_v15  ;;  %v1404_v22 = vadd.f32 %v1403_v18, %v1402_v16  ;;  %v1405_v24 = vpop.f32.mrb[18].mxu0  ;;  %v1453_v25 = vpop.f32.mrb[18].mxu1 }
 0x121   : > { %v1452_v23 = vadd.f32 %v1451_v19, %v1450_v17  ;;  %v1406_v26 = vpop.f32.mrb[19].mxu0  ;;  %v1454_v27 = vpop.f32.mrb[19].mxu1 }
 0x122   : > { %857 = vst.msk [vmem:[%s1879_s12 + $0x1c] sm:$0xf] %vm849_vm0, %v1334_v20  ;;  %873 = vst.msk [vmem:[%s1879_s12 + $0x5c] sm:$0xf] %vm849_vm0, %v1350_v21  ;;  %v595_v28 = vadd.f32 %v1404_v22, %v1873_v50  ;;  %v1407_v30 = vadd.f32 %v1406_v26, %v1405_v24  ;;  %v1455_v31 = vadd.f32 %v1454_v27, %v1453_v25 }
 0x123   : > { %v659_v29 = vadd.f32 %v1452_v23, %v1873_v50 }
 0x124   : > { %v697_v32 = vmax.f32 %v595_v28, 0.0  ;;  %v598_v34 = vadd.f32 %v1407_v30, %v1873_v50  ;;  %v662_v35 = vadd.f32 %v1455_v31, %v1873_v50 }
 0x125   : > { %v713_v33 = vmax.f32 %v659_v29, 0.0 }
 0x126   : > { %v1335_v36 = vpack.c.bf16 %v697_v32, %v697_v32  ;;  %v698_v38 = vmax.f32 %v598_v34, 0.0  ;;  %v714_v39 = vmax.f32 %v662_v35, 0.0  ;;  %v1408_v40 = vpop.f32.mrb[20].mxu0  ;;  %v1456_v41 = vpop.f32.mrb[20].mxu1 }
 0x127   : > { %v1351_v37 = vpack.c.bf16 %v713_v33, %v713_v33  ;;  %v1409_v42 = vpop.f32.mrb[21].mxu0  ;;  %v1457_v43 = vpop.f32.mrb[21].mxu1 }
 0x128   : > { %858 = vst.msk [vmem:[%s1879_s12 + $0x20] sm:$0xf] %vm849_vm0, %v1335_v36  ;;  %v1336_v44 = vpack.c.bf16 %v698_v38, %v698_v38  ;;  %v1352_v45 = vpack.c.bf16 %v714_v39, %v714_v39  ;;  %v1410_v46 = vadd.f32 %v1409_v42, %v1408_v40  ;;  %v1458_v47 = vadd.f32 %v1457_v43, %v1456_v41  ;;  %v1411_v48 = vpop.f32.mrb[22].mxu0  ;;  %v1459_v49 = vpop.f32.mrb[22].mxu1 }
 0x129   : > { %874 = vst.msk [vmem:[%s1879_s12 + $0x60] sm:$0xf] %vm849_vm0, %v1351_v37  ;;  %v1412_v51 = vpop.f32.mrb[23].mxu0  ;;  %v1460_v52 = vpop.f32.mrb[23].mxu1 }
 0x12a   : > { %859 = vst.msk [vmem:[%s1879_s12 + $0x24] sm:$0xf] %vm849_vm0, %v1336_v44  ;;  %875 = vst.msk [vmem:[%s1879_s12 + $0x64] sm:$0xf] %vm849_vm0, %v1352_v45  ;;  %v603_v53 = vadd.f32 %v1410_v46, %v1873_v50  ;;  %v667_v54 = vadd.f32 %v1458_v47, %v1873_v50  ;;  %v1413_v55 = vadd.f32 %v1412_v51, %v1411_v48 }
 0x12b   : > { %v1461_v56 = vadd.f32 %v1460_v52, %v1459_v49 }
 0x12c   : > { %v699_v57 = vmax.f32 %v603_v53, 0.0  ;;  %v715_v58 = vmax.f32 %v667_v54, 0.0  ;;  %v606_v59 = vadd.f32 %v1413_v55, %v1873_v50 }
 0x12d   : > { %v670_v60 = vadd.f32 %v1461_v56, %v1873_v50 }
 0x12e   : > { %v1337_v61 = vpack.c.bf16 %v699_v57, %v699_v57  ;;  %v1353_v62 = vpack.c.bf16 %v715_v58, %v715_v58  ;;  %v700_v63 = vmax.f32 %v606_v59, 0.0  ;;  %v1414_v1 = vpop.f32.mrb[24].mxu0  ;;  %v1462_v2 = vpop.f32.mrb[24].mxu1 }
 0x12f   : > { %v716_v0 = vmax.f32 %v670_v60, 0.0  ;;  %v1415_v3 = vpop.f32.mrb[25].mxu0  ;;  %v1463_v4 = vpop.f32.mrb[25].mxu1 }
 0x130   : > { %860 = vst.msk [vmem:[%s1879_s12 + $0x28] sm:$0xf] %vm849_vm0, %v1337_v61  ;;  %876 = vst.msk [vmem:[%s1879_s12 + $0x68] sm:$0xf] %vm849_vm0, %v1353_v62  ;;  %v1338_v5 = vpack.c.bf16 %v700_v63, %v700_v63  ;;  %v1416_v7 = vadd.f32 %v1415_v3, %v1414_v1  ;;  %v1464_v8 = vadd.f32 %v1463_v4, %v1462_v2  ;;  %v1417_v9 = vpop.f32.mrb[26].mxu0  ;;  %v1465_v10 = vpop.f32.mrb[26].mxu1 }
 0x131   : > { %v1354_v6 = vpack.c.bf16 %v716_v0, %v716_v0  ;;  %v1418_v11 = vpop.f32.mrb[27].mxu0  ;;  %v1466_v12 = vpop.f32.mrb[27].mxu1 }
 0x132   : > { %861 = vst.msk [vmem:[%s1879_s12 + $0x2c] sm:$0xf] %vm849_vm0, %v1338_v5  ;;  %v611_v13 = vadd.f32 %v1416_v7, %v1873_v50  ;;  %v675_v14 = vadd.f32 %v1464_v8, %v1873_v50  ;;  %v1419_v15 = vadd.f32 %v1418_v11, %v1417_v9  ;;  %v1467_v16 = vadd.f32 %v1466_v12, %v1465_v10 }
 0x133   : > { %877 = vst.msk [vmem:[%s1879_s12 + $0x6c] sm:$0xf] %vm849_vm0, %v1354_v6 }
 0x134   : > { %v701_v17 = vmax.f32 %v611_v13, 0.0  ;;  %v717_v18 = vmax.f32 %v675_v14, 0.0  ;;  %v614_v19 = vadd.f32 %v1419_v15, %v1873_v50  ;;  %v678_v20 = vadd.f32 %v1467_v16, %v1873_v50 }
 0x136   : > { %v1339_v21 = vpack.c.bf16 %v701_v17, %v701_v17  ;;  %v1355_v22 = vpack.c.bf16 %v717_v18, %v717_v18  ;;  %v702_v23 = vmax.f32 %v614_v19, 0.0  ;;  %v718_v24 = vmax.f32 %v678_v20, 0.0  ;;  %v1420_v25 = vpop.f32.mrb[28].mxu0  ;;  %v1468_v26 = vpop.f32.mrb[28].mxu1 }
 0x137   : > { %v1421_v27 = vpop.f32.mrb[29].mxu0  ;;  %v1469_v28 = vpop.f32.mrb[29].mxu1 }
 0x138   : > { %862 = vst.msk [vmem:[%s1879_s12 + $0x30] sm:$0xf] %vm849_vm0, %v1339_v21  ;;  %878 = vst.msk [vmem:[%s1879_s12 + $0x70] sm:$0xf] %vm849_vm0, %v1355_v22  ;;  %v1340_v29 = vpack.c.bf16 %v702_v23, %v702_v23  ;;  %v1356_v30 = vpack.c.bf16 %v718_v24, %v718_v24  ;;  %v1422_v31 = vadd.f32 %v1421_v27, %v1420_v25  ;;  %v1423_v33 = vpop.f32.mrb[30].mxu0  ;;  %v1471_v34 = vpop.f32.mrb[30].mxu1 }
 0x139   : > { %v1470_v32 = vadd.f32 %v1469_v28, %v1468_v26  ;;  %v1424_v35 = vpop.f32.mrb[31].mxu0  ;;  %v1472_v36 = vpop.f32.mrb[31].mxu1 }
 0x13a   : > { %863 = vst.msk [vmem:[%s1879_s12 + $0x34] sm:$0xf] %vm849_vm0, %v1340_v29  ;;  %879 = vst.msk [vmem:[%s1879_s12 + $0x74] sm:$0xf] %vm849_vm0, %v1356_v30  ;;  %v619_v37 = vadd.f32 %v1422_v31, %v1873_v50  ;;  %v1425_v39 = vadd.f32 %v1424_v35, %v1423_v33  ;;  %v1473_v40 = vadd.f32 %v1472_v36, %v1471_v34 }
 0x13b   : > { %v683_v38 = vadd.f32 %v1470_v32, %v1873_v50 }
 0x13c   : > { %v703_v41 = vmax.f32 %v619_v37, 0.0  ;;  %v622_v43 = vadd.f32 %v1425_v39, %v1873_v50  ;;  %v686_v44 = vadd.f32 %v1473_v40, %v1873_v50  ;;  %888 = sbr.rel (!%p1775_p4) target bundleno = 393 (0x189), region = 36 }
 0x13d   : > { %v719_v42 = vmax.f32 %v683_v38, 0.0 }
 0x13e   : > { %v1341_v45 = vpack.c.bf16 %v703_v41, %v703_v41  ;;  %v704_v47 = vmax.f32 %v622_v43, 0.0  ;;  %v720_v48 = vmax.f32 %v686_v44, 0.0 }
 0x13f   : > { %v1357_v46 = vpack.c.bf16 %v719_v42, %v719_v42 }
 0x140   : > { %864 = vst.msk [vmem:[%s1879_s12 + $0x38] sm:$0xf] %vm849_vm0, %v1341_v45  ;;  %v1342_v49 = vpack.c.bf16 %v704_v47, %v704_v47  ;;  %v1358_v51 = vpack.c.bf16 %v720_v48, %v720_v48 }
 0x141   : > { %880 = vst.msk [vmem:[%s1879_s12 + $0x78] sm:$0xf] %vm849_vm0, %v1357_v46 }
 0x142   : > { %865 = vst.msk [vmem:[%s1879_s12 + $0x3c] sm:$0xf] %vm849_vm0, %v1342_v49  ;;  %881 = vst.msk [vmem:[%s1879_s12 + $0x7c] sm:$0xf] %vm849_vm0, %v1358_v51 }
 0x143   : > { %s2120_s22 = smov (!%p891_p8, %s890_s22), 32 }
 0x144   : > { %s1311_s28 = sshll.u32 %s2120_s22, 6 }
 0x145   : > { %p1314_p9 = scmp.eq.s32.totalorder %s1311_s28, 0 }
 0x146   : > { %s1986_s29 = sshrl.u32 (!%p1314_p9), %s2120_s22, 5 }
 0x147   : > { %899 = sbr.rel (%p1314_p9) target bundleno = 393 (0x189), region = 40  ;;  %p1315_p10 = scmp.le.s32.totalorder (!%p1314_p9), %s1986_s29, 0 }
 0x14e   : > { %1176 = sbr.rel (%p1315_p10) target bundleno = 372 (0x174), region = 112  ;;  %s2113_s15 = smov (!%p1315_p10), %s1980_s27 }
 0x14f   : > { %s2114_s20 = smov (!%p1315_p10), %s1879_s12  ;;  %s1995_s23 = smov (!%p1315_p10), 0  }
 0x150   : > { %s1997_s30 = smov (!%p1315_p10), 0  }
 0x155 LB: >> { %v915_v50 = vld [vmem:[%s1704_s20] sm:$0xf]  ;;  %v917_v52 = vld [vmem:[%s1704_s20 + $0x4] sm:$0xf]  ;;  %v919_v53 = vld [vmem:[%s1704_s20 + $0x8] sm:$0xf]  ;;  %s1712_s30 = sphi %s1997_s30, %s909_s30   ;;  %s1708_s23 = sphi %s1995_s23, %s2115_s23   ;;  %s1704_s20 = sphi %s2114_s20, %s984_s20   ;;  %s1700_s15 = sphi %s2113_s15, %s985_s15  }
 0x156   : >> { %916 = vst [vmem:[%s1700_s15] sm:$0xf] %v915_v50  ;;  %918 = vst [vmem:[%s1700_s15 + $0x4] sm:$0xf] %v917_v52  ;;  %v921_v54 = vld [vmem:[%s1704_s20 + $0xc] sm:$0xf]  ;;  %s979_s4 = sadd.s32 1, %s1708_s23 }
 0x157   : >> { %920 = vst [vmem:[%s1700_s15 + $0x8] sm:$0xf] %v919_v53  ;;  %v923_v55 = vld [vmem:[%s1704_s20 + $0x10] sm:$0xf]  ;;  %v925_v56 = vld [vmem:[%s1704_s20 + $0x14] sm:$0xf]  ;;  %p980_p11 = scmp.ge.s32.totalorder %s979_s4, %s1986_s29 }
 0x158   : >> { %922 = vst [vmem:[%s1700_s15 + $0xc] sm:$0xf] %v921_v54  ;;  %924 = vst [vmem:[%s1700_s15 + $0x10] sm:$0xf] %v923_v55  ;;  %v927_v57 = vld [vmem:[%s1704_s20 + $0x18] sm:$0xf] }
 0x159   : >> { %926 = vst [vmem:[%s1700_s15 + $0x14] sm:$0xf] %v925_v56  ;;  %v929_v58 = vld [vmem:[%s1704_s20 + $0x1c] sm:$0xf]  ;;  %v931_v59 = vld [vmem:[%s1704_s20 + $0x20] sm:$0xf] }
 0x15a   : >> { %928 = vst [vmem:[%s1700_s15 + $0x18] sm:$0xf] %v927_v57  ;;  %930 = vst [vmem:[%s1700_s15 + $0x1c] sm:$0xf] %v929_v58  ;;  %v933_v60 = vld [vmem:[%s1704_s20 + $0x24] sm:$0xf] }
 0x15b   : >> { %932 = vst [vmem:[%s1700_s15 + $0x20] sm:$0xf] %v931_v59  ;;  %v935_v61 = vld [vmem:[%s1704_s20 + $0x28] sm:$0xf]  ;;  %v937_v62 = vld [vmem:[%s1704_s20 + $0x2c] sm:$0xf] }
 0x15c   : >> { %934 = vst [vmem:[%s1700_s15 + $0x24] sm:$0xf] %v933_v60  ;;  %936 = vst [vmem:[%s1700_s15 + $0x28] sm:$0xf] %v935_v61  ;;  %v939_v63 = vld [vmem:[%s1704_s20 + $0x30] sm:$0xf] }
 0x15d   : >> { %938 = vst [vmem:[%s1700_s15 + $0x2c] sm:$0xf] %v937_v62  ;;  %v941_v0 = vld [vmem:[%s1704_s20 + $0x34] sm:$0xf]  ;;  %v943_v1 = vld [vmem:[%s1704_s20 + $0x38] sm:$0xf] }
 0x15e   : >> { %940 = vst [vmem:[%s1700_s15 + $0x30] sm:$0xf] %v939_v63  ;;  %942 = vst [vmem:[%s1700_s15 + $0x34] sm:$0xf] %v941_v0  ;;  %v945_v2 = vld [vmem:[%s1704_s20 + $0x3c] sm:$0xf] }
 0x15f   : >> { %944 = vst [vmem:[%s1700_s15 + $0x38] sm:$0xf] %v943_v1  ;;  %v947_v3 = vld [vmem:[%s1704_s20 + $0x40] sm:$0xf]  ;;  %v949_v4 = vld [vmem:[%s1704_s20 + $0x44] sm:$0xf] }
 0x160   : >> { %946 = vst [vmem:[%s1700_s15 + $0x3c] sm:$0xf] %v945_v2  ;;  %948 = vst [vmem:[%s1700_s15 + $0x40] sm:$0xf] %v947_v3  ;;  %v951_v5 = vld [vmem:[%s1704_s20 + $0x48] sm:$0xf] }
 0x161   : >> { %950 = vst [vmem:[%s1700_s15 + $0x44] sm:$0xf] %v949_v4  ;;  %v953_v6 = vld [vmem:[%s1704_s20 + $0x4c] sm:$0xf]  ;;  %v955_v7 = vld [vmem:[%s1704_s20 + $0x50] sm:$0xf] }
 0x162   : >> { %952 = vst [vmem:[%s1700_s15 + $0x48] sm:$0xf] %v951_v5  ;;  %954 = vst [vmem:[%s1700_s15 + $0x4c] sm:$0xf] %v953_v6  ;;  %v957_v8 = vld [vmem:[%s1704_s20 + $0x54] sm:$0xf] }
 0x163   : >> { %956 = vst [vmem:[%s1700_s15 + $0x50] sm:$0xf] %v955_v7  ;;  %v959_v9 = vld [vmem:[%s1704_s20 + $0x58] sm:$0xf]  ;;  %v961_v10 = vld [vmem:[%s1704_s20 + $0x5c] sm:$0xf] }
 0x164   : >> { %958 = vst [vmem:[%s1700_s15 + $0x54] sm:$0xf] %v957_v8  ;;  %960 = vst [vmem:[%s1700_s15 + $0x58] sm:$0xf] %v959_v9  ;;  %v963_v11 = vld [vmem:[%s1704_s20 + $0x60] sm:$0xf] }
 0x165   : >> { %962 = vst [vmem:[%s1700_s15 + $0x5c] sm:$0xf] %v961_v10  ;;  %v965_v12 = vld [vmem:[%s1704_s20 + $0x64] sm:$0xf]  ;;  %v967_v13 = vld [vmem:[%s1704_s20 + $0x68] sm:$0xf] }
 0x166   : >> { %964 = vst [vmem:[%s1700_s15 + $0x60] sm:$0xf] %v963_v11  ;;  %966 = vst [vmem:[%s1700_s15 + $0x64] sm:$0xf] %v965_v12  ;;  %v969_v14 = vld [vmem:[%s1704_s20 + $0x6c] sm:$0xf] }
 0x167   : >> { %968 = vst [vmem:[%s1700_s15 + $0x68] sm:$0xf] %v967_v13  ;;  %v971_v15 = vld [vmem:[%s1704_s20 + $0x70] sm:$0xf]  ;;  %v973_v16 = vld [vmem:[%s1704_s20 + $0x74] sm:$0xf] }
 0x168   : >> { %970 = vst [vmem:[%s1700_s15 + $0x6c] sm:$0xf] %v969_v14  ;;  %972 = vst [vmem:[%s1700_s15 + $0x70] sm:$0xf] %v971_v15  ;;  %v975_v17 = vld [vmem:[%s1704_s20 + $0x78] sm:$0xf] }
 0x169   : >> { %974 = vst [vmem:[%s1700_s15 + $0x74] sm:$0xf] %v973_v16  ;;  %v977_v18 = vld [vmem:[%s1704_s20 + $0x7c] sm:$0xf]  ;;  %976 = vst [vmem:[%s1700_s15 + $0x78] sm:$0xf] %v975_v17 }
 0x16a   : >> { %978 = vst [vmem:[%s1700_s15 + $0x7c] sm:$0xf] %v977_v18  ;;  %s2122_s4 = smov (%p980_p11, %s979_s4), 0  ;;  %s909_s30 = sadd.s32 1, %s1712_s30  }
 0x16b   : >> { %s1316_s5 = sshll.u32 %s2122_s4, 7  ;;  %p908_p12 = scmp.ge.s32.totalorder %s909_s30, %s1986_s29 }
 0x16c   : >> { %s984_s20 = scalar_lea.vmem %s1879_s12, %s1316_s5 [#allocation2]   ;;  %s985_s15 = scalar_lea.vmem %s1980_s27, %s1316_s5  }
 0x16d   : >> { %s2115_s23 = smov %s2122_s4  ;;  %911 = sbr.rel (!%p908_p12) target bundleno = 341 (0x155), region = 118 }
 0x174 PF: > { %s2090_s6 = sand.u32 31, %s2120_s22   ;;  %s1360_s7 = sshll.u32 %s1986_s29, 7 }
 0x175   : > { %s990_s8 = scalar_lea.vmem %s1879_s12, %s1360_s7 [#allocation2]   ;;  %s992_s9 = scalar_lea.vmem %s1980_s27, %s1360_s7  }
 0x176   : > { %p1321_p13 = scmp.le.s32.totalorder %s2090_s6, 0 }
 0x177   : > { %s1714_s10 = smov (!%p1321_p13), %s992_s9   ;;  %s1718_s11 = smov (!%p1321_p13), %s990_s8  }
 0x178   : > { %1190 = sbr.rel (%p1321_p13) target bundleno = 393 (0x189), region = 123  ;;  %s1722_s14 = smov (!%p1321_p13), 0  }
 0x179   : > { %s1726_s17 = smov (!%p1321_p13), 0  }
 0x17f LB: >> { %v1002_v19 = vld [vmem:[%s1720_s11] sm:$0xf]  ;;  %s1004_s18 = sadd.s32 1, %s1724_s14  ;;  %s996_s17 = sadd.s32 1, %s1728_s17   ;;  %s1728_s17 = sphi %s1726_s17, %s996_s17   ;;  %s1724_s14 = sphi %s1722_s14, %s1723_s14   ;;  %s1720_s11 = sphi %s1718_s11, %s1009_s11   ;;  %s1716_s10 = sphi %s1714_s10, %s1010_s10  }
 0x180   : >> { %1003 = vst [vmem:[%s1716_s10] sm:$0xf] %v1002_v19  ;;  %p1005_p0 = scmp.ge.s32.totalorder %s1004_s18, %s2090_s6  ;;  %p995_p1 = scmp.ge.s32.totalorder %s996_s17, %s2090_s6 }
 0x182   : >> { %s2124_s18 = smov (%p1005_p0, %s1004_s18), 0  ;;  %998 = sbr.rel (!%p995_p1) target bundleno = 383 (0x17f), region = 129 }
 0x183   : >> { %s1322_s21 = sshll.u32 %s2124_s18, 2  ;;  %s1723_s14 = smov %s2124_s18  }
 0x184   : >> { %s1009_s11 = scalar_lea.vmem %s990_s8, %s1322_s21 [#allocation2]   ;;  %s1010_s10 = scalar_lea.vmem %s992_s9, %s1322_s21  }
 0x189 PF: > { %p10_p2 = scmp.ge.s32.totalorder %s1765_s16, 4   ;;  %s2116_s12 = smov %s1692_s13 }
 0x18a   : > { %s2117_s13 = smov %s1773_s19  ;;  %s2118_s14 = smov %s1765_s16 }
 0x18b   :  { %12 = sbr.rel (!%p10_p2) target bundleno = 2 (0x2), region = 140 }

// kernel: qnetwork_forward.5
= control target key start
LH: loop header
LB: loop body
LE: loop exit
PB: predicated region body
PF: predicated region fallthrough
CT: control target
= control target key end

     0   :  { %vm580_vm0 = vcmask 519168   ;;  %s1037_s1 = inlined_call_operand.vmem [shape: bf16[512,64], index: 1, kind: input, shape index: {}]   ;;  %s1038_s0 = inlined_call_operand.vmem [shape: bf16[72,512], index: 0, kind: input, shape index: {}]   ;;  %s1039_s2 = inlined_call_operand.vmem [shape: f32[1,64], index: 2, kind: input, shape index: {}]   ;;  %s1040_s3 = inlined_call_operand.vmem [shape: bf16[72,64], index: 3, kind: output, shape index: {}]  }
   0x1   :  { %v757_v0 = vld [vmem:[%s1037_s1 + $0x40] sm:$0xff]   ;;  %v761_v4 = vld [vmem:[%s1037_s1 + $0x48] sm:$0xff]   ;;  %v765_v8 = vld [vmem:[%s1037_s1 + $0x50] sm:$0xff]  }
   0x2   :  { %v758_v1 = vld [vmem:[%s1037_s1 + $0xc0] sm:$0xff]   ;;  %665 = vmatprep.subr.bf16.mxu0 %v757_v0  ;;  %v762_v5 = vld [vmem:[%s1037_s1 + $0xc8] sm:$0xff]   ;;  %v766_v9 = vld [vmem:[%s1037_s1 + $0xd0] sm:$0xff]  }
   0x3   :  { %v759_v2 = vld [vmem:[%s1037_s1] sm:$0xff]   ;;  %711 = vmatprep.subr.bf16.mxu1 %v758_v1  ;;  %v763_v6 = vld [vmem:[%s1037_s1 + $0x8] sm:$0xff]   ;;  %v767_v10 = vld [vmem:[%s1037_s1 + $0x10] sm:$0xff]  }
   0x4   :  { %v760_v3 = vld [vmem:[%s1037_s1 + $0x80] sm:$0xff]   ;;  %666 = vmatpush3.bf16.msra.mxu0 %v759_v2  ;;  %v764_v7 = vld [vmem:[%s1037_s1 + $0x88] sm:$0xff]   ;;  %v768_v11 = vld [vmem:[%s1037_s1 + $0x90] sm:$0xff]  }
   0x5   :  { %712 = vmatpush3.bf16.msra.mxu1 %v760_v3  ;;  %667 = vmatprep.subr.bf16.mxu0 %v761_v4  ;;  %v769_v12 = vld [vmem:[%s1037_s1 + $0x58] sm:$0xff]   ;;  %v773_v16 = vld [vmem:[%s1037_s1 + $0x60] sm:$0xff]   ;;  %v777_v20 = vld [vmem:[%s1037_s1 + $0x68] sm:$0xff]  }
   0x6   :  { %713 = vmatprep.subr.bf16.mxu1 %v762_v5  ;;  %v770_v13 = vld [vmem:[%s1037_s1 + $0xd8] sm:$0xff]   ;;  %v774_v17 = vld [vmem:[%s1037_s1 + $0xe0] sm:$0xff]   ;;  %v778_v21 = vld [vmem:[%s1037_s1 + $0xe8] sm:$0xff]  }
   0x7   :  { %v771_v14 = vld [vmem:[%s1037_s1 + $0x18] sm:$0xff]   ;;  %v775_v18 = vld [vmem:[%s1037_s1 + $0x20] sm:$0xff]   ;;  %v779_v22 = vld [vmem:[%s1037_s1 + $0x28] sm:$0xff]  }
   0x8   :  { %668 = vmatpush3.bf16.msra.mxu0 %v763_v6  ;;  %v772_v15 = vld [vmem:[%s1037_s1 + $0x98] sm:$0xff]   ;;  %v776_v19 = vld [vmem:[%s1037_s1 + $0xa0] sm:$0xff]   ;;  %v780_v23 = vld [vmem:[%s1037_s1 + $0xa8] sm:$0xff]  }
   0x9   :  { %714 = vmatpush3.bf16.msra.mxu1 %v764_v7  ;;  %669 = vmatprep.subr.bf16.mxu0 %v765_v8  ;;  %v781_v24 = vld [vmem:[%s1037_s1 + $0x70] sm:$0xff]   ;;  %v785_v28 = vld [vmem:[%s1037_s1 + $0x78] sm:$0xff]   ;;  %v31_v46 = vld [vmem:[%s1038_s0 + $0x80] sm:$0xff] }
   0xa   :  { %715 = vmatprep.subr.bf16.mxu1 %v766_v9  ;;  %v782_v25 = vld [vmem:[%s1037_s1 + $0xf0] sm:$0xff]   ;;  %v786_v29 = vld [vmem:[%s1037_s1 + $0xf8] sm:$0xff]   ;;  %v32_v47 = vld [vmem:[%s1038_s0 + $0x88] sm:$0xff]  ;;  %v612_v50 = vcombine.high %v31_v46, %v31_v46  ;;  %v611_v52 = vcombine.low %v31_v46, %v31_v46 }
   0xb   :  { %v783_v26 = vld [vmem:[%s1037_s1 + $0x30] sm:$0xff]   ;;  %v787_v30 = vld [vmem:[%s1037_s1 + $0x38] sm:$0xff]   ;;  %v614_v51 = vcombine.high %v32_v47, %v32_v47  ;;  %v613_v53 = vcombine.low %v32_v47, %v32_v47  ;;  %v990_v56 = vld [vmem:[%s1039_s2] ss:$0 sm:$0xff] }
   0xc   :  { %670 = vmatpush3.bf16.msra.mxu0 %v767_v10  ;;  %v784_v27 = vld [vmem:[%s1037_s1 + $0xb0] sm:$0xff]   ;;  %v788_v31 = vld [vmem:[%s1037_s1 + $0xb8] sm:$0xff]  }
   0xd   :  { %716 = vmatpush3.bf16.msra.mxu1 %v768_v11  ;;  %671 = vmatprep.subr.bf16.mxu0 %v769_v12  ;;  %v789_v32 = vld [vmem:[%s1038_s0] ss:$16 sps:$4 sm:$0xff]   ;;  %v791_v33 = vld [vmem:[%s1038_s0 + $0x4] ss:$16 sps:$4 sm:$0xff]   ;;  %v792_v34 = vld [vmem:[%s1038_s0 + $0x8] ss:$16 sps:$4 sm:$0xff]  }
   0xe   :  { %717 = vmatprep.subr.bf16.mxu1 %v770_v13  ;;  %v794_v35 = vld [vmem:[%s1038_s0 + $0xc] ss:$16 sps:$4 sm:$0xff]   ;;  %422 = vmatprep.mubr.bf16.mxu0 %v791_v33  ;;  %v795_v36 = vld [vmem:[%s1038_s0 + $0x24] ss:$16 sps:$4 sm:$0xff]   ;;  %v799_v38 = vld [vmem:[%s1038_s0 + $0x20] ss:$16 sps:$4 sm:$0xff]  }
   0xf   :  { %494 = vmatprep.mubr.bf16.mxu1 %v794_v35  ;;  %v797_v37 = vld [vmem:[%s1038_s0 + $0x2c] ss:$16 sps:$4 sm:$0xff]   ;;  %v800_v39 = vld [vmem:[%s1038_s0 + $0x28] ss:$16 sps:$4 sm:$0xff]   ;;  %v801_v40 = vld [vmem:[%s1038_s0 + $0x44] ss:$16 sps:$4 sm:$0xff]  }
  0x10   :  { %672 = vmatpush3.bf16.msra.mxu0 %v771_v14  ;;  %v803_v41 = vld [vmem:[%s1038_s0 + $0x4c] ss:$16 sps:$4 sm:$0xff]   ;;  %v805_v42 = vld [vmem:[%s1038_s0 + $0x40] ss:$16 sps:$4 sm:$0xff]   ;;  %v806_v43 = vld [vmem:[%s1038_s0 + $0x48] ss:$16 sps:$4 sm:$0xff]  }
  0x11   :  { %718 = vmatpush3.bf16.msra.mxu1 %v772_v15  ;;  %673 = vmatprep.subr.bf16.mxu0 %v773_v16  ;;  %v807_v44 = vld [vmem:[%s1038_s0 + $0x64] ss:$16 sps:$4 sm:$0xff]   ;;  %v809_v45 = vld [vmem:[%s1038_s0 + $0x6c] ss:$16 sps:$4 sm:$0xff]   ;;  %v811_v48 = vld [vmem:[%s1038_s0 + $0x60] ss:$16 sps:$4 sm:$0xff]  }
  0x12   :  { %719 = vmatprep.subr.bf16.mxu1 %v774_v17  ;;  %v812_v49 = vld [vmem:[%s1038_s0 + $0x68] ss:$16 sps:$4 sm:$0xff]  }
  0x14   :  { %674 = vmatpush3.bf16.msra.mxu0 %v775_v18 }
  0x15   :  { %720 = vmatpush3.bf16.msra.mxu1 %v776_v19  ;;  %675 = vmatprep.subr.bf16.mxu0 %v777_v20 }
  0x16   :  { %721 = vmatprep.subr.bf16.mxu1 %v778_v21 }
  0x18   :  { %676 = vmatpush3.bf16.msra.mxu0 %v779_v22 }
  0x19   :  { %722 = vmatpush3.bf16.msra.mxu1 %v780_v23  ;;  %677 = vmatprep.subr.bf16.mxu0 %v781_v24 }
  0x1a   :  { %723 = vmatprep.subr.bf16.mxu1 %v782_v25 }
  0x1c   :  { %678 = vmatpush3.bf16.msra.mxu0 %v783_v26 }
  0x1d   :  { %724 = vmatpush3.bf16.msra.mxu1 %v784_v27  ;;  %679 = vmatprep.subr.bf16.mxu0 %v785_v28 }
  0x1e   :  { %725 = vmatprep.subr.bf16.mxu1 %v786_v29 }
  0x20   :  { %680 = vmatpush3.bf16.msra.mxu0 %v787_v30 }
  0x21   :  { %726 = vmatpush3.bf16.msra.mxu1 %v788_v31 }
  0x23   :  { %423 = vmatmul.mubr.bf16.vlgmr.msra.gmra.mrb[0].mxu0 %v789_v32 }
  0x24   :  { %495 = vmatmul.mubr.bf16.vlgmr.msra.gmra.mrb[0].mxu1 %v792_v34  ;;  %430 = vmatprep.mubr.bf16.mxu0 %v795_v36 }
  0x25   :  { %502 = vmatprep.mubr.bf16.mxu1 %v797_v37 }
  0x2b   :  { %431 = vmatmul.mubr.bf16.gmra.mrb[4].mxu0 %v799_v38 }
  0x2c   :  { %503 = vmatmul.mubr.bf16.gmra.mrb[4].mxu1 %v800_v39  ;;  %438 = vmatprep.mubr.bf16.mxu0 %v801_v40 }
  0x2d   :  { %510 = vmatprep.mubr.bf16.mxu1 %v803_v41 }
  0x33   :  { %439 = vmatmul.mubr.bf16.gmra.mrb[8].mxu0 %v805_v42 }
  0x34   :  { %511 = vmatmul.mubr.bf16.gmra.mrb[8].mxu1 %v806_v43  ;;  %446 = vmatprep.mubr.bf16.mxu0 %v807_v44 }
  0x35   :  { %518 = vmatprep.mubr.bf16.mxu1 %v809_v45 }
  0x3b   :  { %447 = vmatmul.mubr.bf16.gmra.mrb[12].mxu0 %v811_v48 }
  0x3c   :  { %519 = vmatmul.mubr.bf16.gmra.mrb[12].mxu1 %v812_v49  ;;  %454 = vmatprep.mubr.bf16.mxu0 %v612_v50 }
  0x3d   :  { %526 = vmatprep.mubr.bf16.mxu1 %v614_v51 }
  0x43   :  { %455 = vmatmul.mubr.bf16.gmra.mrb[16].mxu0 %v611_v52 }
  0x44   :  { %527 = vmatmul.mubr.bf16.gmra.mrb[16].mxu1 %v613_v53 }
  0xf6   :  { %v681_v54 = vpop.f32.mrb[0].mxu0 }
  0xf7   :  { %v727_v55 = vpop.f32.mrb[0].mxu1  ;;  %v682_v57 = vpop.f32.mrb[1].mxu0 }
  0xf8   :  { %v683_v58 = vadd.f32 %v682_v57, %v681_v54  ;;  %v728_v59 = vpop.f32.mrb[1].mxu1  ;;  %v684_v60 = vpop.f32.mrb[2].mxu0 }
  0xf9   :  { %v729_v61 = vadd.f32 %v728_v59, %v727_v55  ;;  %v730_v62 = vpop.f32.mrb[2].mxu1  ;;  %v685_v63 = vpop.f32.mrb[3].mxu0 }
  0xfa   :  { %v425_v0 = vadd.f32 %v683_v58, %v990_v56  ;;  %v686_v1 = vadd.f32 %v685_v63, %v684_v60  ;;  %v731_v2 = vpop.f32.mrb[3].mxu1 }
  0xfb   :  { %v732_v3 = vadd.f32 %v731_v2, %v730_v62 }
  0xfc   :  { %v497_v4 = vadd.f32 %v729_v61, %v425_v0  ;;  %v428_v5 = vadd.f32 %v686_v1, %v990_v56 }
  0xfe   :  { %v534_v6 = vmax.f32 %v497_v4, 0.0  ;;  %v500_v7 = vadd.f32 %v732_v3, %v428_v5  ;;  %v687_v8 = vpop.f32.mrb[4].mxu0 }
  0xff   :  { %v733_v9 = vpop.f32.mrb[4].mxu1  ;;  %v688_v10 = vpop.f32.mrb[5].mxu0 }
 0x100   :  { %v656_v11 = vpack.c.bf16 %v534_v6, %v534_v6  ;;  %v535_v12 = vmax.f32 %v500_v7, 0.0  ;;  %v689_v13 = vadd.f32 %v688_v10, %v687_v8  ;;  %v734_v14 = vpop.f32.mrb[5].mxu1  ;;  %v690_v15 = vpop.f32.mrb[6].mxu0 }
 0x101   :  { %v735_v16 = vadd.f32 %v734_v14, %v733_v9  ;;  %v736_v17 = vpop.f32.mrb[6].mxu1  ;;  %v691_v18 = vpop.f32.mrb[7].mxu0 }
 0x102   :  { %581 = vst.msk [vmem:[%s1040_s3] sm:$0xf] %vm580_vm0, %v656_v11  ;;  %v657_v19 = vpack.c.bf16 %v535_v12, %v535_v12  ;;  %v433_v20 = vadd.f32 %v689_v13, %v990_v56  ;;  %v692_v21 = vadd.f32 %v691_v18, %v690_v15  ;;  %v737_v22 = vpop.f32.mrb[7].mxu1 }
 0x103   :  { %v738_v23 = vadd.f32 %v737_v22, %v736_v17 }
 0x104   :  { %582 = vst.msk [vmem:[%s1040_s3 + $0x4] sm:$0xf] %vm580_vm0, %v657_v19  ;;  %v505_v24 = vadd.f32 %v735_v16, %v433_v20  ;;  %v436_v25 = vadd.f32 %v692_v21, %v990_v56 }
 0x106   :  { %v536_v26 = vmax.f32 %v505_v24, 0.0  ;;  %v508_v27 = vadd.f32 %v738_v23, %v436_v25  ;;  %v693_v28 = vpop.f32.mrb[8].mxu0 }
 0x107   :  { %v739_v29 = vpop.f32.mrb[8].mxu1  ;;  %v694_v30 = vpop.f32.mrb[9].mxu0 }
 0x108   :  { %v658_v31 = vpack.c.bf16 %v536_v26, %v536_v26  ;;  %v537_v32 = vmax.f32 %v508_v27, 0.0  ;;  %v695_v33 = vadd.f32 %v694_v30, %v693_v28  ;;  %v740_v34 = vpop.f32.mrb[9].mxu1  ;;  %v696_v35 = vpop.f32.mrb[10].mxu0 }
 0x109   :  { %v741_v36 = vadd.f32 %v740_v34, %v739_v29  ;;  %v742_v37 = vpop.f32.mrb[10].mxu1  ;;  %v697_v38 = vpop.f32.mrb[11].mxu0 }
 0x10a   :  { %583 = vst.msk [vmem:[%s1040_s3 + $0x8] sm:$0xf] %vm580_vm0, %v658_v31  ;;  %v659_v39 = vpack.c.bf16 %v537_v32, %v537_v32  ;;  %v441_v40 = vadd.f32 %v695_v33, %v990_v56  ;;  %v698_v41 = vadd.f32 %v697_v38, %v696_v35  ;;  %v743_v42 = vpop.f32.mrb[11].mxu1 }
 0x10b   :  { %v744_v43 = vadd.f32 %v743_v42, %v742_v37 }
 0x10c   :  { %584 = vst.msk [vmem:[%s1040_s3 + $0xc] sm:$0xf] %vm580_vm0, %v659_v39  ;;  %v513_v44 = vadd.f32 %v741_v36, %v441_v40  ;;  %v444_v45 = vadd.f32 %v698_v41, %v990_v56 }
 0x10e   :  { %v538_v46 = vmax.f32 %v513_v44, 0.0  ;;  %v516_v47 = vadd.f32 %v744_v43, %v444_v45  ;;  %v699_v48 = vpop.f32.mrb[12].mxu0 }
 0x10f   :  { %v745_v49 = vpop.f32.mrb[12].mxu1  ;;  %v700_v50 = vpop.f32.mrb[13].mxu0 }
 0x110   :  { %v660_v51 = vpack.c.bf16 %v538_v46, %v538_v46  ;;  %v539_v52 = vmax.f32 %v516_v47, 0.0  ;;  %v701_v53 = vadd.f32 %v700_v50, %v699_v48  ;;  %v746_v54 = vpop.f32.mrb[13].mxu1  ;;  %v702_v55 = vpop.f32.mrb[14].mxu0 }
 0x111   :  { %v747_v57 = vadd.f32 %v746_v54, %v745_v49  ;;  %v748_v58 = vpop.f32.mrb[14].mxu1  ;;  %v703_v59 = vpop.f32.mrb[15].mxu0 }
 0x112   :  { %585 = vst.msk [vmem:[%s1040_s3 + $0x10] sm:$0xf] %vm580_vm0, %v660_v51  ;;  %v661_v60 = vpack.c.bf16 %v539_v52, %v539_v52  ;;  %v449_v61 = vadd.f32 %v701_v53, %v990_v56  ;;  %v704_v62 = vadd.f32 %v703_v59, %v702_v55  ;;  %v749_v63 = vpop.f32.mrb[15].mxu1 }
 0x113   :  { %v750_v0 = vadd.f32 %v749_v63, %v748_v58 }
 0x114   :  { %586 = vst.msk [vmem:[%s1040_s3 + $0x14] sm:$0xf] %vm580_vm0, %v661_v60  ;;  %v521_v1 = vadd.f32 %v747_v57, %v449_v61  ;;  %v452_v2 = vadd.f32 %v704_v62, %v990_v56 }
 0x116   :  { %v540_v3 = vmax.f32 %v521_v1, 0.0  ;;  %v524_v4 = vadd.f32 %v750_v0, %v452_v2  ;;  %v705_v5 = vpop.f32.mrb[16].mxu0 }
 0x117   :  { %v751_v6 = vpop.f32.mrb[16].mxu1  ;;  %v706_v7 = vpop.f32.mrb[17].mxu0 }
 0x118   :  { %v662_v8 = vpack.c.bf16 %v540_v3, %v540_v3  ;;  %v541_v9 = vmax.f32 %v524_v4, 0.0  ;;  %v707_v10 = vadd.f32 %v706_v7, %v705_v5  ;;  %v752_v11 = vpop.f32.mrb[17].mxu1  ;;  %v708_v12 = vpop.f32.mrb[18].mxu0 }
 0x119   :  { %v753_v13 = vadd.f32 %v752_v11, %v751_v6  ;;  %v754_v14 = vpop.f32.mrb[18].mxu1  ;;  %v709_v15 = vpop.f32.mrb[19].mxu0 }
 0x11a   :  { %587 = vst.msk [vmem:[%s1040_s3 + $0x18] sm:$0xf] %vm580_vm0, %v662_v8  ;;  %v663_v16 = vpack.c.bf16 %v541_v9, %v541_v9  ;;  %v457_v17 = vadd.f32 %v707_v10, %v990_v56  ;;  %v755_v18 = vpop.f32.mrb[19].mxu1 }
 0x11c   :  { %588 = vst.msk [vmem:[%s1040_s3 + $0x1c] sm:$0xf] %vm580_vm0, %v663_v16  ;;  %v529_v19 = vadd.f32 %v753_v13, %v457_v17 }
 0x11e   :  { %v542_v20 = vmax.f32 %v529_v19, 0.0 }
 0x120   :  { %v664_v21 = vpack.c.bf16 %v542_v20, %v542_v20 }
 0x122   :  { %589 = vst.msk [vmem:[%s1040_s3 + $0x20] sm:$0xf] %vm580_vm0, %v664_v21 }

// kernel: qnetwork_forward.6
= control target key start
LH: loop header
LB: loop body
LE: loop exit
PB: predicated region body
PF: predicated region fallthrough
CT: control target
= control target key end

     0   :  { %vm372_vm0 = vcmask 523264   ;;  %vm546_vm1 = vcmask 519168   ;;  %s909_s1 = inlined_call_operand.vmem [shape: bf16[576,64], index: 1, kind: input, shape index: {}]   ;;  %s910_s0 = inlined_call_operand.vmem [shape: bf16[32,576], index: 0, kind: input, shape index: {}]   ;;  %s911_s2 = inlined_call_operand.vmem [shape: f32[1,64], index: 2, kind: input, shape index: {}]   ;;  %s912_s3 = inlined_call_operand.vmem [shape: bf16[32,64], index: 3, kind: output, shape index: {}]  }
   0x1   :  { %v686_v0 = vld [vmem:[%s909_s1 + $0x40] sm:$0xff]   ;;  %v690_v4 = vld [vmem:[%s909_s1 + $0x48] sm:$0xff]   ;;  %v694_v8 = vld [vmem:[%s909_s1 + $0x50] sm:$0xff]  }
   0x2   :  { %v687_v1 = vld [vmem:[%s909_s1] sm:$0xff]   ;;  %612 = vmatprep.subr.bf16.mxu0 %v686_v0  ;;  %v691_v5 = vld [vmem:[%s909_s1 + $0x8] sm:$0xff]   ;;  %v695_v9 = vld [vmem:[%s909_s1 + $0x10] sm:$0xff]  }
   0x3   :  { %v688_v2 = vld [vmem:[%s909_s1 + $0xc0] sm:$0xff]   ;;  %613 = vmatpush3.bf16.msra.mxu0 %v687_v1  ;;  %v692_v6 = vld [vmem:[%s909_s1 + $0xc8] sm:$0xff]   ;;  %v696_v10 = vld [vmem:[%s909_s1 + $0xd0] sm:$0xff]  }
   0x4   :  { %v689_v3 = vld [vmem:[%s909_s1 + $0x80] sm:$0xff]   ;;  %640 = vmatprep.subr.bf16.mxu1 %v688_v2  ;;  %614 = vmatprep.subr.bf16.mxu0 %v690_v4  ;;  %v693_v7 = vld [vmem:[%s909_s1 + $0x88] sm:$0xff]   ;;  %v697_v11 = vld [vmem:[%s909_s1 + $0x90] sm:$0xff]  }
   0x5   :  { %641 = vmatpush3.bf16.msra.mxu1 %v689_v3  ;;  %v698_v12 = vld [vmem:[%s909_s1 + $0x58] sm:$0xff]   ;;  %v702_v16 = vld [vmem:[%s909_s1 + $0x60] sm:$0xff]   ;;  %v706_v20 = vld [vmem:[%s909_s1 + $0x68] sm:$0xff]  }
   0x6   :  { %642 = vmatprep.subr.bf16.mxu1 %v692_v6  ;;  %v699_v13 = vld [vmem:[%s909_s1 + $0x18] sm:$0xff]   ;;  %v703_v17 = vld [vmem:[%s909_s1 + $0x20] sm:$0xff]   ;;  %v707_v21 = vld [vmem:[%s909_s1 + $0x28] sm:$0xff]  }
   0x7   :  { %615 = vmatpush3.bf16.msra.mxu0 %v691_v5  ;;  %v700_v14 = vld [vmem:[%s909_s1 + $0xd8] sm:$0xff]   ;;  %v704_v18 = vld [vmem:[%s909_s1 + $0xe0] sm:$0xff]   ;;  %v708_v22 = vld [vmem:[%s909_s1 + $0xe8] sm:$0xff]  }
   0x8   :  { %616 = vmatprep.subr.bf16.mxu0 %v694_v8  ;;  %v701_v15 = vld [vmem:[%s909_s1 + $0x98] sm:$0xff]   ;;  %v705_v19 = vld [vmem:[%s909_s1 + $0xa0] sm:$0xff]   ;;  %v709_v23 = vld [vmem:[%s909_s1 + $0xa8] sm:$0xff]  }
   0x9   :  { %643 = vmatpush3.bf16.msra.mxu1 %v693_v7  ;;  %v710_v24 = vld [vmem:[%s909_s1 + $0x70] sm:$0xff]   ;;  %v714_v28 = vld [vmem:[%s909_s1 + $0x78] sm:$0xff]   ;;  %v721_v34 = vld [vmem:[%s909_s1 + $0x100] sm:$0xff]  }
   0xa   :  { %644 = vmatprep.subr.bf16.mxu1 %v696_v10  ;;  %v711_v25 = vld [vmem:[%s909_s1 + $0x30] sm:$0xff]   ;;  %v715_v29 = vld [vmem:[%s909_s1 + $0x38] sm:$0xff]   ;;  %v724_v36 = vld [vmem:[%s910_s0 + $0xc] ss:$20 sps:$4 sm:$0xff]  }
   0xb   :  { %617 = vmatpush3.bf16.msra.mxu0 %v695_v9  ;;  %v712_v26 = vld [vmem:[%s909_s1 + $0xf0] sm:$0xff]   ;;  %v716_v30 = vld [vmem:[%s909_s1 + $0xf8] sm:$0xff]   ;;  %v725_v37 = vld [vmem:[%s909_s1 + $0x108] sm:$0xff]   ;;  %460 = vmatprep.mubr.bf16.mxu1 %v724_v36 }
   0xc   :  { %618 = vmatprep.subr.bf16.mxu0 %v698_v12  ;;  %v713_v27 = vld [vmem:[%s909_s1 + $0xb0] sm:$0xff]   ;;  %v719_v32 = vld [vmem:[%s910_s0 + $0x4] ss:$20 sps:$4 sm:$0xff]   ;;  %v722_v35 = vld [vmem:[%s910_s0 + $0x8] ss:$20 sps:$4 sm:$0xff]  }
   0xd   :  { %645 = vmatpush3.bf16.msra.mxu1 %v697_v11  ;;  %v717_v31 = vld [vmem:[%s910_s0] ss:$20 sps:$4 sm:$0xff]   ;;  %v720_v33 = vld [vmem:[%s909_s1 + $0xb8] sm:$0xff]   ;;  %411 = vmatprep.mubr.bf16.mxu0 %v719_v32  ;;  %v732_v42 = vld [vmem:[%s910_s0 + $0x30] ss:$20 sps:$4 sm:$0xff]  }
   0xe   :  { %646 = vmatprep.subr.bf16.mxu1 %v700_v14  ;;  %v726_v38 = vld [vmem:[%s910_s0 + $0x2c] ss:$20 sps:$4 sm:$0xff]   ;;  %v728_v39 = vld [vmem:[%s910_s0 + $0x28] ss:$20 sps:$4 sm:$0xff]   ;;  %v729_v40 = vld [vmem:[%s909_s1 + $0x110] sm:$0xff]  }
   0xf   :  { %619 = vmatpush3.bf16.msra.mxu0 %v699_v13  ;;  %v730_v41 = vld [vmem:[%s910_s0 + $0x34] ss:$20 sps:$4 sm:$0xff]   ;;  %v733_v43 = vld [vmem:[%s909_s1 + $0x118] sm:$0xff]   ;;  %v734_v44 = vld [vmem:[%s910_s0 + $0x10] ss:$20 sps:$4 sm:$0xff]  }
  0x10   :  { %620 = vmatprep.subr.bf16.mxu0 %v702_v16  ;;  %v735_v45 = vld [vmem:[%s910_s0 + $0x38] ss:$20 sps:$4 sm:$0xff]   ;;  %v555_v47 = vld [vmem:[%s911_s2] ss:$0 sm:$0xff] }
  0x11   :  { %647 = vmatpush3.bf16.msra.mxu1 %v701_v15 }
  0x12   :  { %648 = vmatprep.subr.bf16.mxu1 %v704_v18 }
  0x13   :  { %621 = vmatpush3.bf16.msra.mxu0 %v703_v17 }
  0x14   :  { %622 = vmatprep.subr.bf16.mxu0 %v706_v20 }
  0x15   :  { %649 = vmatpush3.bf16.msra.mxu1 %v705_v19 }
  0x16   :  { %650 = vmatprep.subr.bf16.mxu1 %v708_v22 }
  0x17   :  { %623 = vmatpush3.bf16.msra.mxu0 %v707_v21 }
  0x18   :  { %624 = vmatprep.subr.bf16.mxu0 %v710_v24 }
  0x19   :  { %651 = vmatpush3.bf16.msra.mxu1 %v709_v23 }
  0x1a   :  { %652 = vmatprep.subr.bf16.mxu1 %v712_v26 }
  0x1b   :  { %625 = vmatpush3.bf16.msra.mxu0 %v711_v25 }
  0x1c   :  { %626 = vmatprep.subr.bf16.mxu0 %v714_v28 }
  0x1d   :  { %653 = vmatpush3.bf16.msra.mxu1 %v713_v27 }
  0x1e   :  { %654 = vmatprep.subr.bf16.mxu1 %v716_v30 }
  0x1f   :  { %627 = vmatpush3.bf16.msra.mxu0 %v715_v29 }
  0x20   :  { %674 = vmatprep.subr.bf16.mxu0 %v721_v34 }
  0x21   :  { %655 = vmatpush3.bf16.msra.mxu1 %v720_v33 }
  0x22   :  { %412 = vmatmul.mubr.bf16.vlgmr.msra.gmra.mrb[0].mxu0 %v717_v31 }
  0x23   :  { %675 = vmatpush3.bf16.msra.mxu0 %v721_v34  ;;  %419 = vmatprep.mubr.bf16.mxu0 %v726_v38 }
  0x24   :  { %461 = vmatmul.mubr.bf16.vlgmr.msra.gmra.mrb[0].mxu1 %v722_v35  ;;  %676 = vmatprep.subr.bf16.mxu0 %v725_v37 }
  0x25   :  { %468 = vmatprep.mubr.bf16.mxu1 %v730_v41 }
  0x27   :  { %677 = vmatpush3.bf16.msra.mxu0 %v725_v37 }
  0x28   :  { %678 = vmatprep.subr.bf16.mxu0 %v729_v40 }
  0x2a   :  { %420 = vmatmul.mubr.bf16.gmra.mrb[4].mxu0 %v728_v39 }
  0x2b   :  { %682 = vmatprep.mubr.msk.bf16.mxu0 %vm372_vm0, %v734_v44  ;;  %679 = vmatpush3.bf16.msra.mxu0 %v729_v40 }
  0x2c   :  { %469 = vmatmul.mubr.bf16.gmra.mrb[4].mxu1 %v732_v42  ;;  %680 = vmatprep.subr.bf16.mxu0 %v733_v43 }
  0x2f   :  { %681 = vmatpush3.bf16.msra.mxu0 %v733_v43 }
  0x32   :  { %683 = vmatmul.mubr.msk.bf16.vlgmr.msra.gmra.mrb[8].mxu0 %vm372_vm0, %v735_v45 }
  0xf5   :  { %v628_v46 = vpop.f32.mrb[0].mxu0 }
  0xf6   :  { %v629_v48 = vpop.f32.mrb[1].mxu0 }
  0xf7   :  { %v630_v49 = vadd.f32 %v629_v48, %v628_v46  ;;  %v631_v50 = vpop.f32.mrb[2].mxu0  ;;  %v656_v51 = vpop.f32.mrb[0].mxu1 }
  0xf8   :  { %v632_v52 = vpop.f32.mrb[3].mxu0  ;;  %v657_v55 = vpop.f32.mrb[1].mxu1 }
  0xf9   :  { %v414_v53 = vadd.f32 %v630_v49, %v555_v47  ;;  %v633_v54 = vadd.f32 %v632_v52, %v631_v50  ;;  %v658_v56 = vadd.f32 %v657_v55, %v656_v51  ;;  %v659_v57 = vpop.f32.mrb[2].mxu1 }
  0xfa   :  { %v660_v59 = vpop.f32.mrb[3].mxu1 }
  0xfb   :  { %v417_v58 = vadd.f32 %v633_v54, %v555_v47  ;;  %v661_v60 = vadd.f32 %v660_v59, %v659_v57  ;;  %v463_v61 = vadd.f32 %v658_v56, %v414_v53 }
  0xfd   :  { %v634_v62 = vpop.f32.mrb[4].mxu0  ;;  %v466_v0 = vadd.f32 %v661_v60, %v417_v58 }
  0xfe   :  { %v635_v63 = vpop.f32.mrb[5].mxu0 }
  0xff   :  { %v636_v1 = vadd.f32 %v635_v63, %v634_v62  ;;  %v637_v2 = vpop.f32.mrb[6].mxu0  ;;  %v662_v3 = vpop.f32.mrb[4].mxu1 }
 0x100   :  { %v638_v4 = vpop.f32.mrb[7].mxu0  ;;  %v663_v7 = vpop.f32.mrb[5].mxu1 }
 0x101   :  { %v422_v5 = vadd.f32 %v636_v1, %v555_v47  ;;  %v639_v6 = vadd.f32 %v638_v4, %v637_v2  ;;  %v664_v8 = vadd.f32 %v663_v7, %v662_v3  ;;  %v665_v9 = vpop.f32.mrb[6].mxu1 }
 0x102   :  { %v666_v11 = vpop.f32.mrb[7].mxu1 }
 0x103   :  { %v425_v10 = vadd.f32 %v639_v6, %v555_v47  ;;  %v667_v12 = vadd.f32 %v666_v11, %v665_v9  ;;  %v471_v13 = vadd.f32 %v664_v8, %v422_v5 }
 0x105   :  { %v684_v14 = vpop.f32.mrb[8].mxu0  ;;  %v474_v15 = vadd.f32 %v667_v12, %v425_v10 }
 0x106   :  { %v520_v16 = vadd.f32 %v684_v14, %v471_v13  ;;  %v511_v17 = vpop.f32.mrb[9].mxu0 }
 0x107   :  { %v512_v18 = vadd.f32 %v511_v17, %v463_v61  ;;  %v685_v19 = vpop.f32.mrb[10].mxu0 }
 0x108   :  { %v528_v20 = vmax.f32 %v520_v16, 0.0  ;;  %v523_v21 = vadd.f32 %v685_v19, %v474_v15  ;;  %v514_v22 = vpop.f32.mrb[11].mxu0 }
 0x109   :  { %v526_v23 = vmax.f32 %v512_v18, 0.0  ;;  %v515_v24 = vadd.f32 %v514_v22, %v466_v0 }
 0x10a   :  { %v610_v25 = vpack.c.bf16 %v528_v20, %v528_v20  ;;  %v529_v26 = vmax.f32 %v523_v21, 0.0 }
 0x10b   :  { %v608_v27 = vpack.c.bf16 %v526_v23, %v526_v23  ;;  %v527_v28 = vmax.f32 %v515_v24, 0.0 }
 0x10c   :  { %549 = vst.msk [vmem:[%s912_s3 + $0x8] sm:$0xf] %vm546_vm1, %v610_v25  ;;  %v611_v29 = vpack.c.bf16 %v529_v26, %v529_v26 }
 0x10d   :  { %547 = vst.msk [vmem:[%s912_s3] sm:$0xf] %vm546_vm1, %v608_v27  ;;  %v609_v30 = vpack.c.bf16 %v527_v28, %v527_v28 }
 0x10e   :  { %550 = vst.msk [vmem:[%s912_s3 + $0xc] sm:$0xf] %vm546_vm1, %v611_v29 }
 0x10f   :  { %548 = vst.msk [vmem:[%s912_s3 + $0x4] sm:$0xf] %vm546_vm1, %v609_v30 }

// kernel: qnetwork_forward.7
= control target key start
LH: loop header
LB: loop body
LE: loop exit
PB: predicated region body
PF: predicated region fallthrough
CT: control target
= control target key end

     0   :  { %v3476_v2 = vmov 0   ;;  %v3477_v60 = vmov 1966171168   ;;  %v565_v62 = vlaneseq  ;;  %s4570_s0 = inlined_call_operand.vmem [shape: bf16[2,1024], index: 0, kind: input, shape index: {}]   ;;  %s4571_s1 = inlined_call_operand.vmem [shape: bf16[2,128], index: 1, kind: input, shape index: {}]   ;;  %s4572_s2 = inlined_call_operand.vmem [shape: bf16[1024,512], index: 2, kind: input, shape index: {}]   ;;  %s4573_s3 = inlined_call_operand.vmem [shape: bf16[128,512], index: 3, kind: input, shape index: {}]   ;;  %s4574_s4 = inlined_call_operand.vmem [shape: f32[1,512], index: 4, kind: input, shape index: {}]   ;;  %s4575_s5 = inlined_call_operand.vmem [shape: bf16[512,6], index: 5, kind: input, shape index: {}]   ;;  %s4576_s6 = inlined_call_operand.vmem [shape: f32[1,6], index: 6, kind: input, shape index: {}]   ;;  %s4577_s7 = inlined_call_operand.hbm [shape: f32[2,6], index: 7, kind: output, shape index: {}]  }
   0x1   :  { %v2987_v0 = vld [vmem:[%s4573_s3 + $0x4] ss:$16 sps:$4 sm:$0xff]   ;;  %v2989_v1 = vld [vmem:[%s4573_s3 + $0xc] ss:$16 sps:$4 sm:$0xff]   ;;  %510 = vmatprep.mubr.bf16.mxu0 %v3476_v2  ;;  %551 = vmatprep.mubr.bf16.mxu1 %v3476_v2  ;;  %v2991_v3 = vld [vmem:[%s4573_s3] ss:$16 sps:$4 sm:$0xff]   ;;  %v563_v61 = vunpack.c.l.s4 %v3477_v60 }
   0x2   :  { %478 = vmatprep.subr.bf16.mxu0 %v2987_v0  ;;  %v2992_v4 = vld [vmem:[%s4573_s3 + $0x8] ss:$16 sps:$4 sm:$0xff]   ;;  %519 = vmatprep.subr.bf16.mxu1 %v2989_v1  ;;  %v2993_v5 = vld [vmem:[%s4573_s3 + $0x24] ss:$16 sps:$4 sm:$0xff]   ;;  %v2995_v6 = vld [vmem:[%s4573_s3 + $0x2c] ss:$16 sps:$4 sm:$0xff]  }
   0x3   :  { %479 = vmatpush1.bf16.msra.mxu0 %v2991_v3  ;;  %520 = vmatpush1.bf16.msra.mxu1 %v2992_v4  ;;  %v2997_v7 = vld [vmem:[%s4573_s3 + $0x20] ss:$16 sps:$4 sm:$0xff]   ;;  %v2998_v8 = vld [vmem:[%s4573_s3 + $0x28] ss:$16 sps:$4 sm:$0xff]   ;;  %v2999_v9 = vld [vmem:[%s4573_s3 + $0x44] ss:$16 sps:$4 sm:$0xff]   ;;  %v564_v3 = vunpack.c.0.s8 %v563_v61 }
   0x4   :  { %480 = vmatprep.subr.bf16.mxu0 %v2993_v5  ;;  %521 = vmatprep.subr.bf16.mxu1 %v2995_v6  ;;  %v3001_v10 = vld [vmem:[%s4573_s3 + $0x4c] ss:$16 sps:$4 sm:$0xff]   ;;  %v3003_v11 = vld [vmem:[%s4573_s3 + $0x40] ss:$16 sps:$4 sm:$0xff]   ;;  %v3004_v12 = vld [vmem:[%s4573_s3 + $0x48] ss:$16 sps:$4 sm:$0xff]  }
   0x5   :  { %v3005_v13 = vld [vmem:[%s4573_s3 + $0x64] ss:$16 sps:$4 sm:$0xff]   ;;  %v3007_v14 = vld [vmem:[%s4573_s3 + $0x6c] ss:$16 sps:$4 sm:$0xff]   ;;  %v3009_v15 = vld [vmem:[%s4573_s3 + $0x60] ss:$16 sps:$4 sm:$0xff]  }
   0x6   :  { %v3010_v16 = vld [vmem:[%s4573_s3 + $0x68] ss:$16 sps:$4 sm:$0xff]   ;;  %v3011_v17 = vld [vmem:[%s4573_s3 + $0x84] ss:$16 sps:$4 sm:$0xff]   ;;  %v3013_v18 = vld [vmem:[%s4573_s3 + $0x8c] ss:$16 sps:$4 sm:$0xff]  }
   0x7   :  { %481 = vmatpush1.bf16.msra.mxu0 %v2997_v7  ;;  %522 = vmatpush1.bf16.msra.mxu1 %v2998_v8  ;;  %v3015_v19 = vld [vmem:[%s4573_s3 + $0x80] ss:$16 sps:$4 sm:$0xff]   ;;  %v3016_v20 = vld [vmem:[%s4573_s3 + $0x88] ss:$16 sps:$4 sm:$0xff]   ;;  %v3017_v21 = vld [vmem:[%s4573_s3 + $0xa4] ss:$16 sps:$4 sm:$0xff]  }
   0x8   :  { %482 = vmatprep.subr.bf16.mxu0 %v2999_v9  ;;  %523 = vmatprep.subr.bf16.mxu1 %v3001_v10  ;;  %v3019_v22 = vld [vmem:[%s4573_s3 + $0xac] ss:$16 sps:$4 sm:$0xff]   ;;  %v3021_v23 = vld [vmem:[%s4573_s3 + $0xa0] ss:$16 sps:$4 sm:$0xff]   ;;  %v3022_v24 = vld [vmem:[%s4573_s3 + $0xa8] ss:$16 sps:$4 sm:$0xff]  }
   0x9   :  { %v3023_v25 = vld [vmem:[%s4573_s3 + $0xc4] ss:$16 sps:$4 sm:$0xff]   ;;  %v3025_v26 = vld [vmem:[%s4573_s3 + $0xcc] ss:$16 sps:$4 sm:$0xff]   ;;  %v3027_v27 = vld [vmem:[%s4573_s3 + $0xc0] ss:$16 sps:$4 sm:$0xff]  }
   0xa   :  { %v3028_v28 = vld [vmem:[%s4573_s3 + $0xc8] ss:$16 sps:$4 sm:$0xff]   ;;  %v3029_v29 = vld [vmem:[%s4573_s3 + $0xe4] ss:$16 sps:$4 sm:$0xff]   ;;  %v3031_v30 = vld [vmem:[%s4573_s3 + $0xec] ss:$16 sps:$4 sm:$0xff]  }
   0xb   :  { %483 = vmatpush1.bf16.msra.mxu0 %v3003_v11  ;;  %524 = vmatpush1.bf16.msra.mxu1 %v3004_v12  ;;  %v3033_v31 = vld [vmem:[%s4573_s3 + $0xe0] ss:$16 sps:$4 sm:$0xff]   ;;  %v3034_v32 = vld [vmem:[%s4573_s3 + $0xe8] ss:$16 sps:$4 sm:$0xff]   ;;  %v3037_v33 = vld [vmem:[%s4572_s2 + $0x4] ss:$16 sps:$4 sm:$0xff]  }
   0xc   :  { %484 = vmatprep.subr.bf16.mxu0 %v3005_v13  ;;  %525 = vmatprep.subr.bf16.mxu1 %v3007_v14  ;;  %v3040_v34 = vld [vmem:[%s4572_s2 + $0x204] ss:$16 sps:$4 sm:$0xff]   ;;  %v285_v35 = vld [vmem:[%s4571_s1] sm:$0x1]  ;;  %v3708_v4 = vshrl.u32 %v565_v62, 7 }
   0xd   :  { %v3035_v36 = vld [vmem:[%s4572_s2] ss:$16 sps:$4 sm:$0xff]   ;;  %v3043_v38 = vld [vmem:[%s4572_s2 + $0x24] ss:$16 sps:$4 sm:$0xff]  }
   0xe   :  { %v3038_v37 = vld [vmem:[%s4572_s2 + $0x200] ss:$16 sps:$4 sm:$0xff]   ;;  %v3046_v39 = vld [vmem:[%s4572_s2 + $0x224] ss:$16 sps:$4 sm:$0xff]   ;;  %v3723_v9 = vsub.s32 %v564_v3, %v3708_v4 }
   0xf   :  { %485 = vmatpush1.bf16.msra.mxu0 %v3009_v15  ;;  %526 = vmatpush1.bf16.msra.mxu1 %v3010_v16  ;;  %v3041_v40 = vld [vmem:[%s4572_s2 + $0x20] ss:$16 sps:$4 sm:$0xff]   ;;  %v3049_v42 = vld [vmem:[%s4572_s2 + $0x44] ss:$16 sps:$4 sm:$0xff]  }
  0x10   :  { %486 = vmatprep.subr.bf16.mxu0 %v3011_v17  ;;  %527 = vmatprep.subr.bf16.mxu1 %v3013_v18  ;;  %v3044_v41 = vld [vmem:[%s4572_s2 + $0x220] ss:$16 sps:$4 sm:$0xff]   ;;  %v3052_v43 = vld [vmem:[%s4572_s2 + $0x244] ss:$16 sps:$4 sm:$0xff]  }
  0x11   :  { %v3047_v44 = vld [vmem:[%s4572_s2 + $0x40] ss:$16 sps:$4 sm:$0xff]   ;;  %v3055_v46 = vld [vmem:[%s4572_s2 + $0x64] ss:$16 sps:$4 sm:$0xff]  }
  0x12   :  { %v3050_v45 = vld [vmem:[%s4572_s2 + $0x240] ss:$16 sps:$4 sm:$0xff]   ;;  %v3058_v47 = vld [vmem:[%s4572_s2 + $0x264] ss:$16 sps:$4 sm:$0xff]  }
  0x13   :  { %487 = vmatpush1.bf16.msra.mxu0 %v3015_v19  ;;  %528 = vmatpush1.bf16.msra.mxu1 %v3016_v20  ;;  %v3053_v48 = vld [vmem:[%s4572_s2 + $0x60] ss:$16 sps:$4 sm:$0xff]   ;;  %v3061_v50 = vld [vmem:[%s4572_s2 + $0x84] ss:$16 sps:$4 sm:$0xff]  }
  0x14   :  { %488 = vmatprep.subr.bf16.mxu0 %v3017_v21  ;;  %529 = vmatprep.subr.bf16.mxu1 %v3019_v22  ;;  %v3056_v49 = vld [vmem:[%s4572_s2 + $0x260] ss:$16 sps:$4 sm:$0xff]   ;;  %v3064_v51 = vld [vmem:[%s4572_s2 + $0x284] ss:$16 sps:$4 sm:$0xff]  }
  0x15   :  { %v3059_v52 = vld [vmem:[%s4572_s2 + $0x80] ss:$16 sps:$4 sm:$0xff]   ;;  %v3067_v54 = vld [vmem:[%s4572_s2 + $0xa4] ss:$16 sps:$4 sm:$0xff]  }
  0x16   :  { %v3062_v53 = vld [vmem:[%s4572_s2 + $0x280] ss:$16 sps:$4 sm:$0xff]   ;;  %v3070_v55 = vld [vmem:[%s4572_s2 + $0x2a4] ss:$16 sps:$4 sm:$0xff]  }
  0x17   :  { %489 = vmatpush1.bf16.msra.mxu0 %v3021_v23  ;;  %530 = vmatpush1.bf16.msra.mxu1 %v3022_v24  ;;  %v3065_v56 = vld [vmem:[%s4572_s2 + $0xa0] ss:$16 sps:$4 sm:$0xff]   ;;  %v3073_v58 = vld [vmem:[%s4572_s2 + $0xc4] ss:$16 sps:$4 sm:$0xff]  }
  0x18   :  { %490 = vmatprep.subr.bf16.mxu0 %v3023_v25  ;;  %531 = vmatprep.subr.bf16.mxu1 %v3025_v26  ;;  %v3068_v57 = vld [vmem:[%s4572_s2 + $0x2a0] ss:$16 sps:$4 sm:$0xff]   ;;  %v3076_v59 = vld [vmem:[%s4572_s2 + $0x2c4] ss:$16 sps:$4 sm:$0xff]  }
  0x19   :  { %v3071_v63 = vld [vmem:[%s4572_s2 + $0xc0] ss:$16 sps:$4 sm:$0xff]   ;;  %v3079_v1 = vld [vmem:[%s4572_s2 + $0xe4] ss:$16 sps:$4 sm:$0xff]  }
  0x1a   :  { %v3074_v0 = vld [vmem:[%s4572_s2 + $0x2c0] ss:$16 sps:$4 sm:$0xff]   ;;  %v3082_v2 = vld [vmem:[%s4572_s2 + $0x2e4] ss:$16 sps:$4 sm:$0xff]  }
  0x1b   :  { %491 = vmatpush1.bf16.msra.mxu0 %v3027_v27  ;;  %532 = vmatpush1.bf16.msra.mxu1 %v3028_v28  ;;  %v3077_v5 = vld [vmem:[%s4572_s2 + $0xe0] ss:$16 sps:$4 sm:$0xff]   ;;  %v3085_v7 = vld [vmem:[%s4572_s2 + $0x104] ss:$16 sps:$4 sm:$0xff]  }
  0x1c   :  { %492 = vmatprep.subr.bf16.mxu0 %v3029_v29  ;;  %533 = vmatprep.subr.bf16.mxu1 %v3031_v30  ;;  %v3080_v6 = vld [vmem:[%s4572_s2 + $0x2e0] ss:$16 sps:$4 sm:$0xff]   ;;  %v3088_v8 = vld [vmem:[%s4572_s2 + $0x304] ss:$16 sps:$4 sm:$0xff]  }
  0x1d   :  { %v3083_v10 = vld [vmem:[%s4572_s2 + $0x100] ss:$16 sps:$4 sm:$0xff]   ;;  %v3091_v13 = vld [vmem:[%s4572_s2 + $0x124] ss:$16 sps:$4 sm:$0xff]  }
  0x1e   :  { %v3086_v11 = vld [vmem:[%s4572_s2 + $0x300] ss:$16 sps:$4 sm:$0xff]   ;;  %v3094_v14 = vld [vmem:[%s4572_s2 + $0x324] ss:$16 sps:$4 sm:$0xff]  }
  0x1f   :  { %493 = vmatpush1.bf16.msra.mxu0 %v3033_v31  ;;  %534 = vmatpush1.bf16.msra.mxu1 %v3034_v32  ;;  %v28_v12 = vld [vmem:[%s4570_s0] sm:$0xff] }
  0x20   :  { %1898 = vmatprep.subr.bf16.mxu0 %v3037_v33  ;;  %1939 = vmatprep.subr.bf16.mxu1 %v3040_v34  ;;  %v568_v15 = vrot.slane %v28_v12, %v3723_v9  ;;  %v561_v16 = vcombine.high %v28_v12, %v28_v12  ;;  %v3089_v18 = vld [vmem:[%s4572_s2 + $0x120] ss:$16 sps:$4 sm:$0xff]   ;;  %v3097_v21 = vld [vmem:[%s4572_s2 + $0x144] ss:$16 sps:$4 sm:$0xff]  }
  0x21   :  { %v3092_v19 = vld [vmem:[%s4572_s2 + $0x320] ss:$16 sps:$4 sm:$0xff]   ;;  %v3100_v22 = vld [vmem:[%s4572_s2 + $0x344] ss:$16 sps:$4 sm:$0xff]  }
  0x22   :  { %511 = vmatmul.mubr.bf16.vlgmr.msra.gmra.mrb[0].mxu0 %v285_v35  ;;  %552 = vmatmul.mubr.bf16.vlgmr.msra.gmra.mrb[0].mxu1 %v285_v35  ;;  %v576_v17 = vcombine.high %v568_v15, %v568_v15  ;;  %v575_v20 = vrot.slane %v561_v16, %v3723_v9  ;;  %v3095_v26 = vld [vmem:[%s4572_s2 + $0x140] ss:$16 sps:$4 sm:$0xff]   ;;  %v3103_v28 = vld [vmem:[%s4572_s2 + $0x164] ss:$16 sps:$4 sm:$0xff]  }
  0x23   :  { %1899 = vmatpush1.bf16.msra.mxu0 %v3035_v36  ;;  %1940 = vmatpush1.bf16.msra.mxu1 %v3038_v37  ;;  %v3098_v27 = vld [vmem:[%s4572_s2 + $0x340] ss:$16 sps:$4 sm:$0xff]   ;;  %v3106_v29 = vld [vmem:[%s4572_s2 + $0x364] ss:$16 sps:$4 sm:$0xff]  }
  0x24   :  { %1900 = vmatprep.subr.bf16.mxu0 %v3043_v38  ;;  %1941 = vmatprep.subr.bf16.mxu1 %v3046_v39  ;;  %v3755_v23 = vrot.slane %v576_v17, %v3723_v9  ;;  %v3758_v24 = vrot.slane %v575_v20, %v3723_v9  ;;  %v3101_v30 = vld [vmem:[%s4572_s2 + $0x160] ss:$16 sps:$4 sm:$0xff]   ;;  %v3109_v32 = vld [vmem:[%s4572_s2 + $0x184] ss:$16 sps:$4 sm:$0xff]  }
  0x25   :  { %v3104_v31 = vld [vmem:[%s4572_s2 + $0x360] ss:$16 sps:$4 sm:$0xff]   ;;  %v3112_v33 = vld [vmem:[%s4572_s2 + $0x384] ss:$16 sps:$4 sm:$0xff]  }
  0x26   :  { %1930 = vmatprep.mubr.bf16.mxu0 %v3755_v23  ;;  %v3763_v25 = vcombine.high %v3755_v23, %v3755_v23  ;;  %v3107_v34 = vld [vmem:[%s4572_s2 + $0x180] ss:$16 sps:$4 sm:$0xff]   ;;  %v3115_v36 = vld [vmem:[%s4572_s2 + $0x1a4] ss:$16 sps:$4 sm:$0xff]  }
  0x27   :  { %1901 = vmatpush1.bf16.msra.mxu0 %v3041_v40  ;;  %1942 = vmatpush1.bf16.msra.mxu1 %v3044_v41  ;;  %v3110_v35 = vld [vmem:[%s4572_s2 + $0x380] ss:$16 sps:$4 sm:$0xff]   ;;  %v3118_v37 = vld [vmem:[%s4572_s2 + $0x3a4] ss:$16 sps:$4 sm:$0xff]  }
  0x28   :  { %1902 = vmatprep.subr.bf16.mxu0 %v3049_v42  ;;  %1943 = vmatprep.subr.bf16.mxu1 %v3052_v43  ;;  %v3113_v38 = vld [vmem:[%s4572_s2 + $0x1a0] ss:$16 sps:$4 sm:$0xff]   ;;  %v3121_v40 = vld [vmem:[%s4572_s2 + $0x1c4] ss:$16 sps:$4 sm:$0xff]  }
  0x29   :  { %1971 = vmatprep.mubr.bf16.mxu1 %v3763_v25  ;;  %v3116_v39 = vld [vmem:[%s4572_s2 + $0x3a0] ss:$16 sps:$4 sm:$0xff]   ;;  %v3124_v41 = vld [vmem:[%s4572_s2 + $0x3c4] ss:$16 sps:$4 sm:$0xff]  }
  0x2a   :  { %v3119_v42 = vld [vmem:[%s4572_s2 + $0x1c0] ss:$16 sps:$4 sm:$0xff]   ;;  %v3145_v61 = vld [vmem:[%s4572_s2 + $0x444] ss:$16 sps:$4 sm:$0xff]  }
  0x2b   :  { %1903 = vmatpush1.bf16.msra.mxu0 %v3047_v44  ;;  %1944 = vmatpush1.bf16.msra.mxu1 %v3050_v45  ;;  %v3122_v43 = vld [vmem:[%s4572_s2 + $0x3c0] ss:$16 sps:$4 sm:$0xff]   ;;  %v3127_v44 = vld [vmem:[%s4572_s2 + $0x1e4] ss:$16 sps:$4 sm:$0xff]  }
  0x2c   :  { %1904 = vmatprep.subr.bf16.mxu0 %v3055_v46  ;;  %1945 = vmatprep.subr.bf16.mxu1 %v3058_v47  ;;  %v3130_v45 = vld [vmem:[%s4572_s2 + $0x3e4] ss:$16 sps:$4 sm:$0xff]   ;;  %v577_v46 = vcombine.high %v575_v20, %v575_v20  ;;  %v3827_v47 = vrot.slane %v568_v15, %v3723_v9  ;;  %v3140_v60 = vld [vmem:[%s4572_s2 + $0x620] ss:$16 sps:$4 sm:$0xff]  }
  0x2d   :  { %v3148_v62 = vld [vmem:[%s4572_s2 + $0x644] ss:$16 sps:$4 sm:$0xff]   ;;  %v3149_v3 = vld [vmem:[%s4572_s2 + $0x460] ss:$16 sps:$4 sm:$0xff]  }
  0x2e   :  { %v3161_v12 = vld [vmem:[%s4572_s2 + $0x4a0] ss:$16 sps:$4 sm:$0xff]   ;;  %v3172_v15 = vld [vmem:[%s4572_s2 + $0x6c4] ss:$16 sps:$4 sm:$0xff]  }
  0x2f   :  { %1905 = vmatpush1.bf16.msra.mxu0 %v3053_v48  ;;  %1946 = vmatpush1.bf16.msra.mxu1 %v3056_v49  ;;  %v3125_v48 = vld [vmem:[%s4572_s2 + $0x1e0] ss:$16 sps:$4 sm:$0xff]  }
  0x30   :  { %1906 = vmatprep.subr.bf16.mxu0 %v3061_v50  ;;  %1947 = vmatprep.subr.bf16.mxu1 %v3064_v51  ;;  %v3128_v49 = vld [vmem:[%s4572_s2 + $0x3e0] ss:$16 sps:$4 sm:$0xff]   ;;  %v3133_v50 = vld [vmem:[%s4572_s2 + $0x404] ss:$16 sps:$4 sm:$0xff]  }
  0x31   :  { %v3136_v51 = vld [vmem:[%s4572_s2 + $0x604] ss:$16 sps:$4 sm:$0xff]   ;;  %v3167_v16 = vld [vmem:[%s4572_s2 + $0x4c0] ss:$16 sps:$4 sm:$0xff]  }
  0x32   :  { %v3170_v17 = vld [vmem:[%s4572_s2 + $0x6c0] ss:$16 sps:$4 sm:$0xff]  }
  0x33   :  { %1907 = vmatpush1.bf16.msra.mxu0 %v3059_v52  ;;  %1948 = vmatpush1.bf16.msra.mxu1 %v3062_v53  ;;  %v3842_v52 = vrot.slane %v577_v46, %v3723_v9  ;;  %v3846_v53 = vcombine.high %v3827_v47, %v3827_v47  ;;  %v3158_v9 = vld [vmem:[%s4572_s2 + $0x680] ss:$16 sps:$4 sm:$0xff]   ;;  %v3214_v46 = vld [vmem:[%s4572_s2 + $0x7a4] ss:$16 sps:$4 sm:$0xff]  }
  0x34   :  { %1908 = vmatprep.subr.bf16.mxu0 %v3067_v54  ;;  %1949 = vmatprep.subr.bf16.mxu1 %v3070_v55  ;;  %v3131_v54 = vld [vmem:[%s4572_s2 + $0x400] ss:$16 sps:$4 sm:$0xff]  }
  0x35   :  { %v3134_v55 = vld [vmem:[%s4572_s2 + $0x600] ss:$16 sps:$4 sm:$0xff]  }
  0x36   :  { %v3173_v20 = vld [vmem:[%s4572_s2 + $0x4e0] ss:$16 sps:$4 sm:$0xff]  }
  0x37   :  { %1909 = vmatpush1.bf16.msra.mxu0 %v3065_v56  ;;  %1950 = vmatpush1.bf16.msra.mxu1 %v3068_v57  ;;  %v3139_v56 = vld [vmem:[%s4572_s2 + $0x424] ss:$16 sps:$4 sm:$0xff]  }
  0x38   :  { %1910 = vmatprep.subr.bf16.mxu0 %v3073_v58  ;;  %1951 = vmatprep.subr.bf16.mxu1 %v3076_v59  ;;  %v3142_v57 = vld [vmem:[%s4572_s2 + $0x624] ss:$16 sps:$4 sm:$0xff]   ;;  %v3862_v58 = vcombine.high %v3842_v52, %v3842_v52  ;;  %v3137_v59 = vld [vmem:[%s4572_s2 + $0x420] ss:$16 sps:$4 sm:$0xff]  }
  0x3b   :  { %1911 = vmatpush1.bf16.msra.mxu0 %v3071_v63  ;;  %1952 = vmatpush1.bf16.msra.mxu1 %v3074_v0  ;;  %v3143_v63 = vld [vmem:[%s4572_s2 + $0x440] ss:$16 sps:$4 sm:$0xff]  }
  0x3c   :  { %1912 = vmatprep.subr.bf16.mxu0 %v3079_v1  ;;  %1953 = vmatprep.subr.bf16.mxu1 %v3082_v2  ;;  %v3146_v0 = vld [vmem:[%s4572_s2 + $0x640] ss:$16 sps:$4 sm:$0xff]   ;;  %v3151_v1 = vld [vmem:[%s4572_s2 + $0x464] ss:$16 sps:$4 sm:$0xff]  }
  0x3d   :  { %v3154_v2 = vld [vmem:[%s4572_s2 + $0x664] ss:$16 sps:$4 sm:$0xff]  }
  0x3f   :  { %1913 = vmatpush1.bf16.msra.mxu0 %v3077_v5  ;;  %1954 = vmatpush1.bf16.msra.mxu1 %v3080_v6  ;;  %v3152_v5 = vld [vmem:[%s4572_s2 + $0x660] ss:$16 sps:$4 sm:$0xff]   ;;  %v3157_v6 = vld [vmem:[%s4572_s2 + $0x484] ss:$16 sps:$4 sm:$0xff]  }
  0x40   :  { %1914 = vmatprep.subr.bf16.mxu0 %v3085_v7  ;;  %1955 = vmatprep.subr.bf16.mxu1 %v3088_v8  ;;  %v3160_v7 = vld [vmem:[%s4572_s2 + $0x684] ss:$16 sps:$4 sm:$0xff]   ;;  %v3155_v8 = vld [vmem:[%s4572_s2 + $0x480] ss:$16 sps:$4 sm:$0xff]  }
  0x43   :  { %1915 = vmatpush1.bf16.msra.mxu0 %v3083_v10  ;;  %1956 = vmatpush1.bf16.msra.mxu1 %v3086_v11  ;;  %v3163_v10 = vld [vmem:[%s4572_s2 + $0x4a4] ss:$16 sps:$4 sm:$0xff]  }
  0x44   :  { %1916 = vmatprep.subr.bf16.mxu0 %v3091_v13  ;;  %1957 = vmatprep.subr.bf16.mxu1 %v3094_v14  ;;  %v3166_v11 = vld [vmem:[%s4572_s2 + $0x6a4] ss:$16 sps:$4 sm:$0xff]   ;;  %v3164_v13 = vld [vmem:[%s4572_s2 + $0x6a0] ss:$16 sps:$4 sm:$0xff]  }
  0x45   :  { %v3169_v14 = vld [vmem:[%s4572_s2 + $0x4c4] ss:$16 sps:$4 sm:$0xff]  }
  0x47   :  { %1917 = vmatpush1.bf16.msra.mxu0 %v3089_v18  ;;  %1958 = vmatpush1.bf16.msra.mxu1 %v3092_v19  ;;  %v3175_v18 = vld [vmem:[%s4572_s2 + $0x4e4] ss:$16 sps:$4 sm:$0xff]  }
  0x48   :  { %1918 = vmatprep.subr.bf16.mxu0 %v3097_v21  ;;  %1959 = vmatprep.subr.bf16.mxu1 %v3100_v22  ;;  %v3178_v19 = vld [vmem:[%s4572_s2 + $0x6e4] ss:$16 sps:$4 sm:$0xff]   ;;  %v3176_v21 = vld [vmem:[%s4572_s2 + $0x6e0] ss:$16 sps:$4 sm:$0xff]  }
  0x49   :  { %v3181_v22 = vld [vmem:[%s4572_s2 + $0x504] ss:$16 sps:$4 sm:$0xff]  }
  0x4b   :  { %1919 = vmatpush1.bf16.msra.mxu0 %v3095_v26  ;;  %1960 = vmatpush1.bf16.msra.mxu1 %v3098_v27  ;;  %v3184_v26 = vld [vmem:[%s4572_s2 + $0x704] ss:$16 sps:$4 sm:$0xff]   ;;  %v3179_v27 = vld [vmem:[%s4572_s2 + $0x500] ss:$16 sps:$4 sm:$0xff]  }
  0x4c   :  { %1920 = vmatprep.subr.bf16.mxu0 %v3103_v28  ;;  %1961 = vmatprep.subr.bf16.mxu1 %v3106_v29  ;;  %v3182_v28 = vld [vmem:[%s4572_s2 + $0x700] ss:$16 sps:$4 sm:$0xff]   ;;  %v3187_v29 = vld [vmem:[%s4572_s2 + $0x524] ss:$16 sps:$4 sm:$0xff]  }
  0x4f   :  { %1921 = vmatpush1.bf16.msra.mxu0 %v3101_v30  ;;  %1962 = vmatpush1.bf16.msra.mxu1 %v3104_v31  ;;  %v3190_v30 = vld [vmem:[%s4572_s2 + $0x724] ss:$16 sps:$4 sm:$0xff]   ;;  %v3185_v31 = vld [vmem:[%s4572_s2 + $0x520] ss:$16 sps:$4 sm:$0xff]  }
  0x50   :  { %1922 = vmatprep.subr.bf16.mxu0 %v3109_v32  ;;  %1963 = vmatprep.subr.bf16.mxu1 %v3112_v33  ;;  %v3188_v32 = vld [vmem:[%s4572_s2 + $0x720] ss:$16 sps:$4 sm:$0xff]   ;;  %v3193_v33 = vld [vmem:[%s4572_s2 + $0x544] ss:$16 sps:$4 sm:$0xff]  }
  0x53   :  { %1923 = vmatpush1.bf16.msra.mxu0 %v3107_v34  ;;  %1964 = vmatpush1.bf16.msra.mxu1 %v3110_v35  ;;  %v3196_v34 = vld [vmem:[%s4572_s2 + $0x744] ss:$16 sps:$4 sm:$0xff]   ;;  %v3191_v35 = vld [vmem:[%s4572_s2 + $0x540] ss:$16 sps:$4 sm:$0xff]  }
  0x54   :  { %1924 = vmatprep.subr.bf16.mxu0 %v3115_v36  ;;  %1965 = vmatprep.subr.bf16.mxu1 %v3118_v37  ;;  %v3194_v36 = vld [vmem:[%s4572_s2 + $0x740] ss:$16 sps:$4 sm:$0xff]   ;;  %v3199_v37 = vld [vmem:[%s4572_s2 + $0x564] ss:$16 sps:$4 sm:$0xff]  }
  0x57   :  { %1925 = vmatpush1.bf16.msra.mxu0 %v3113_v38  ;;  %1966 = vmatpush1.bf16.msra.mxu1 %v3116_v39  ;;  %v3202_v38 = vld [vmem:[%s4572_s2 + $0x764] ss:$16 sps:$4 sm:$0xff]   ;;  %v3197_v39 = vld [vmem:[%s4572_s2 + $0x560] ss:$16 sps:$4 sm:$0xff]  }
  0x58   :  { %1926 = vmatprep.subr.bf16.mxu0 %v3121_v40  ;;  %1967 = vmatprep.subr.bf16.mxu1 %v3124_v41  ;;  %v3200_v40 = vld [vmem:[%s4572_s2 + $0x760] ss:$16 sps:$4 sm:$0xff]   ;;  %v3205_v41 = vld [vmem:[%s4572_s2 + $0x584] ss:$16 sps:$4 sm:$0xff]  }
  0x5b   :  { %1927 = vmatpush1.bf16.msra.mxu0 %v3119_v42  ;;  %1968 = vmatpush1.bf16.msra.mxu1 %v3122_v43  ;;  %v3208_v42 = vld [vmem:[%s4572_s2 + $0x784] ss:$16 sps:$4 sm:$0xff]   ;;  %v3203_v43 = vld [vmem:[%s4572_s2 + $0x580] ss:$16 sps:$4 sm:$0xff]  }
  0x5c   :  { %1928 = vmatprep.subr.bf16.mxu0 %v3127_v44  ;;  %1969 = vmatprep.subr.bf16.mxu1 %v3130_v45  ;;  %v3206_v44 = vld [vmem:[%s4572_s2 + $0x780] ss:$16 sps:$4 sm:$0xff]   ;;  %v3211_v45 = vld [vmem:[%s4572_s2 + $0x5a4] ss:$16 sps:$4 sm:$0xff]  }
  0x5f   :  { %1929 = vmatpush1.bf16.msra.mxu0 %v3125_v48  ;;  %1970 = vmatpush1.bf16.msra.mxu1 %v3128_v49  ;;  %v3209_v48 = vld [vmem:[%s4572_s2 + $0x5a0] ss:$16 sps:$4 sm:$0xff]  }
  0x60   :  { %1980 = vmatprep.subr.bf16.mxu0 %v3133_v50  ;;  %2021 = vmatprep.subr.bf16.mxu1 %v3136_v51  ;;  %v3212_v49 = vld [vmem:[%s4572_s2 + $0x7a0] ss:$16 sps:$4 sm:$0xff]   ;;  %v3217_v50 = vld [vmem:[%s4572_s2 + $0x5c4] ss:$16 sps:$4 sm:$0xff]  }
  0x61   :  { %v3220_v51 = vld [vmem:[%s4572_s2 + $0x7c4] ss:$16 sps:$4 sm:$0xff]  }
  0x62   :  { %1931 = vmatmul.mubr.bf16.vlgmr.msra.gmra.mrb[4].mxu0 %v3827_v47  ;;  %1972 = vmatmul.mubr.bf16.vlgmr.msra.gmra.mrb[4].mxu1 %v3846_v53 }
  0x63   :  { %1981 = vmatpush1.bf16.msra.mxu0 %v3131_v54  ;;  %2022 = vmatpush1.bf16.msra.mxu1 %v3134_v55  ;;  %v3215_v54 = vld [vmem:[%s4572_s2 + $0x5c0] ss:$16 sps:$4 sm:$0xff]  }
  0x64   :  { %1982 = vmatprep.subr.bf16.mxu0 %v3139_v56  ;;  %2023 = vmatprep.subr.bf16.mxu1 %v3142_v57  ;;  %v3218_v55 = vld [vmem:[%s4572_s2 + $0x7c0] ss:$16 sps:$4 sm:$0xff]   ;;  %v3223_v56 = vld [vmem:[%s4572_s2 + $0x5e4] ss:$16 sps:$4 sm:$0xff]  }
  0x65   :  { %2012 = vmatprep.mubr.bf16.mxu0 %v3842_v52  ;;  %2053 = vmatprep.mubr.bf16.mxu1 %v3862_v58  ;;  %v3226_v57 = vld [vmem:[%s4572_s2 + $0x7e4] ss:$16 sps:$4 sm:$0xff]  }
  0x67   :  { %1983 = vmatpush1.bf16.msra.mxu0 %v3137_v59  ;;  %2024 = vmatpush1.bf16.msra.mxu1 %v3140_v60  ;;  %v3221_v59 = vld [vmem:[%s4572_s2 + $0x5e0] ss:$16 sps:$4 sm:$0xff]  }
  0x68   :  { %1984 = vmatprep.subr.bf16.mxu0 %v3145_v61  ;;  %2025 = vmatprep.subr.bf16.mxu1 %v3148_v62  ;;  %v3224_v60 = vld [vmem:[%s4572_s2 + $0x7e0] ss:$16 sps:$4 sm:$0xff]   ;;  %v3230_v61 = vld [vmem:[%s4572_s2 + $0xc] ss:$16 sps:$4 sm:$0xff]  }
  0x69   :  { %v3233_v62 = vld [vmem:[%s4572_s2 + $0x20c] ss:$16 sps:$4 sm:$0xff]  }
  0x6b   :  { %1985 = vmatpush1.bf16.msra.mxu0 %v3143_v63  ;;  %2026 = vmatpush1.bf16.msra.mxu1 %v3146_v0  ;;  %v4050_v63 = vcombine.high %v3758_v24, %v3758_v24  ;;  %v3228_v0 = vld [vmem:[%s4572_s2 + $0x8] ss:$16 sps:$4 sm:$0xff]  }
  0x6c   :  { %1986 = vmatprep.subr.bf16.mxu0 %v3151_v1  ;;  %2027 = vmatprep.subr.bf16.mxu1 %v3154_v2  ;;  %v3231_v1 = vld [vmem:[%s4572_s2 + $0x208] ss:$16 sps:$4 sm:$0xff]   ;;  %v3236_v2 = vld [vmem:[%s4572_s2 + $0x2c] ss:$16 sps:$4 sm:$0xff]  }
  0x6f   :  { %1987 = vmatpush1.bf16.msra.mxu0 %v3149_v3  ;;  %2028 = vmatpush1.bf16.msra.mxu1 %v3152_v5  ;;  %v3239_v3 = vld [vmem:[%s4572_s2 + $0x22c] ss:$16 sps:$4 sm:$0xff]   ;;  %v3234_v5 = vld [vmem:[%s4572_s2 + $0x28] ss:$16 sps:$4 sm:$0xff]  }
  0x70   :  { %1988 = vmatprep.subr.bf16.mxu0 %v3157_v6  ;;  %2029 = vmatprep.subr.bf16.mxu1 %v3160_v7  ;;  %v3237_v6 = vld [vmem:[%s4572_s2 + $0x228] ss:$16 sps:$4 sm:$0xff]   ;;  %v3242_v7 = vld [vmem:[%s4572_s2 + $0x4c] ss:$16 sps:$4 sm:$0xff]  }
  0x73   :  { %1989 = vmatpush1.bf16.msra.mxu0 %v3155_v8  ;;  %2030 = vmatpush1.bf16.msra.mxu1 %v3158_v9  ;;  %v3245_v8 = vld [vmem:[%s4572_s2 + $0x24c] ss:$16 sps:$4 sm:$0xff]   ;;  %v3240_v9 = vld [vmem:[%s4572_s2 + $0x48] ss:$16 sps:$4 sm:$0xff]  }
  0x74   :  { %1990 = vmatprep.subr.bf16.mxu0 %v3163_v10  ;;  %2031 = vmatprep.subr.bf16.mxu1 %v3166_v11  ;;  %v3243_v10 = vld [vmem:[%s4572_s2 + $0x248] ss:$16 sps:$4 sm:$0xff]   ;;  %v3248_v11 = vld [vmem:[%s4572_s2 + $0x6c] ss:$16 sps:$4 sm:$0xff]  }
  0x77   :  { %1991 = vmatpush1.bf16.msra.mxu0 %v3161_v12  ;;  %2032 = vmatpush1.bf16.msra.mxu1 %v3164_v13  ;;  %v3249_v12 = vld [vmem:[%s4572_s2 + $0x268] ss:$16 sps:$4 sm:$0xff]   ;;  %v3254_v13 = vld [vmem:[%s4572_s2 + $0x8c] ss:$16 sps:$4 sm:$0xff]  }
  0x78   :  { %1992 = vmatprep.subr.bf16.mxu0 %v3169_v14  ;;  %2033 = vmatprep.subr.bf16.mxu1 %v3172_v15  ;;  %v3257_v14 = vld [vmem:[%s4572_s2 + $0x28c] ss:$16 sps:$4 sm:$0xff]   ;;  %v3252_v15 = vld [vmem:[%s4572_s2 + $0x88] ss:$16 sps:$4 sm:$0xff]  }
  0x7b   :  { %1993 = vmatpush1.bf16.msra.mxu0 %v3167_v16  ;;  %2034 = vmatpush1.bf16.msra.mxu1 %v3170_v17  ;;  %v3255_v16 = vld [vmem:[%s4572_s2 + $0x288] ss:$16 sps:$4 sm:$0xff]   ;;  %v3260_v17 = vld [vmem:[%s4572_s2 + $0xac] ss:$16 sps:$4 sm:$0xff]  }
  0x7c   :  { %1994 = vmatprep.subr.bf16.mxu0 %v3175_v18  ;;  %2035 = vmatprep.subr.bf16.mxu1 %v3178_v19  ;;  %v3263_v18 = vld [vmem:[%s4572_s2 + $0x2ac] ss:$16 sps:$4 sm:$0xff]   ;;  %v3258_v19 = vld [vmem:[%s4572_s2 + $0xa8] ss:$16 sps:$4 sm:$0xff]  }
  0x7f   :  { %1995 = vmatpush1.bf16.msra.mxu0 %v3173_v20  ;;  %2036 = vmatpush1.bf16.msra.mxu1 %v3176_v21  ;;  %v3261_v20 = vld [vmem:[%s4572_s2 + $0x2a8] ss:$16 sps:$4 sm:$0xff]   ;;  %v3266_v21 = vld [vmem:[%s4572_s2 + $0xcc] ss:$16 sps:$4 sm:$0xff]  }
  0x80   :  { %1996 = vmatprep.subr.bf16.mxu0 %v3181_v22  ;;  %2037 = vmatprep.subr.bf16.mxu1 %v3184_v26  ;;  %v3269_v22 = vld [vmem:[%s4572_s2 + $0x2cc] ss:$16 sps:$4 sm:$0xff]   ;;  %v3264_v26 = vld [vmem:[%s4572_s2 + $0xc8] ss:$16 sps:$4 sm:$0xff]  }
  0x83   :  { %1997 = vmatpush1.bf16.msra.mxu0 %v3179_v27  ;;  %2038 = vmatpush1.bf16.msra.mxu1 %v3182_v28  ;;  %v3267_v27 = vld [vmem:[%s4572_s2 + $0x2c8] ss:$16 sps:$4 sm:$0xff]   ;;  %v3272_v28 = vld [vmem:[%s4572_s2 + $0xec] ss:$16 sps:$4 sm:$0xff]  }
  0x84   :  { %1998 = vmatprep.subr.bf16.mxu0 %v3187_v29  ;;  %2039 = vmatprep.subr.bf16.mxu1 %v3190_v30  ;;  %v3275_v29 = vld [vmem:[%s4572_s2 + $0x2ec] ss:$16 sps:$4 sm:$0xff]   ;;  %v3270_v30 = vld [vmem:[%s4572_s2 + $0xe8] ss:$16 sps:$4 sm:$0xff]  }
  0x87   :  { %1999 = vmatpush1.bf16.msra.mxu0 %v3185_v31  ;;  %2040 = vmatpush1.bf16.msra.mxu1 %v3188_v32  ;;  %v3273_v31 = vld [vmem:[%s4572_s2 + $0x2e8] ss:$16 sps:$4 sm:$0xff]   ;;  %v3278_v32 = vld [vmem:[%s4572_s2 + $0x10c] ss:$16 sps:$4 sm:$0xff]  }
  0x88   :  { %2000 = vmatprep.subr.bf16.mxu0 %v3193_v33  ;;  %2041 = vmatprep.subr.bf16.mxu1 %v3196_v34  ;;  %v3281_v33 = vld [vmem:[%s4572_s2 + $0x30c] ss:$16 sps:$4 sm:$0xff]   ;;  %v3276_v34 = vld [vmem:[%s4572_s2 + $0x108] ss:$16 sps:$4 sm:$0xff]  }
  0x8b   :  { %2001 = vmatpush1.bf16.msra.mxu0 %v3191_v35  ;;  %2042 = vmatpush1.bf16.msra.mxu1 %v3194_v36  ;;  %v3279_v35 = vld [vmem:[%s4572_s2 + $0x308] ss:$16 sps:$4 sm:$0xff]   ;;  %v3284_v36 = vld [vmem:[%s4572_s2 + $0x12c] ss:$16 sps:$4 sm:$0xff]  }
  0x8c   :  { %2002 = vmatprep.subr.bf16.mxu0 %v3199_v37  ;;  %2043 = vmatprep.subr.bf16.mxu1 %v3202_v38  ;;  %v3287_v37 = vld [vmem:[%s4572_s2 + $0x32c] ss:$16 sps:$4 sm:$0xff]   ;;  %v3282_v38 = vld [vmem:[%s4572_s2 + $0x128] ss:$16 sps:$4 sm:$0xff]  }
  0x8f   :  { %2003 = vmatpush1.bf16.msra.mxu0 %v3197_v39  ;;  %2044 = vmatpush1.bf16.msra.mxu1 %v3200_v40  ;;  %v3285_v39 = vld [vmem:[%s4572_s2 + $0x328] ss:$16 sps:$4 sm:$0xff]   ;;  %v3290_v40 = vld [vmem:[%s4572_s2 + $0x14c] ss:$16 sps:$4 sm:$0xff]  }
  0x90   :  { %2004 = vmatprep.subr.bf16.mxu0 %v3205_v41  ;;  %2045 = vmatprep.subr.bf16.mxu1 %v3208_v42  ;;  %v3293_v41 = vld [vmem:[%s4572_s2 + $0x34c] ss:$16 sps:$4 sm:$0xff]   ;;  %v3288_v42 = vld [vmem:[%s4572_s2 + $0x148] ss:$16 sps:$4 sm:$0xff]  }
  0x93   :  { %2005 = vmatpush1.bf16.msra.mxu0 %v3203_v43  ;;  %2046 = vmatpush1.bf16.msra.mxu1 %v3206_v44  ;;  %v3291_v43 = vld [vmem:[%s4572_s2 + $0x348] ss:$16 sps:$4 sm:$0xff]   ;;  %v3296_v44 = vld [vmem:[%s4572_s2 + $0x16c] ss:$16 sps:$4 sm:$0xff]  }
  0x94   :  { %2006 = vmatprep.subr.bf16.mxu0 %v3211_v45  ;;  %2047 = vmatprep.subr.bf16.mxu1 %v3214_v46  ;;  %v3299_v45 = vld [vmem:[%s4572_s2 + $0x36c] ss:$16 sps:$4 sm:$0xff]   ;;  %v3294_v46 = vld [vmem:[%s4572_s2 + $0x168] ss:$16 sps:$4 sm:$0xff]  }
  0x97   :  { %2007 = vmatpush1.bf16.msra.mxu0 %v3209_v48  ;;  %2048 = vmatpush1.bf16.msra.mxu1 %v3212_v49  ;;  %v3297_v48 = vld [vmem:[%s4572_s2 + $0x368] ss:$16 sps:$4 sm:$0xff]   ;;  %v3302_v49 = vld [vmem:[%s4572_s2 + $0x18c] ss:$16 sps:$4 sm:$0xff]  }
  0x98   :  { %2008 = vmatprep.subr.bf16.mxu0 %v3217_v50  ;;  %2049 = vmatprep.subr.bf16.mxu1 %v3220_v51  ;;  %v3305_v50 = vld [vmem:[%s4572_s2 + $0x38c] ss:$16 sps:$4 sm:$0xff]   ;;  %v3300_v51 = vld [vmem:[%s4572_s2 + $0x188] ss:$16 sps:$4 sm:$0xff]  }
  0x9b   :  { %2009 = vmatpush1.bf16.msra.mxu0 %v3215_v54  ;;  %2050 = vmatpush1.bf16.msra.mxu1 %v3218_v55  ;;  %v3303_v54 = vld [vmem:[%s4572_s2 + $0x388] ss:$16 sps:$4 sm:$0xff]   ;;  %v3308_v55 = vld [vmem:[%s4572_s2 + $0x1ac] ss:$16 sps:$4 sm:$0xff]  }
  0x9c   :  { %2010 = vmatprep.subr.bf16.mxu0 %v3223_v56  ;;  %2051 = vmatprep.subr.bf16.mxu1 %v3226_v57  ;;  %v3311_v56 = vld [vmem:[%s4572_s2 + $0x3ac] ss:$16 sps:$4 sm:$0xff]   ;;  %v3306_v57 = vld [vmem:[%s4572_s2 + $0x1a8] ss:$16 sps:$4 sm:$0xff]  }
  0x9f   :  { %2011 = vmatpush1.bf16.msra.mxu0 %v3221_v59  ;;  %2052 = vmatpush1.bf16.msra.mxu1 %v3224_v60  ;;  %v3309_v59 = vld [vmem:[%s4572_s2 + $0x3a8] ss:$16 sps:$4 sm:$0xff]   ;;  %v3314_v60 = vld [vmem:[%s4572_s2 + $0x1cc] ss:$16 sps:$4 sm:$0xff]  }
  0xa0   :  { %2062 = vmatprep.subr.bf16.mxu0 %v3230_v61  ;;  %2103 = vmatprep.subr.bf16.mxu1 %v3233_v62  ;;  %v3317_v61 = vld [vmem:[%s4572_s2 + $0x3cc] ss:$16 sps:$4 sm:$0xff]   ;;  %v3312_v62 = vld [vmem:[%s4572_s2 + $0x1c8] ss:$16 sps:$4 sm:$0xff]  }
  0xa2   :  { %2013 = vmatmul.mubr.bf16.vlgmr.msra.gmra.mrb[8].mxu0 %v3758_v24  ;;  %2054 = vmatmul.mubr.bf16.vlgmr.msra.gmra.mrb[8].mxu1 %v4050_v63 }
  0xa3   :  { %2063 = vmatpush1.bf16.msra.mxu0 %v3228_v0  ;;  %2104 = vmatpush1.bf16.msra.mxu1 %v3231_v1  ;;  %v3315_v0 = vld [vmem:[%s4572_s2 + $0x3c8] ss:$16 sps:$4 sm:$0xff]   ;;  %v3320_v1 = vld [vmem:[%s4572_s2 + $0x1ec] ss:$16 sps:$4 sm:$0xff]  }
  0xa4   :  { %2064 = vmatprep.subr.bf16.mxu0 %v3236_v2  ;;  %2105 = vmatprep.subr.bf16.mxu1 %v3239_v3  ;;  %v3323_v2 = vld [vmem:[%s4572_s2 + $0x3ec] ss:$16 sps:$4 sm:$0xff]  }
  0xa5   :  { %2094 = vmatprep.mubr.bf16.mxu0 %v3755_v23  ;;  %2135 = vmatprep.mubr.bf16.mxu1 %v3763_v25  ;;  %v3251_v23 = vld [vmem:[%s4572_s2 + $0x26c] ss:$16 sps:$4 sm:$0xff]   ;;  %v3246_v25 = vld [vmem:[%s4572_s2 + $0x68] ss:$16 sps:$4 sm:$0xff]  }
  0xa7   :  { %2065 = vmatpush1.bf16.msra.mxu0 %v3234_v5  ;;  %2106 = vmatpush1.bf16.msra.mxu1 %v3237_v6 }
  0xa8   :  { %2066 = vmatprep.subr.bf16.mxu0 %v3242_v7  ;;  %2107 = vmatprep.subr.bf16.mxu1 %v3245_v8 }
  0xab   :  { %2067 = vmatpush1.bf16.msra.mxu0 %v3240_v9  ;;  %2108 = vmatpush1.bf16.msra.mxu1 %v3243_v10 }
  0xac   :  { %2068 = vmatprep.subr.bf16.mxu0 %v3248_v11  ;;  %2109 = vmatprep.subr.bf16.mxu1 %v3251_v23 }
  0xaf   :  { %2069 = vmatpush1.bf16.msra.mxu0 %v3246_v25  ;;  %2110 = vmatpush1.bf16.msra.mxu1 %v3249_v12 }
  0xb0   :  { %2070 = vmatprep.subr.bf16.mxu0 %v3254_v13  ;;  %2111 = vmatprep.subr.bf16.mxu1 %v3257_v14 }
  0xb3   :  { %2071 = vmatpush1.bf16.msra.mxu0 %v3252_v15  ;;  %2112 = vmatpush1.bf16.msra.mxu1 %v3255_v16 }
  0xb4   :  { %2072 = vmatprep.subr.bf16.mxu0 %v3260_v17  ;;  %2113 = vmatprep.subr.bf16.mxu1 %v3263_v18 }
  0xb7   :  { %2073 = vmatpush1.bf16.msra.mxu0 %v3258_v19  ;;  %2114 = vmatpush1.bf16.msra.mxu1 %v3261_v20 }
  0xb8   :  { %2074 = vmatprep.subr.bf16.mxu0 %v3266_v21  ;;  %2115 = vmatprep.subr.bf16.mxu1 %v3269_v22 }
  0xbb   :  { %2075 = vmatpush1.bf16.msra.mxu0 %v3264_v26  ;;  %2116 = vmatpush1.bf16.msra.mxu1 %v3267_v27 }
  0xbc   :  { %2076 = vmatprep.subr.bf16.mxu0 %v3272_v28  ;;  %2117 = vmatprep.subr.bf16.mxu1 %v3275_v29 }
  0xbf   :  { %2077 = vmatpush1.bf16.msra.mxu0 %v3270_v30  ;;  %2118 = vmatpush1.bf16.msra.mxu1 %v3273_v31 }
  0xc0   :  { %2078 = vmatprep.subr.bf16.mxu0 %v3278_v32  ;;  %2119 = vmatprep.subr.bf16.mxu1 %v3281_v33 }
  0xc3   :  { %2079 = vmatpush1.bf16.msra.mxu0 %v3276_v34  ;;  %2120 = vmatpush1.bf16.msra.mxu1 %v3279_v35 }
  0xc4   :  { %2080 = vmatprep.subr.bf16.mxu0 %v3284_v36  ;;  %2121 = vmatprep.subr.bf16.mxu1 %v3287_v37 }
  0xc7   :  { %2081 = vmatpush1.bf16.msra.mxu0 %v3282_v38  ;;  %2122 = vmatpush1.bf16.msra.mxu1 %v3285_v39 }
  0xc8   :  { %2082 = vmatprep.subr.bf16.mxu0 %v3290_v40  ;;  %2123 = vmatprep.subr.bf16.mxu1 %v3293_v41 }
  0xcb   :  { %2083 = vmatpush1.bf16.msra.mxu0 %v3288_v42  ;;  %2124 = vmatpush1.bf16.msra.mxu1 %v3291_v43 }
  0xcc   :  { %2084 = vmatprep.subr.bf16.mxu0 %v3296_v44  ;;  %2125 = vmatprep.subr.bf16.mxu1 %v3299_v45 }
  0xcf   :  { %2085 = vmatpush1.bf16.msra.mxu0 %v3294_v46  ;;  %2126 = vmatpush1.bf16.msra.mxu1 %v3297_v48 }
  0xd0   :  { %2086 = vmatprep.subr.bf16.mxu0 %v3302_v49  ;;  %2127 = vmatprep.subr.bf16.mxu1 %v3305_v50 }
  0xd3   :  { %2087 = vmatpush1.bf16.msra.mxu0 %v3300_v51  ;;  %2128 = vmatpush1.bf16.msra.mxu1 %v3303_v54 }
  0xd4   :  { %2088 = vmatprep.subr.bf16.mxu0 %v3308_v55  ;;  %2129 = vmatprep.subr.bf16.mxu1 %v3311_v56 }
  0xd7   :  { %2089 = vmatpush1.bf16.msra.mxu0 %v3306_v57  ;;  %2130 = vmatpush1.bf16.msra.mxu1 %v3309_v59 }
  0xd8   :  { %2090 = vmatprep.subr.bf16.mxu0 %v3314_v60  ;;  %2131 = vmatprep.subr.bf16.mxu1 %v3317_v61 }
  0xd9   :  { %12 = vsyncpa [#allocation3], 0  ;;  %v3318_v3 = vld [vmem:[%s4572_s2 + $0x1e8] ss:$16 sps:$4 sm:$0xff]   ;;  %v3326_v6 = vld [vmem:[%s4572_s2 + $0x40c] ss:$16 sps:$4 sm:$0xff]  }
  0xda   :  { %v3321_v5 = vld [vmem:[%s4572_s2 + $0x3e8] ss:$16 sps:$4 sm:$0xff]   ;;  %v3329_v7 = vld [vmem:[%s4572_s2 + $0x60c] ss:$16 sps:$4 sm:$0xff]   ;;  %s3478_s27 = smov [#allocation2]   ;;  %vm2603_vm0 = vcmask 41984  }
  0xdb   :  { %2091 = vmatpush1.bf16.msra.mxu0 %v3312_v62  ;;  %2132 = vmatpush1.bf16.msra.mxu1 %v3315_v0  ;;  %v3324_v8 = vld [vmem:[%s4572_s2 + $0x408] ss:$16 sps:$4 sm:$0xff]   ;;  %v3332_v10 = vld [vmem:[%s4572_s2 + $0x42c] ss:$16 sps:$4 sm:$0xff]   ;;  %s2611_s28 = sshll.u32 %s3478_s27, 4  ;;  %s2612_s28 = int_to_ptr.vmem [resolvable:$true] %s2611_s28 }
  0xdc   :  { %2092 = vmatprep.subr.bf16.mxu0 %v3320_v1  ;;  %2133 = vmatprep.subr.bf16.mxu1 %v3323_v2  ;;  %v3327_v9 = vld [vmem:[%s4572_s2 + $0x608] ss:$16 sps:$4 sm:$0xff]   ;;  %v3335_v11 = vld [vmem:[%s4572_s2 + $0x62c] ss:$16 sps:$4 sm:$0xff]   ;;  %s3452_s29 = scalar_lea.vmem %s2612_s28, 32  ;;  %p3457_p1 = scmp.lt.s32.totalorder %s2612_s28, %s2612_s28 }
  0xdd   :  { %v3330_v23 = vld [vmem:[%s4572_s2 + $0x428] ss:$16 sps:$4 sm:$0xff]   ;;  %v3338_v12 = vld [vmem:[%s4572_s2 + $0x44c] ss:$16 sps:$4 sm:$0xff]   ;;  %p3453_p0 = scmp.ne.s32.totalorder %s2612_s28, %s3452_s29  ;;  %p3458_p2 = scmp.lt.s32.totalorder %s3452_s29, %s3452_s29 }
  0xde   :  { %v3333_v25 = vld [vmem:[%s4572_s2 + $0x628] ss:$16 sps:$4 sm:$0xff]   ;;  %v3344_v14 = vld [vmem:[%s4572_s2 + $0x46c] ss:$16 sps:$4 sm:$0xff]  }
  0xdf   :  { %2093 = vmatpush1.bf16.msra.mxu0 %v3318_v3  ;;  %2134 = vmatpush1.bf16.msra.mxu1 %v3321_v5  ;;  %v3339_v13 = vld [vmem:[%s4572_s2 + $0x648] ss:$16 sps:$4 sm:$0xff]   ;;  %v3350_v16 = vld [vmem:[%s4572_s2 + $0x48c] ss:$16 sps:$4 sm:$0xff]   ;;  %p3459_p3 = por %p3458_p2, %p3457_p1 }
  0xe0   :  { %2144 = vmatprep.subr.bf16.mxu0 %v3326_v6  ;;  %2185 = vmatprep.subr.bf16.mxu1 %v3329_v7  ;;  %v3345_v15 = vld [vmem:[%s4572_s2 + $0x668] ss:$16 sps:$4 sm:$0xff]   ;;  %v3353_v17 = vld [vmem:[%s4572_s2 + $0x68c] ss:$16 sps:$4 sm:$0xff]  }
  0xe1   :  { %v3348_v18 = vld [vmem:[%s4572_s2 + $0x488] ss:$16 sps:$4 sm:$0xff]   ;;  %v3356_v20 = vld [vmem:[%s4572_s2 + $0x4ac] ss:$16 sps:$4 sm:$0xff]   ;;  %p3460_p4 = pnand %p3459_p3, %p3453_p0 }
  0xe2   :  { %2095 = vmatmul.mubr.bf16.vlgmr.msra.gmra.mrb[12].mxu0 %v3827_v47  ;;  %2136 = vmatmul.mubr.bf16.vlgmr.msra.gmra.mrb[12].mxu1 %v3846_v53  ;;  %v3341_v47 = vld [vmem:[%s4572_s2 + $0x64c] ss:$16 sps:$4 sm:$0xff]   ;;  %v3336_v53 = vld [vmem:[%s4572_s2 + $0x448] ss:$16 sps:$4 sm:$0xff]  }
  0xe3   :  { %2145 = vmatpush1.bf16.msra.mxu0 %v3324_v8  ;;  %2186 = vmatpush1.bf16.msra.mxu1 %v3327_v9  ;;  %v3351_v19 = vld [vmem:[%s4572_s2 + $0x688] ss:$16 sps:$4 sm:$0xff]   ;;  %v3359_v21 = vld [vmem:[%s4572_s2 + $0x6ac] ss:$16 sps:$4 sm:$0xff]  }
  0xe4   :  { %2146 = vmatprep.subr.bf16.mxu0 %v3332_v10  ;;  %2187 = vmatprep.subr.bf16.mxu1 %v3335_v11  ;;  %v3354_v22 = vld [vmem:[%s4572_s2 + $0x4a8] ss:$16 sps:$4 sm:$0xff]   ;;  %v3362_v27 = vld [vmem:[%s4572_s2 + $0x4cc] ss:$16 sps:$4 sm:$0xff]  }
  0xe5   :  { %2176 = vmatprep.mubr.bf16.mxu0 %v3842_v52  ;;  %2217 = vmatprep.mubr.bf16.mxu1 %v3862_v58  ;;  %v3347_v52 = vld [vmem:[%s4572_s2 + $0x66c] ss:$16 sps:$4 sm:$0xff]   ;;  %v3342_v58 = vld [vmem:[%s4572_s2 + $0x468] ss:$16 sps:$4 sm:$0xff]  }
  0xe6   :  { %v3357_v26 = vld [vmem:[%s4572_s2 + $0x6a8] ss:$16 sps:$4 sm:$0xff]   ;;  %v3365_v28 = vld [vmem:[%s4572_s2 + $0x6cc] ss:$16 sps:$4 sm:$0xff]  }
  0xe7   :  { %2147 = vmatpush1.bf16.msra.mxu0 %v3330_v23  ;;  %2188 = vmatpush1.bf16.msra.mxu1 %v3333_v25  ;;  %v3360_v35 = vld [vmem:[%s4572_s2 + $0x4c8] ss:$16 sps:$4 sm:$0xff]   ;;  %v3368_v39 = vld [vmem:[%s4572_s2 + $0x4ec] ss:$16 sps:$4 sm:$0xff]  }
  0xe8   :  { %2148 = vmatprep.subr.bf16.mxu0 %v3338_v12  ;;  %2189 = vmatprep.subr.bf16.mxu1 %v3341_v47  ;;  %v3363_v36 = vld [vmem:[%s4572_s2 + $0x6c8] ss:$16 sps:$4 sm:$0xff]   ;;  %v3371_v40 = vld [vmem:[%s4572_s2 + $0x6ec] ss:$16 sps:$4 sm:$0xff]  }
  0xe9   :  { %v3366_v41 = vld [vmem:[%s4572_s2 + $0x4e8] ss:$16 sps:$4 sm:$0xff]   ;;  %v3374_v43 = vld [vmem:[%s4572_s2 + $0x50c] ss:$16 sps:$4 sm:$0xff]  }
  0xea   :  { %v3369_v42 = vld [vmem:[%s4572_s2 + $0x6e8] ss:$16 sps:$4 sm:$0xff]   ;;  %v3377_v44 = vld [vmem:[%s4572_s2 + $0x70c] ss:$16 sps:$4 sm:$0xff]  }
  0xeb   :  { %2149 = vmatpush1.bf16.msra.mxu0 %v3336_v53  ;;  %2190 = vmatpush1.bf16.msra.mxu1 %v3339_v13  ;;  %v3372_v45 = vld [vmem:[%s4572_s2 + $0x508] ss:$16 sps:$4 sm:$0xff]   ;;  %v3380_v48 = vld [vmem:[%s4572_s2 + $0x52c] ss:$16 sps:$4 sm:$0xff]   ;;  %v3420_v13 = vld [vmem:[%s4575_s5 + $0x40] sm:$0xff]  }
  0xec   :  { %2150 = vmatprep.subr.bf16.mxu0 %v3344_v14  ;;  %2191 = vmatprep.subr.bf16.mxu1 %v3347_v52  ;;  %v3375_v46 = vld [vmem:[%s4572_s2 + $0x708] ss:$16 sps:$4 sm:$0xff]   ;;  %v3383_v49 = vld [vmem:[%s4572_s2 + $0x72c] ss:$16 sps:$4 sm:$0xff]   ;;  %v3421_v14 = vld [vmem:[%s4575_s5] sm:$0xff]  }
  0xed   :  { %v3378_v50 = vld [vmem:[%s4572_s2 + $0x528] ss:$16 sps:$4 sm:$0xff]   ;;  %v3386_v54 = vld [vmem:[%s4572_s2 + $0x54c] ss:$16 sps:$4 sm:$0xff]  }
  0xee   :  { %v3381_v51 = vld [vmem:[%s4572_s2 + $0x728] ss:$16 sps:$4 sm:$0xff]   ;;  %v3389_v55 = vld [vmem:[%s4572_s2 + $0x74c] ss:$16 sps:$4 sm:$0xff]  }
  0xef   :  { %2151 = vmatpush1.bf16.msra.mxu0 %v3342_v58  ;;  %2192 = vmatpush1.bf16.msra.mxu1 %v3345_v15  ;;  %v3384_v56 = vld [vmem:[%s4572_s2 + $0x548] ss:$16 sps:$4 sm:$0xff]   ;;  %v3392_v59 = vld [vmem:[%s4572_s2 + $0x56c] ss:$16 sps:$4 sm:$0xff]   ;;  %v3424_v15 = vld [vmem:[%s4575_s5 + $0x50] sm:$0xff]  }
  0xf0   :  { %2152 = vmatprep.subr.bf16.mxu0 %v3350_v16  ;;  %2193 = vmatprep.subr.bf16.mxu1 %v3353_v17  ;;  %v3387_v57 = vld [vmem:[%s4572_s2 + $0x748] ss:$16 sps:$4 sm:$0xff]   ;;  %v3395_v60 = vld [vmem:[%s4572_s2 + $0x76c] ss:$16 sps:$4 sm:$0xff]   ;;  %v3425_v16 = vld [vmem:[%s4575_s5 + $0x10] sm:$0xff]  }
  0xf1   :  { %v3390_v61 = vld [vmem:[%s4572_s2 + $0x568] ss:$16 sps:$4 sm:$0xff]   ;;  %v3398_v0 = vld [vmem:[%s4572_s2 + $0x58c] ss:$16 sps:$4 sm:$0xff]   ;;  %v3428_v17 = vld [vmem:[%s4575_s5 + $0x60] sm:$0xff]  }
  0xf2   :  { %v3393_v62 = vld [vmem:[%s4572_s2 + $0x768] ss:$16 sps:$4 sm:$0xff]   ;;  %v3401_v1 = vld [vmem:[%s4572_s2 + $0x78c] ss:$16 sps:$4 sm:$0xff]  }
  0xf3   :  { %2153 = vmatpush1.bf16.msra.mxu0 %v3348_v18  ;;  %2194 = vmatpush1.bf16.msra.mxu1 %v3351_v19  ;;  %v3396_v2 = vld [vmem:[%s4572_s2 + $0x588] ss:$16 sps:$4 sm:$0xff]   ;;  %v3404_v5 = vld [vmem:[%s4572_s2 + $0x5ac] ss:$16 sps:$4 sm:$0xff]   ;;  %v3429_v18 = vld [vmem:[%s4575_s5 + $0x20] sm:$0xff]  }
  0xf4   :  { %2154 = vmatprep.subr.bf16.mxu0 %v3356_v20  ;;  %2195 = vmatprep.subr.bf16.mxu1 %v3359_v21  ;;  %v3399_v3 = vld [vmem:[%s4572_s2 + $0x788] ss:$16 sps:$4 sm:$0xff]   ;;  %v3407_v6 = vld [vmem:[%s4572_s2 + $0x7ac] ss:$16 sps:$4 sm:$0xff]   ;;  %v3432_v21 = vld [vmem:[%s4575_s5 + $0x70] sm:$0xff]  }
  0xf5   :  { %v4324_v29 = vpop.f32.mrb[0].mxu0  ;;  %v4326_v30 = vpop.f32.mrb[0].mxu1  ;;  %v3402_v7 = vld [vmem:[%s4572_s2 + $0x5a8] ss:$16 sps:$4 sm:$0xff]   ;;  %v3410_v9 = vld [vmem:[%s4572_s2 + $0x5cc] ss:$16 sps:$4 sm:$0xff]  }
  0xf6   :  { %v4328_v31 = vpop.f32.mrb[1].mxu0  ;;  %v4330_v32 = vpop.f32.mrb[1].mxu1  ;;  %v3405_v8 = vld [vmem:[%s4572_s2 + $0x7a8] ss:$16 sps:$4 sm:$0xff]   ;;  %v3413_v10 = vld [vmem:[%s4572_s2 + $0x7cc] ss:$16 sps:$4 sm:$0xff]  }
  0xf7   :  { %v516_v33 = vpop.f32.mrb[2].mxu0  ;;  %v557_v34 = vpop.f32.mrb[2].mxu1  ;;  %2155 = vmatpush1.bf16.msra.mxu0 %v3354_v22  ;;  %2196 = vmatpush1.bf16.msra.mxu1 %v3357_v26  ;;  %v3408_v11 = vld [vmem:[%s4572_s2 + $0x5c8] ss:$16 sps:$4 sm:$0xff]   ;;  %v3416_v25 = vld [vmem:[%s4572_s2 + $0x5ec] ss:$16 sps:$4 sm:$0xff]  }
  0xf8   :  { %v517_v37 = vpop.f32.mrb[3].mxu0  ;;  %v558_v38 = vpop.f32.mrb[3].mxu1  ;;  %2156 = vmatprep.subr.bf16.mxu0 %v3362_v27  ;;  %2197 = vmatprep.subr.bf16.mxu1 %v3365_v28  ;;  %v3411_v23 = vld [vmem:[%s4572_s2 + $0x7c8] ss:$16 sps:$4 sm:$0xff]   ;;  %v3419_v12 = vld [vmem:[%s4572_s2 + $0x7ec] ss:$16 sps:$4 sm:$0xff]  }
  0xf9   :  { %v3414_v47 = vld [vmem:[%s4572_s2 + $0x5e8] ss:$16 sps:$4 sm:$0xff]   ;;  %v3433_v37 = vld [vmem:[%s4575_s5 + $0x30] sm:$0xff]  }
  0xfa   :  { %v3417_v53 = vld [vmem:[%s4572_s2 + $0x7e8] ss:$16 sps:$4 sm:$0xff]  }
  0xfb   :  { %2157 = vmatpush1.bf16.msra.mxu0 %v3360_v35  ;;  %2198 = vmatpush1.bf16.msra.mxu1 %v3363_v36  ;;  %v3422_v52 = vld [vmem:[%s4575_s5 + $0x48] sm:$0xff]  }
  0xfc   :  { %2158 = vmatprep.subr.bf16.mxu0 %v3368_v39  ;;  %2199 = vmatprep.subr.bf16.mxu1 %v3371_v40  ;;  %v3423_v58 = vld [vmem:[%s4575_s5 + $0x8] sm:$0xff]  }
  0xfd   :  { %v3430_v19 = vld [vmem:[%s4575_s5 + $0x68] sm:$0xff]  }
  0xfe   :  { %v3431_v20 = vld [vmem:[%s4575_s5 + $0x28] sm:$0xff]  }
  0xff   :  { %2159 = vmatpush1.bf16.msra.mxu0 %v3366_v41  ;;  %2200 = vmatpush1.bf16.msra.mxu1 %v3369_v42  ;;  %v3434_v41 = vld [vmem:[%s4575_s5 + $0x78] sm:$0xff]   ;;  %v3437_v42 = vld [vmem:[%s4575_s5 + $0x80] sm:$0xff]  }
 0x100   :  { %2160 = vmatprep.subr.bf16.mxu0 %v3374_v43  ;;  %2201 = vmatprep.subr.bf16.mxu1 %v3377_v44  ;;  %v3438_v43 = vld [vmem:[%s4575_s5 + $0xc8] sm:$0xff]   ;;  %v3435_v44 = vld [vmem:[%s4575_s5 + $0x38] sm:$0xff]  }
 0x103   :  { %2161 = vmatpush1.bf16.msra.mxu0 %v3372_v45  ;;  %2202 = vmatpush1.bf16.msra.mxu1 %v3375_v46  ;;  %v3439_v45 = vld [vmem:[%s4575_s5 + $0x88] sm:$0xff]   ;;  %v3440_v46 = vld [vmem:[%s4575_s5 + $0xd0] sm:$0xff]  }
 0x104   :  { %2162 = vmatprep.subr.bf16.mxu0 %v3380_v48  ;;  %2203 = vmatprep.subr.bf16.mxu1 %v3383_v49  ;;  %v3441_v48 = vld [vmem:[%s4575_s5 + $0x90] sm:$0xff]   ;;  %v3442_v49 = vld [vmem:[%s4575_s5 + $0xd8] sm:$0xff]  }
 0x107   :  { %2163 = vmatpush1.bf16.msra.mxu0 %v3378_v50  ;;  %2204 = vmatpush1.bf16.msra.mxu1 %v3381_v51  ;;  %v3443_v50 = vld [vmem:[%s4575_s5 + $0x98] sm:$0xff]   ;;  %v3444_v51 = vld [vmem:[%s4575_s5 + $0xe0] sm:$0xff]  }
 0x108   :  { %2164 = vmatprep.subr.bf16.mxu0 %v3386_v54  ;;  %2205 = vmatprep.subr.bf16.mxu1 %v3389_v55  ;;  %v3445_v54 = vld [vmem:[%s4575_s5 + $0xa0] sm:$0xff]   ;;  %v2230_v55 = vsub.s32 0, %v3708_v4 }
 0x10b   :  { %2165 = vmatpush1.bf16.msra.mxu0 %v3384_v56  ;;  %2206 = vmatpush1.bf16.msra.mxu1 %v3387_v57  ;;  %v2226_v56 = vld [vmem:[%s4574_s4] sm:$0xf]  ;;  %v2234_v57 = vsub.s32 1, %v3708_v4 }
 0x10c   :  { %2166 = vmatprep.subr.bf16.mxu0 %v3392_v59  ;;  %2207 = vmatprep.subr.bf16.mxu1 %v3395_v60  ;;  %v3446_v59 = vld [vmem:[%s4575_s5 + $0xe8] sm:$0xff]  }
 0x10f   :  { %2167 = vmatpush1.bf16.msra.mxu0 %v3390_v61  ;;  %2208 = vmatpush1.bf16.msra.mxu1 %v3393_v62  ;;  %v3447_v62 = vld [vmem:[%s4575_s5 + $0xa8] sm:$0xff]  }
 0x110   :  { %2168 = vmatprep.subr.bf16.mxu0 %v3398_v0  ;;  %2209 = vmatprep.subr.bf16.mxu1 %v3401_v1  ;;  %v2231_v1 = vrot.slane %v2226_v56, %v2230_v55 }
 0x113   :  { %2169 = vmatpush1.bf16.msra.mxu0 %v3396_v2  ;;  %2210 = vmatpush1.bf16.msra.mxu1 %v3399_v3 }
 0x114   :  { %2170 = vmatprep.subr.bf16.mxu0 %v3404_v5  ;;  %2211 = vmatprep.subr.bf16.mxu1 %v3407_v6  ;;  %v2235_v6 = vrot.slane %v2226_v56, %v2234_v57 }
 0x117   :  { %2171 = vmatpush1.bf16.msra.mxu0 %v3402_v7  ;;  %2212 = vmatpush1.bf16.msra.mxu1 %v3405_v8 }
 0x118   :  { %2172 = vmatprep.subr.bf16.mxu0 %v3410_v9  ;;  %2213 = vmatprep.subr.bf16.mxu1 %v3413_v10 }
 0x11b   :  { %2173 = vmatpush1.bf16.msra.mxu0 %v3408_v11  ;;  %2214 = vmatpush1.bf16.msra.mxu1 %v3411_v23  ;;  %v3448_v23 = vld [vmem:[%s4575_s5 + $0xf0] sm:$0xff]  }
 0x11c   :  { %2174 = vmatprep.subr.bf16.mxu0 %v3416_v25  ;;  %2215 = vmatprep.subr.bf16.mxu1 %v3419_v12  ;;  %v3449_v12 = vld [vmem:[%s4575_s5 + $0xb0] sm:$0xff]  }
 0x11f   :  { %2175 = vmatpush1.bf16.msra.mxu0 %v3414_v47  ;;  %2216 = vmatpush1.bf16.msra.mxu1 %v3417_v53 }
 0x120   :  { %2940 = vmatprep.subr.bf16.mxu0 %v3420_v13 }
 0x122   :  { %2177 = vmatmul.mubr.bf16.vlgmr.msra.gmra.mrb[16].mxu0 %v3758_v24  ;;  %2218 = vmatmul.mubr.bf16.vlgmr.msra.gmra.mrb[16].mxu1 %v4050_v63  ;;  %v3426_v24 = vld [vmem:[%s4575_s5 + $0x58] sm:$0xff]  }
 0x123   :  { %2941 = vmatpush3.bf16.msra.mxu0 %v3421_v14  ;;  %v3427_v63 = vld [vmem:[%s4575_s5 + $0x18] sm:$0xff]  }
 0x124   :  { %2942 = vmatprep.subr.bf16.mxu0 %v3422_v52  ;;  %v3450_v14 = vld [vmem:[%s4575_s5 + $0xf8] sm:$0xff]  }
 0x127   :  { %2943 = vmatpush3.bf16.msra.mxu0 %v3423_v58  ;;  %v3451_v58 = vld [vmem:[%s4575_s5 + $0xb8] sm:$0xff]  }
 0x128   :  { %2944 = vmatprep.subr.bf16.mxu0 %v3424_v15 }
 0x12b   :  { %2945 = vmatpush3.bf16.msra.mxu0 %v3425_v16 }
 0x12c   :  { %2946 = vmatprep.subr.bf16.mxu0 %v3426_v24 }
 0x12f   :  { %2947 = vmatpush3.bf16.msra.mxu0 %v3427_v63 }
 0x130   :  { %2948 = vmatprep.subr.bf16.mxu0 %v3428_v17 }
 0x133   :  { %2949 = vmatpush3.bf16.msra.mxu0 %v3429_v18 }
 0x134   :  { %2950 = vmatprep.subr.bf16.mxu0 %v3430_v19 }
 0x135   :  { %v1932_v22 = vpop.f32.mrb[4].mxu0  ;;  %v1973_v26 = vpop.f32.mrb[4].mxu1 }
 0x136   :  { %v1933_v27 = vadd.f32 %v1932_v22, %v4324_v29  ;;  %v1934_v28 = vpop.f32.mrb[5].mxu0  ;;  %v1975_v33 = vpop.f32.mrb[5].mxu1 }
 0x137   :  { %v1935_v34 = vadd.f32 %v1934_v28, %v4328_v31  ;;  %v1936_v35 = vpop.f32.mrb[6].mxu0  ;;  %v1977_v36 = vpop.f32.mrb[6].mxu1  ;;  %2951 = vmatpush3.bf16.msra.mxu0 %v3431_v20  ;;  %v3436_v31 = vld [vmem:[%s4575_s5 + $0xc0] sm:$0xff]  }
 0x138   :  { %v1974_v38 = vadd.f32 %v1973_v26, %v1933_v27  ;;  %v1937_v39 = vpop.f32.mrb[7].mxu0  ;;  %v1978_v40 = vpop.f32.mrb[7].mxu1  ;;  %2952 = vmatprep.subr.bf16.mxu0 %v3432_v21  ;;  %2962 = vmatprep.subr.bf16.mxu1 %v3436_v31  ;;  %v2242_v35 = vsub.s32 3, %v3708_v4 }
 0x139   :  { %v1976_v29 = vadd.f32 %v1975_v33, %v1935_v34  ;;  %2963 = vmatpush3.bf16.msra.mxu1 %v3437_v42  ;;  %v2238_v34 = vsub.s32 2, %v3708_v4 }
 0x13a   :  { %2964 = vmatprep.subr.bf16.mxu1 %v3438_v43 }
 0x13b   :  { %2953 = vmatpush3.bf16.msra.mxu0 %v3433_v37  ;;  %v2239_v39 = vrot.slane %v2226_v56, %v2238_v34 }
 0x13c   :  { %2954 = vmatprep.subr.bf16.mxu0 %v3434_v41 }
 0x13d   :  { %2965 = vmatpush3.bf16.msra.mxu1 %v3439_v45 }
 0x13e   :  { %2966 = vmatprep.subr.bf16.mxu1 %v3440_v46 }
 0x13f   :  { %2955 = vmatpush3.bf16.msra.mxu0 %v3435_v44 }
 0x141   :  { %2967 = vmatpush3.bf16.msra.mxu1 %v3441_v48 }
 0x142   :  { %2968 = vmatprep.subr.bf16.mxu1 %v3442_v49 }
 0x145   :  { %2969 = vmatpush3.bf16.msra.mxu1 %v3443_v50 }
 0x146   :  { %2970 = vmatprep.subr.bf16.mxu1 %v3444_v51 }
 0x149   :  { %2971 = vmatpush3.bf16.msra.mxu1 %v3445_v54 }
 0x14a   :  { %2972 = vmatprep.subr.bf16.mxu1 %v3446_v59 }
 0x14d   :  { %2973 = vmatpush3.bf16.msra.mxu1 %v3447_v62 }
 0x14e   :  { %2974 = vmatprep.subr.bf16.mxu1 %v3448_v23 }
 0x151   :  { %2975 = vmatpush3.bf16.msra.mxu1 %v3449_v12 }
 0x152   :  { %2976 = vmatprep.subr.bf16.mxu1 %v3450_v14 }
 0x155   :  { %2977 = vmatpush3.bf16.msra.mxu1 %v3451_v58 }
 0x175   :  { %v2014_v60 = vpop.f32.mrb[8].mxu0  ;;  %v2055_v61 = vpop.f32.mrb[8].mxu1 }
 0x176   :  { %v2015_v0 = vadd.f32 %v2014_v60, %v1974_v38  ;;  %v2016_v2 = vpop.f32.mrb[9].mxu0  ;;  %v2057_v3 = vpop.f32.mrb[9].mxu1 }
 0x177   :  { %v2017_v5 = vadd.f32 %v2016_v2, %v1976_v29  ;;  %v2018_v7 = vpop.f32.mrb[10].mxu0  ;;  %v2059_v8 = vpop.f32.mrb[10].mxu1  ;;  %v2243_v29 = vrot.slane %v2226_v56, %v2242_v35  ;;  %v2907_v56 = vld [vmem:[%s4576_s6] ss:$0 sm:$0xff] }
 0x178   :  { %v2056_v9 = vadd.f32 %v2055_v61, %v2015_v0  ;;  %v2019_v10 = vpop.f32.mrb[11].mxu0  ;;  %v2060_v11 = vpop.f32.mrb[11].mxu1 }
 0x179   :  { %v2058_v25 = vadd.f32 %v2057_v3, %v2017_v5 }
 0x17a   :  { %v2248_v47 = vadd.f32 %v2231_v1, %v2056_v9 }
 0x17b   :  { %v2249_v53 = vadd.f32 %v2235_v6, %v2058_v25 }
 0x17c   :  { %v2252_v13 = vmax.f32 %v2248_v47, 0.0 }
 0x17d   :  { %v2253_v52 = vmax.f32 %v2249_v53, 0.0 }
 0x17e   :  { %v2256_v16 = vpack.c.bf16 %v2252_v13, %v2252_v13 }
 0x17f   :  { %v2257_v15 = vpack.c.bf16 %v2253_v52, %v2253_v52 }
 0x181   :  { %2555 = vmatprep.mubr.bf16.mxu0 %v2257_v15 }
 0x182   :  { %2556 = vmatmul.mubr.bf16.vlgmr.msra.gmra.mrb[20].mxu0 %v2256_v16 }
 0x1b5   :  { %v2096_v24 = vpop.f32.mrb[12].mxu0  ;;  %v2137_v63 = vpop.f32.mrb[12].mxu1 }
 0x1b6   :  { %v2097_v17 = vadd.f32 %v2096_v24, %v4326_v30  ;;  %v2098_v18 = vpop.f32.mrb[13].mxu0  ;;  %v2139_v19 = vpop.f32.mrb[13].mxu1 }
 0x1b7   :  { %v2099_v20 = vadd.f32 %v2098_v18, %v4330_v32  ;;  %v2100_v21 = vpop.f32.mrb[14].mxu0  ;;  %v2141_v22 = vpop.f32.mrb[14].mxu1 }
 0x1b8   :  { %v2138_v26 = vadd.f32 %v2137_v63, %v2097_v17  ;;  %v2101_v27 = vpop.f32.mrb[15].mxu0  ;;  %v2142_v28 = vpop.f32.mrb[15].mxu1 }
 0x1b9   :  { %v2140_v33 = vadd.f32 %v2139_v19, %v2099_v20 }
 0x1f5   :  { %v2178_v36 = vpop.f32.mrb[16].mxu0  ;;  %v2219_v37 = vpop.f32.mrb[16].mxu1 }
 0x1f6   :  { %v2179_v38 = vadd.f32 %v2178_v36, %v2138_v26  ;;  %v2180_v40 = vpop.f32.mrb[17].mxu0  ;;  %v2221_v30 = vpop.f32.mrb[17].mxu1 }
 0x1f7   :  { %v2181_v41 = vadd.f32 %v2180_v40, %v2140_v33  ;;  %v2182_v31 = vpop.f32.mrb[18].mxu0  ;;  %v2223_v32 = vpop.f32.mrb[18].mxu1 }
 0x1f8   :  { %v2220_v42 = vadd.f32 %v2219_v37, %v2179_v38  ;;  %v2183_v43 = vpop.f32.mrb[19].mxu0  ;;  %v2224_v44 = vpop.f32.mrb[19].mxu1 }
 0x1f9   :  { %v2222_v45 = vadd.f32 %v2221_v30, %v2181_v41 }
 0x1fa   :  { %v2250_v46 = vadd.f32 %v2239_v39, %v2220_v42 }
 0x1fb   :  { %v2251_v48 = vadd.f32 %v2243_v29, %v2222_v45 }
 0x1fc   :  { %v2254_v49 = vmax.f32 %v2250_v46, 0.0 }
 0x1fd   :  { %v2255_v50 = vmax.f32 %v2251_v48, 0.0 }
 0x1fe   :  { %v2258_v4 = vpack.c.bf16 %v2254_v49, %v2254_v49 }
 0x1ff   :  { %v2259_v51 = vpack.c.bf16 %v2255_v50, %v2255_v50 }
 0x201   :  { %2595 = vmatprep.mubr.bf16.mxu1 %v2259_v51 }
 0x202   :  { %2596 = vmatmul.mubr.bf16.vlgmr.msra.gmra.mrb[20].mxu1 %v2258_v4 }
 0x255   :  { %v2956_v54 = vpop.f32.mrb[20].mxu0 }
 0x256   :  { %v2957_v55 = vpop.f32.mrb[21].mxu0 }
 0x257   :  { %v2958_v57 = vadd.f32 %v2957_v55, %v2956_v54  ;;  %v2959_v59 = vpop.f32.mrb[22].mxu0 }
 0x258   :  { %v2960_v60 = vpop.f32.mrb[23].mxu0 }
 0x259   :  { %v2558_v0 = vadd.f32 %v2958_v57, %v2907_v56 }
 0x2d5   :  { %v2978_v61 = vpop.f32.mrb[20].mxu1 }
 0x2d6   :  { %v2979_v62 = vpop.f32.mrb[21].mxu1 }
 0x2d7   :  { %v2980_v1 = vadd.f32 %v2979_v62, %v2978_v61  ;;  %v2981_v2 = vpop.f32.mrb[22].mxu1 }
 0x2d8   :  { %v2982_v3 = vpop.f32.mrb[23].mxu1 }
 0x2d9   :  { %v2598_v5 = vadd.f32 %v2980_v1, %v2558_v0 }
 0x2db   :  { %2604 = vst.msk [vmem:[#allocation2] sm:$0x3] %vm2603_vm0, %v2598_v5 }
 0x2dc   :  { %3463 = shalt.err (!%p3460_p4)
}
 0x2dd   :  { %s3464_s8 = scalar_lea.hbm %s4577_s7, 32 }
 0x2de   :  { %p3465_p5 = scmp.ne.s32.totalorder %s4577_s7, %s3464_s8  ;;  %p3468_p6 = scmp.lt.u32.totalorder %s3464_s8, %s4577_s7 }
 0x2e0   :  { %p3470_p7 = pnand %p3468_p6, %p3465_p5 }
 0x2e2   :  { %3473 = shalt.err (!%p3470_p7)
}
 0x2e3   :  { %2614 = dma.vmem_to_hbm [thread:$0]  %s2612_s28, 32, %s4577_s7, [#allocation3]  }
 0x2e4   :  { %3474 = dma.done.wait [#allocation3], 32  }
 0x2e5   :  { %3475 = vsyncadd [#allocation3], 4294967264 }
 0x2e6   :  { %2618 = vsyncpa [#allocation3], 1 }

</bundles_post_ra>
